<compile_context>
chip_gen: v7x
topology: tpu7x:2x2x1
jax: 0.10.0
libtpu: 0.0.40
codegen_flags: <defaults>
</compile_context>

<pallas_src>
import functools

import jax
import jax.numpy as jnp
from jax.experimental import pallas as pl
from jax.experimental.pallas import tpu as pltpu

BN_EPS = 1e-5
LANE = 128                      # pad C_out to a multiple of this (lane-dense stores)
TAIL = 16                       # halo rows fetched from the next tile (>= k_eff - 1)
MAX_TILE_L = 4096               # max output rows per grid step (multiple of 16)
VMEM_TARGET = 12 * 1024 * 1024  # target live bytes per grid step
VMEM_LIMIT = 40 * 1024 * 1024   # explicit scoped-VMEM limit (safe on v5e/v6e/v7x)
COMPUTE_DTYPE = jnp.bfloat16    # MXU operands + inter-layer activations


def _round_up(x, m):
    return (x + m - 1) // m * m


def _choose_tile_l(l_out, c_in_pad, c_out_pad):
    """Pick the output-row tile (multiple of 16), VMEM-budget aware."""
    per_row = (2 * 2 * c_in_pad          # x block, bf16, double buffered
               + 2 * 2 * c_out_pad       # y block, bf16, double buffered
               + 4 * c_out_pad           # f32 accumulator
               + 2 * 4 * c_in_pad)       # f32 window + rolled copy
    budget_rows = max(16, (VMEM_TARGET // per_row) // 16 * 16)
    tile = min(MAX_TILE_L, budget_rows, _round_up(l_out, 16))
    n_tiles = -(-l_out // tile)
    return tile, n_tiles


# ----------------------------- Pallas kernels ------------------------------

def _conv_stats_kernel(xm_ref, xt_ref, w_ref, y_ref, s1_ref, s2_ref, *,
                       k_eff, tile_l, l_out, need_mask):
    """Stride-1 conv over a contiguous window; emits y (bf16) + per-tile stats.

    xm_ref: (tile_l, C_in)  main window rows.
    xt_ref: (TAIL,  C_in)   halo rows from the next tile.
    w_ref : (k_eff, C_in, C_out) taps.
    """
    win = jnp.concatenate(
        [xm_ref[...].astype(jnp.float32), xt_ref[...].astype(jnp.float32)],
        axis=0)                                      # (tile_l + TAIL, C_in) f32
    w_rows = tile_l + TAIL

    acc = jnp.dot(win[:tile_l, :].astype(COMPUTE_DTYPE), w_ref[0],
                  preferred_element_type=jnp.float32)
    for t in range(1, k_eff):
        # shifted[i] = win[i + t]  (sublane rotate on the XLU; slices stay aligned)
        shifted = pltpu.roll(win, shift=w_rows - t, axis=0)
        acc = acc + jnp.dot(shifted[:tile_l, :].astype(COMPUTE_DTYPE), w_ref[t],
                            preferred_element_type=jnp.float32)

    y_ref[...] = acc.astype(y_ref.dtype)

    ys = acc
    if need_mask:
        # Only emitted when the padded row tile over-covers the true L_out
        # (padded rows near the boundary can see real data, so mask them).
        row = (pl.program_id(1) * tile_l
               + jax.lax.broadcasted_iota(jnp.int32, acc.shape, 0))
        ys = jnp.where(row < l_out, acc, 0.0)
    # NOTE: variance is finalized as E[y^2]-E[y]^2 in f32 (adequate at these
    # scales; a shifted/Welford merge would be safer for |mean| >> std).
    s1_ref[...] = jnp.sum(ys, axis=0, keepdims=True)
    s2_ref[...] = jnp.sum(ys * ys, axis=0, keepdims=True)


def _bn_relu_kernel(y_ref, sc_ref, sh_ref, o_ref):
    """out = relu(y * scale + shift), bf16 in / bf16 out, f32 VPU math."""
    y = y_ref[...].astype(jnp.float32)
    o_ref[...] = jnp.maximum(y * sc_ref[...] + sh_ref[...], 0.0).astype(o_ref.dtype)


def _bn_relu_conv1x1_kernel(y_ref, sc_ref, sh_ref, w1_ref, b1_ref, o_ref):
    """Last decoder BN+ReLU fused with the final 1x1 output conv (+bias)."""
    y = y_ref[...].astype(jnp.float32)
    a = jnp.maximum(y * sc_ref[...] + sh_ref[...], 0.0)
    o_ref[...] = (jnp.dot(a.astype(COMPUTE_DTYPE), w1_ref[...],
                          preferred_element_type=jnp.float32)
                  + b1_ref[...]).astype(o_ref.dtype)


# ------------------------------ launchers -----------------------------------

def _conv_stats_call(x_r, w_r, *, tile_l, n_tiles, k_eff, l_out):
    n = x_r.shape[0]
    c_in_pad = x_r.shape[-1]
    c_out_pad = w_r.shape[-1]
    need_mask = (n_tiles * tile_l != l_out)
    tail_mult = tile_l // TAIL
    kern = functools.partial(_conv_stats_kernel, k_eff=k_eff, tile_l=tile_l,
                             l_out=l_out, need_mask=need_mask)
    return pl.pallas_call(
        kern,
        out_shape=(jax.ShapeDtypeStruct((n, n_tiles * tile_l, c_out_pad),
                                        COMPUTE_DTYPE),
                   jax.ShapeDtypeStruct((n, n_tiles, 1, c_out_pad), jnp.float32),
                   jax.ShapeDtypeStruct((n, n_tiles, 1, c_out_pad), jnp.float32)),
        grid=(n, n_tiles),
        in_specs=[pl.BlockSpec((None, tile_l, c_in_pad), lambda b, j: (b, j, 0)),
                  pl.BlockSpec((None, TAIL, c_in_pad),
                               lambda b, j: (b, (j + 1) * tail_mult, 0)),
                  pl.BlockSpec((k_eff, c_in_pad, c_out_pad),
                               lambda b, j: (0, 0, 0))],
        out_specs=(pl.BlockSpec((None, tile_l, c_out_pad), lambda b, j: (b, j, 0)),
                   pl.BlockSpec((None, None, 1, c_out_pad),
                                lambda b, j: (b, j, 0, 0)),
                   pl.BlockSpec((None, None, 1, c_out_pad),
                                lambda b, j: (b, j, 0, 0))),
        compiler_params=pltpu.CompilerParams(
            dimension_semantics=("parallel", "parallel"),
            vmem_limit_bytes=VMEM_LIMIT),
    )(x_r, x_r, w_r)


def _bn_relu_call(y, scale, shift, *, tile_l):
    n, r_pad, c_pad = y.shape
    n_tiles = r_pad // tile_l
    return pl.pallas_call(
        _bn_relu_kernel,
        out_shape=jax.ShapeDtypeStruct((n, r_pad, c_pad), COMPUTE_DTYPE),
        grid=(n, n_tiles),
        in_specs=[pl.BlockSpec((None, tile_l, c_pad), lambda b, j: (b, j, 0)),
                  pl.BlockSpec((1, c_pad), lambda b, j: (0, 0)),
                  pl.BlockSpec((1, c_pad), lambda b, j: (0, 0))],
        out_specs=pl.BlockSpec((None, tile_l, c_pad), lambda b, j: (b, j, 0)),
        compiler_params=pltpu.CompilerParams(
            dimension_semantics=("parallel", "parallel"),
            vmem_limit_bytes=VMEM_LIMIT),
    )(y, scale, shift)


def _bn_relu_conv1x1_call(y, scale, shift, w1, b1, *, tile_l):
    n, r_pad, c_pad = y.shape
    c_fin = w1.shape[1]
    n_tiles = r_pad // tile_l
    return pl.pallas_call(
        _bn_relu_conv1x1_kernel,
        out_shape=jax.ShapeDtypeStruct((n, r_pad, c_fin), jnp.float32),
        grid=(n, n_tiles),
        in_specs=[pl.BlockSpec((None, tile_l, c_pad), lambda b, j: (b, j, 0)),
                  pl.BlockSpec((1, c_pad), lambda b, j: (0, 0)),
                  pl.BlockSpec((1, c_pad), lambda b, j: (0, 0)),
                  pl.BlockSpec((c_pad, c_fin), lambda b, j: (0, 0)),
                  pl.BlockSpec((1, c_fin), lambda b, j: (0, 0))],
        out_specs=pl.BlockSpec((None, tile_l, c_fin), lambda b, j: (b, j, 0)),
        compiler_params=pltpu.CompilerParams(
            dimension_semantics=("parallel", "parallel"),
            vmem_limit_bytes=VMEM_LIMIT),
    )(y, scale, shift, w1, b1)


def _bn_scale_shift(s1, s2, gamma_pad, beta_pad, count):
    """Reduce per-tile partial sums and fold BN into per-channel scale/shift."""
    tot = jnp.sum(s1, axis=(0, 1, 2))
    tot2 = jnp.sum(s2, axis=(0, 1, 2))
    mean = tot / count
    var = jnp.maximum(tot2 / count - mean * mean, 0.0)
    rstd = jax.lax.rsqrt(var + BN_EPS)
    scale = gamma_pad * rstd
    shift = beta_pad - mean * scale
    return scale.reshape(1, -1), shift.reshape(1, -1)


# --------------------------- layer wrappers (glue) ---------------------------

def _conv_bn(x_r, w_r, k_eff, c_out, gamma, beta, l_out, tile_l, n_tiles,
             output_fuse=None):
    n = x_r.shape[0]
    c_out_pad = w_r.shape[-1]
    y, s1, s2 = _conv_stats_call(x_r, w_r, tile_l=tile_l, n_tiles=n_tiles,
                                 k_eff=k_eff, l_out=l_out)
    gpad = jnp.pad(gamma.astype(jnp.float32), (0, c_out_pad - c_out))
    bpad = jnp.pad(beta.astype(jnp.float32), (0, c_out_pad - c_out))
    scale, shift = _bn_scale_shift(s1, s2, gpad, bpad, n * l_out)
    if output_fuse is None:
        out = _bn_relu_call(y, scale, shift, tile_l=tile_l)
        return out[:, :l_out, :c_out]
    w1, b1, c_fin = output_fuse
    out = _bn_relu_conv1x1_call(y, scale, shift, w1, b1, tile_l=tile_l)
    return out[:, :l_out, :c_fin]


def encoder_block(x, w, gamma, beta):
    """Conv1d(stride=2, padding=k//2) + BN + ReLU on channel-last x (N,L,C)."""
    n, l, c_in = x.shape
    c_out, _, k = w.shape
    s, pad = 2, k // 2
    l_out = (l + 2 * pad - k) // s + 1
    k_eff = (k + s - 1) // s                 # stride folded into channels
    c_in_eff = s * c_in
    c_in_pad = _round_up(c_in_eff, 8)
    c_out_pad = _round_up(c_out, LANE)
    tile_l, n_tiles = _choose_tile_l(l_out, c_in_pad, c_out_pad)
    rows = n_tiles * tile_l + TAIL

    # pad + fold stride-s into the channel dim -> stride-1 conv on (N, rows, s*C_in)
    x_p = jnp.pad(x, ((0, 0), (pad, s * rows - pad - l), (0, 0)))
    x_r = jnp.pad(x_p.reshape(n, rows, c_in_eff),
                  ((0, 0), (0, 0), (0, c_in_pad - c_in_eff))).astype(COMPUTE_DTYPE)

    # weight (C_out, C_in, k) -> (k_eff, s*C_in, C_out), extra taps zero-padded
    w_r = jnp.transpose(w, (2, 1, 0)).astype(jnp.float32)
    w_r = jnp.pad(w_r, ((0, k_eff * s - k), (0, 0), (0, 0)))
    w_r = w_r.reshape(k_eff, c_in_eff, c_out)
    w_r = jnp.pad(w_r, ((0, 0), (0, c_in_pad - c_in_eff),
                        (0, c_out_pad - c_out))).astype(COMPUTE_DTYPE)
    # conv bias dropped: it cancels exactly against the BN batch mean.
    return _conv_bn(x_r, w_r, k_eff, c_out, gamma, beta, l_out, tile_l, n_tiles)


def decoder_block(x, w, gamma, beta, output_fuse=None):
    """ConvTranspose1d(stride=2, padding=k//2, output_padding=1) + BN + ReLU."""
    n, l, c_in = x.shape
    _, c_out, k = w.shape
    s, pad, outp = 2, k // 2, 1
    l_out = (l - 1) * s - 2 * pad + k + outp
    k_eff = k
    c_in_pad = _round_up(c_in, 8)
    c_out_pad = _round_up(c_out, LANE)
    tile_l, n_tiles = _choose_tile_l(l_out, c_in_pad, c_out_pad)
    rows = n_tiles * tile_l + TAIL

    # zero-stuff by the stride, asymmetric pad -> stride-1 conv with flipped kernel
    xz = jnp.stack([x, jnp.zeros_like(x)], axis=2).reshape(n, 2 * l, c_in)
    xz = xz[:, :2 * l - 1, :]
    pad_l = k - 1 - pad
    x_r = jnp.pad(xz, ((0, 0), (pad_l, rows - pad_l - (2 * l - 1)),
                       (0, c_in_pad - c_in))).astype(COMPUTE_DTYPE)

    # weight (C_in, C_out, k) -> flipped, (k, C_in, C_out)
    w_r = jnp.transpose(jnp.flip(w, axis=-1), (2, 0, 1)).astype(jnp.float32)
    w_r = jnp.pad(w_r, ((0, 0), (0, c_in_pad - c_in),
                        (0, c_out_pad - c_out))).astype(COMPUTE_DTYPE)
    return _conv_bn(x_r, w_r, k_eff, c_out, gamma, beta, l_out, tile_l, n_tiles,
                    output_fuse=output_fuse)


# ------------------------------ model params --------------------------------

def init_fcmae_params(key, in_channels, base_dim, num_blocks, kernel_size):
    params = {"encoder": [], "decoder": []}
    c = in_channels
    for i in range(num_blocks):
        co = base_dim * 2 ** i
        key, k1, k2, k3, k4 = jax.random.split(key, 5)
        params["encoder"].append((
            0.1 * jax.random.normal(k1, (co, c, kernel_size), jnp.float32),
            0.01 * jax.random.normal(k2, (co,), jnp.float32),   # conv bias (cancels in BN)
            1.0 + 0.1 * jax.random.normal(k3, (co,), jnp.float32),   # BN gamma
            0.1 * jax.random.normal(k4, (co,), jnp.float32),         # BN beta
        ))
        c = co
    for i in reversed(range(num_blocks)):
        co = base_dim * 2 ** i
        key, k1, k2, k3, k4 = jax.random.split(key, 5)
        params["decoder"].append((
            0.1 * jax.random.normal(k1, (c, co, kernel_size), jnp.float32),
            0.01 * jax.random.normal(k2, (co,), jnp.float32),
            1.0 + 0.1 * jax.random.normal(k3, (co,), jnp.float32),
            0.1 * jax.random.normal(k4, (co,), jnp.float32),
        ))
        c = co
    key, k1, k2 = jax.random.split(key, 3)
    params["output"] = (
        0.1 * jax.random.normal(k1, (in_channels, c, 1), jnp.float32),
        0.01 * jax.random.normal(k2, (in_channels,), jnp.float32),
    )
    return params


def fcmae_forward(params, x, kernel_size=7):
    del kernel_size  # taken from the weight shapes
    x = jnp.transpose(x, (0, 2, 1)).astype(COMPUTE_DTYPE)        # NCL -> NLC

    for (w, _b, g, bt) in params["encoder"]:
        x = encoder_block(x, w, g, bt)

    # fold the 1x1 output conv (+bias) into the last decoder's BN+ReLU kernel
    w_out, b_out = params["output"]
    c_last = params["decoder"][-1][0].shape[1]
    c_last_pad = _round_up(c_last, LANE)
    c_fin = w_out.shape[0]
    c_fin_pad = _round_up(c_fin, LANE)
    w1 = jnp.pad(jnp.transpose(w_out[:, :, 0], (1, 0)).astype(jnp.float32),
                 ((0, c_last_pad - c_last), (0, c_fin_pad - c_fin))
                 ).astype(COMPUTE_DTYPE)
    b1 = jnp.pad(b_out.astype(jnp.float32), (0, c_fin_pad - c_fin)).reshape(1, -1)

    n_dec = len(params["decoder"])
    for idx, (w, _b, g, bt) in enumerate(params["decoder"]):
        fuse = (w1, b1, c_fin) if idx == n_dec - 1 else None
        x = decoder_block(x, w, g, bt, output_fuse=fuse)

    return jnp.transpose(x, (0, 2, 1))                            # NLC -> NCL (f32)


# ---------------------------------- main -------------------------------------

if __name__ == "__main__":
    in_channels, base_dim, num_blocks, kernel_size = 2, 8, 3, 7
    batch, length = 2, 16

    x = jax.random.normal(jax.random.PRNGKey(0),
                          (batch, in_channels, length), jnp.float32)
    params = init_fcmae_params(jax.random.PRNGKey(1),
                               in_channels, base_dim, num_blocks, kernel_size)

    y = jax.jit(lambda p, xx: fcmae_forward(p, xx, kernel_size))(params, x)
    y = jax.block_until_ready(y)

    assert y.shape == (batch, in_channels, length), y.shape
    assert bool(jnp.all(jnp.isfinite(y)))
    print("KERNEL_OK")
</pallas_src>

<mosaic_0001>
module attributes {stable_mosaic.version = 11 : i64} {
  func.func @_bn_relu_kernel(%arg0: i32, %arg1: i32, %arg2: memref<1x16x128xbf16, #tpu.memory_space<vmem>>, %arg3: memref<1x128xf32, #tpu.memory_space<vmem>>, %arg4: memref<1x128xf32, #tpu.memory_space<vmem>>, %arg5: memref<1x16x128xbf16, #tpu.memory_space<vmem>>) attributes {dimension_semantics = [#tpu.dimension_semantics<parallel>, #tpu.dimension_semantics<parallel>], iteration_bounds = array<i64: 2, 1>, scalar_prefetch = 0 : i64, scratch_operands = 0 : i64, tpu.core_type = #tpu.core_type<tc>, window_params = [{transform_indices = @transform_0, window_bounds = array<i64: 1, 16, 128>}, {pipeline_mode = #tpu.pipeline_mode<synchronous>, transform_indices = @transform_1, window_bounds = array<i64: 1, 128>}, {pipeline_mode = #tpu.pipeline_mode<synchronous>, transform_indices = @transform_2, window_bounds = array<i64: 1, 128>}, {transform_indices = @transform_3, window_bounds = array<i64: 1, 16, 128>}]} {
    %c0 = arith.constant 0 : index
    %c0_0 = arith.constant 0 : index
    %c0_1 = arith.constant 0 : index
    %0 = vector.load %arg2[%c0, %c0_0, %c0_1] : memref<1x16x128xbf16, #tpu.memory_space<vmem>>, vector<1x16x128xbf16>
    %1 = vector.shape_cast %0 : vector<1x16x128xbf16> to vector<16x128xbf16>
    %2 = arith.extf %1 : vector<16x128xbf16> to vector<16x128xf32>
    %c0_2 = arith.constant 0 : index
    %c0_3 = arith.constant 0 : index
    %3 = vector.load %arg3[%c0_2, %c0_3] : memref<1x128xf32, #tpu.memory_space<vmem>>, vector<1x128xf32>
    %4 = vector.broadcast %3 : vector<1x128xf32> to vector<16x128xf32>
    %5 = arith.mulf %2, %4 : vector<16x128xf32>
    %c0_4 = arith.constant 0 : index
    %c0_5 = arith.constant 0 : index
    %6 = vector.load %arg4[%c0_4, %c0_5] : memref<1x128xf32, #tpu.memory_space<vmem>>, vector<1x128xf32>
    %7 = vector.broadcast %6 : vector<1x128xf32> to vector<16x128xf32>
    %8 = arith.addf %5, %7 : vector<16x128xf32>
    %cst = arith.constant 0.000000e+00 : f32
    %9 = vector.broadcast %cst : f32 to vector<16x128xf32>
    %10 = arith.maximumf %8, %9 : vector<16x128xf32>
    %11 = arith.truncf %10 : vector<16x128xf32> to vector<16x128xbf16>
    %c0_6 = arith.constant 0 : index
    %c0_7 = arith.constant 0 : index
    %c0_8 = arith.constant 0 : index
    %12 = vector.load %arg5[%c0_6, %c0_7, %c0_8] : memref<1x16x128xbf16, #tpu.memory_space<vmem>>, vector<1x16x128xbf16>
    %13 = vector.shape_cast %12 : vector<1x16x128xbf16> to vector<16x128xbf16>
    %14 = vector.shape_cast %11 : vector<16x128xbf16> to vector<1x16x128xbf16>
    tpu.vector_store %arg5[%c0_6, %c0_7, %c0_8], %14 {strides = array<i32>} : memref<1x16x128xbf16, #tpu.memory_space<vmem>>, vector<1x16x128xbf16>,
    return
  }
  func.func @transform_0(%arg0: i32, %arg1: i32) -> (i32, i32, i32) {
    %c0_i32 = arith.constant 0 : i32
    %c0_i32_0 = arith.constant 0 : i32
    return %arg0, %arg1, %c0_i32 : i32, i32, i32
  }
  func.func @transform_1(%arg0: i32, %arg1: i32) -> (i32, i32) {
    %c0_i32 = arith.constant 0 : i32
    %c0_i32_0 = arith.constant 0 : i32
    %c0_i32_1 = arith.constant 0 : i32
    return %c0_i32, %c0_i32_0 : i32, i32
  }
  func.func @transform_2(%arg0: i32, %arg1: i32) -> (i32, i32) {
    %c0_i32 = arith.constant 0 : i32
    %c0_i32_0 = arith.constant 0 : i32
    %c0_i32_1 = arith.constant 0 : i32
    return %c0_i32, %c0_i32_0 : i32, i32
  }
  func.func @transform_3(%arg0: i32, %arg1: i32) -> (i32, i32, i32) {
    %c0_i32 = arith.constant 0 : i32
    %c0_i32_0 = arith.constant 0 : i32
    return %arg0, %arg1, %c0_i32 : i32, i32, i32
  }
}

module attributes {stable_mosaic.version = 11 : i64} {
  func.func @_conv_stats_kernel(%arg0: i32, %arg1: i32, %arg2: memref<1x16x8xbf16, #tpu.memory_space<vmem>>, %arg3: memref<1x16x8xbf16, #tpu.memory_space<vmem>>, %arg4: memref<4x8x128xbf16, #tpu.memory_space<vmem>>, %arg5: memref<1x16x128xbf16, #tpu.memory_space<vmem>>, %arg6: memref<1x1x1x128xf32, #tpu.memory_space<vmem>>, %arg7: memref<1x1x1x128xf32, #tpu.memory_space<vmem>>) attributes {dimension_semantics = [#tpu.dimension_semantics<parallel>, #tpu.dimension_semantics<parallel>], iteration_bounds = array<i64: 2, 1>, scalar_prefetch = 0 : i64, scratch_operands = 0 : i64, tpu.core_type = #tpu.core_type<tc>, window_params = [{transform_indices = @transform_0, window_bounds = array<i64: 1, 16, 8>}, {transform_indices = @transform_1, window_bounds = array<i64: 1, 16, 8>}, {pipeline_mode = #tpu.pipeline_mode<synchronous>, transform_indices = @transform_2, window_bounds = array<i64: 4, 8, 128>}, {transform_indices = @transform_3, window_bounds = array<i64: 1, 16, 128>}, {transform_indices = @transform_4, window_bounds = array<i64: 1, 1, 1, 128>}, {transform_indices = @transform_5, window_bounds = array<i64: 1, 1, 1, 128>}]} {
    %c0 = arith.constant 0 : index
    %c0_0 = arith.constant 0 : index
    %c0_1 = arith.constant 0 : index
    %0 = vector.load %arg2[%c0, %c0_0, %c0_1] : memref<1x16x8xbf16, #tpu.memory_space<vmem>>, vector<1x16x8xbf16>
    %1 = vector.shape_cast %0 : vector<1x16x8xbf16> to vector<16x8xbf16>
    %2 = arith.extf %1 : vector<16x8xbf16> to vector<16x8xf32>
    %c0_2 = arith.constant 0 : index
    %c0_3 = arith.constant 0 : index
    %c0_4 = arith.constant 0 : index
    %3 = vector.load %arg3[%c0_2, %c0_3, %c0_4] : memref<1x16x8xbf16, #tpu.memory_space<vmem>>, vector<1x16x8xbf16>
    %4 = vector.shape_cast %3 : vector<1x16x8xbf16> to vector<16x8xbf16>
    %5 = arith.extf %4 : vector<16x8xbf16> to vector<16x8xf32>
    %6 = tpu.concatenate %2, %5 in 0 : vector<16x8xf32>, vector<16x8xf32> -> vector<32x8xf32>
    %7 = vector.extract_strided_slice %6 {offsets = [0, 0], sizes = [16, 8], strides = [1, 1]} : vector<32x8xf32> to vector<16x8xf32>
    %8 = arith.truncf %7 : vector<16x8xf32> to vector<16x8xbf16>
    %c0_5 = arith.constant 0 : index
    %c0_6 = arith.constant 0 : index
    %c0_7 = arith.constant 0 : index
    %9 = vector.load %arg4[%c0_5, %c0_6, %c0_7] : memref<4x8x128xbf16, #tpu.memory_space<vmem>>, vector<1x8x128xbf16>
    %10 = vector.shape_cast %9 : vector<1x8x128xbf16> to vector<8x128xbf16>
    %cst = arith.constant dense<0.000000e+00> : vector<16x128xf32>
    %11 = tpu.matmul %8, %10, %cst {dimension_numbers = #tpu.dot_dimension_numbers<[1], [0], [0], [1], [0, 0, 1, 1], [], []>} : vector<16x8xbf16>, vector<8x128xbf16>, vector<16x128xf32> -> vector<16x128xf32>
    %c31_i32 = arith.constant 31 : i32
    %12 = tpu.dynamic_rotate %6 by %c31_i32 dim 0 : vector<32x8xf32>, i32 -> vector<32x8xf32>
    %13 = vector.extract_strided_slice %12 {offsets = [0, 0], sizes = [16, 8], strides = [1, 1]} : vector<32x8xf32> to vector<16x8xf32>
    %14 = arith.truncf %13 : vector<16x8xf32> to vector<16x8xbf16>
    %c1 = arith.constant 1 : index
    %c0_8 = arith.constant 0 : index
    %c0_9 = arith.constant 0 : index
    %15 = vector.load %arg4[%c1, %c0_8, %c0_9] : memref<4x8x128xbf16, #tpu.memory_space<vmem>>, vector<1x8x128xbf16>
    %16 = vector.shape_cast %15 : vector<1x8x128xbf16> to vector<8x128xbf16>
    %cst_10 = arith.constant dense<0.000000e+00> : vector<16x128xf32>
    %17 = tpu.matmul %14, %16, %cst_10 {dimension_numbers = #tpu.dot_dimension_numbers<[1], [0], [0], [1], [0, 0, 1, 1], [], []>} : vector<16x8xbf16>, vector<8x128xbf16>, vector<16x128xf32> -> vector<16x128xf32>
    %18 = arith.addf %11, %17 : vector<16x128xf32>
    %c30_i32 = arith.constant 30 : i32
    %19 = tpu.dynamic_rotate %6 by %c30_i32 dim 0 : vector<32x8xf32>, i32 -> vector<32x8xf32>
    %20 = vector.extract_strided_slice %19 {offsets = [0, 0], sizes = [16, 8], strides = [1, 1]} : vector<32x8xf32> to vector<16x8xf32>
    %21 = arith.truncf %20 : vector<16x8xf32> to vector<16x8xbf16>
    %c2 = arith.constant 2 : index
    %c0_11 = arith.constant 0 : index
    %c0_12 = arith.constant 0 : index
    %22 = vector.load %arg4[%c2, %c0_11, %c0_12] : memref<4x8x128xbf16, #tpu.memory_space<vmem>>, vector<1x8x128xbf16>
    %23 = vector.shape_cast %22 : vector<1x8x128xbf16> to vector<8x128xbf16>
    %cst_13 = arith.constant dense<0.000000e+00> : vector<16x128xf32>
    %24 = tpu.matmul %21, %23, %cst_13 {dimension_numbers = #tpu.dot_dimension_numbers<[1], [0], [0], [1], [0, 0, 1, 1], [], []>} : vector<16x8xbf16>, vector<8x128xbf16>, vector<16x128xf32> -> vector<16x128xf32>
    %25 = arith.addf %18, %24 : vector<16x128xf32>
    %c29_i32 = arith.constant 29 : i32
    %26 = tpu.dynamic_rotate %6 by %c29_i32 dim 0 : vector<32x8xf32>, i32 -> vector<32x8xf32>
    %27 = vector.extract_strided_slice %26 {offsets = [0, 0], sizes = [16, 8], strides = [1, 1]} : vector<32x8xf32> to vector<16x8xf32>
    %28 = arith.truncf %27 : vector<16x8xf32> to vector<16x8xbf16>
    %c3 = arith.constant 3 : index
    %c0_14 = arith.constant 0 : index
    %c0_15 = arith.constant 0 : index
    %29 = vector.load %arg4[%c3, %c0_14, %c0_15] : memref<4x8x128xbf16, #tpu.memory_space<vmem>>, vector<1x8x128xbf16>
    %30 = vector.shape_cast %29 : vector<1x8x128xbf16> to vector<8x128xbf16>
    %cst_16 = arith.constant dense<0.000000e+00> : vector<16x128xf32>
    %31 = tpu.matmul %28, %30, %cst_16 {dimension_numbers = #tpu.dot_dimension_numbers<[1], [0], [0], [1], [0, 0, 1, 1], [], []>} : vector<16x8xbf16>, vector<8x128xbf16>, vector<16x128xf32> -> vector<16x128xf32>
    %32 = arith.addf %25, %31 : vector<16x128xf32>
    %33 = arith.truncf %32 : vector<16x128xf32> to vector<16x128xbf16>
    %c0_17 = arith.constant 0 : index
    %c0_18 = arith.constant 0 : index
    %c0_19 = arith.constant 0 : index
    %34 = vector.load %arg5[%c0_17, %c0_18, %c0_19] : memref<1x16x128xbf16, #tpu.memory_space<vmem>>, vector<1x16x128xbf16>
    %35 = vector.shape_cast %34 : vector<1x16x128xbf16> to vector<16x128xbf16>
    %36 = vector.shape_cast %33 : vector<16x128xbf16> to vector<1x16x128xbf16>
    tpu.vector_store %arg5[%c0_17, %c0_18, %c0_19], %36 {strides = array<i32>} : memref<1x16x128xbf16, #tpu.memory_space<vmem>>, vector<1x16x128xbf16>,
    %c16_i32 = arith.constant 16 : i32
    %37 = arith.muli %arg1, %c16_i32 : i32
    %38 = tpu.iota {dimensions = array<i32: 0>} : vector<16x128xi32>
    %39 = vector.broadcast %37 : i32 to vector<16x128xi32>
    %40 = arith.addi %39, %38 : vector<16x128xi32>
    %c8_i32 = arith.constant 8 : i32
    %41 = vector.broadcast %c8_i32 : i32 to vector<16x128xi32>
    %42 = arith.cmpi slt, %40, %41 : vector<16x128xi32>
    %cst_20 = arith.constant 0.000000e+00 : f32
    %43 = vector.broadcast %cst_20 : f32 to vector<16x128xf32>
    %44 = arith.select %42, %32, %43 : vector<16x128xi1>, vector<16x128xf32>
    %cst_21 = arith.constant dense<0.000000e+00> : vector<128xf32>
    %45 = vector.multi_reduction <add>, %44, %cst_21 [0] : vector<16x128xf32> to vector<128xf32>
    %46 = vector.shape_cast %45 : vector<128xf32> to vector<1x128xf32>
    %c0_22 = arith.constant 0 : index
    %c0_23 = arith.constant 0 : index
    %c0_24 = arith.constant 0 : index
    %c0_25 = arith.constant 0 : index
    %47 = vector.load %arg6[%c0_22, %c0_23, %c0_24, %c0_25] : memref<1x1x1x128xf32, #tpu.memory_space<vmem>>, vector<1x1x1x128xf32>
    %48 = vector.shape_cast %47 : vector<1x1x1x128xf32> to vector<1x128xf32>
    %49 = vector.shape_cast %46 : vector<1x128xf32> to vector<1x1x1x128xf32>
    tpu.vector_store %arg6[%c0_22, %c0_23, %c0_24, %c0_25], %49 {strides = array<i32>} : memref<1x1x1x128xf32, #tpu.memory_space<vmem>>, vector<1x1x1x128xf32>,
    %50 = arith.mulf %44, %44 : vector<16x128xf32>
    %cst_26 = arith.constant dense<0.000000e+00> : vector<128xf32>
    %51 = vector.multi_reduction <add>, %50, %cst_26 [0] : vector<16x128xf32> to vector<128xf32>
    %52 = vector.shape_cast %51 : vector<128xf32> to vector<1x128xf32>
    %c0_27 = arith.constant 0 : index
    %c0_28 = arith.constant 0 : index
    %c0_29 = arith.constant 0 : index
    %c0_30 = arith.constant 0 : index
    %53 = vector.load %arg7[%c0_27, %c0_28, %c0_29, %c0_30] : memref<1x1x1x128xf32, #tpu.memory_space<vmem>>, vector<1x1x1x128xf32>
    %54 = vector.shape_cast %53 : vector<1x1x1x128xf32> to vector<1x128xf32>
    %55 = vector.shape_cast %52 : vector<1x128xf32> to vector<1x1x1x128xf32>
    tpu.vector_store %arg7[%c0_27, %c0_28, %c0_29, %c0_30], %55 {strides = array<i32>} : memref<1x1x1x128xf32, #tpu.memory_space<vmem>>, vector<1x1x1x128xf32>,
    return
  }
  func.func @transform_0(%arg0: i32, %arg1: i32) -> (i32, i32, i32) {
    %c0_i32 = arith.constant 0 : i32
    %c0_i32_0 = arith.constant 0 : i32
    return %arg0, %arg1, %c0_i32 : i32, i32, i32
  }
  func.func @transform_1(%arg0: i32, %arg1: i32) -> (i32, i32, i32) {
    %c1_i32 = arith.constant 1 : i32
    %0 = arith.addi %arg1, %c1_i32 : i32
    %c1_i32_0 = arith.constant 1 : i32
    %1 = arith.muli %0, %c1_i32_0 : i32
    %c0_i32 = arith.constant 0 : i32
    %c0_i32_1 = arith.constant 0 : i32
    return %arg0, %1, %c0_i32 : i32, i32, i32
  }
  func.func @transform_2(%arg0: i32, %arg1: i32) -> (i32, i32, i32) {
    %c0_i32 = arith.constant 0 : i32
    %c0_i32_0 = arith.constant 0 : i32
    %c0_i32_1 = arith.constant 0 : i32
    %c0_i32_2 = arith.constant 0 : i32
    return %c0_i32, %c0_i32_0, %c0_i32_1 : i32, i32, i32
  }
  func.func @transform_3(%arg0: i32, %arg1: i32) -> (i32, i32, i32) {
    %c0_i32 = arith.constant 0 : i32
    %c0_i32_0 = arith.constant 0 : i32
    return %arg0, %arg1, %c0_i32 : i32, i32, i32
  }
  func.func @transform_4(%arg0: i32, %arg1: i32) -> (i32, i32, i32, i32) {
    %c0_i32 = arith.constant 0 : i32
    %c0_i32_0 = arith.constant 0 : i32
    %c0_i32_1 = arith.constant 0 : i32
    return %arg0, %arg1, %c0_i32, %c0_i32_0 : i32, i32, i32, i32
  }
  func.func @transform_5(%arg0: i32, %arg1: i32) -> (i32, i32, i32, i32) {
    %c0_i32 = arith.constant 0 : i32
    %c0_i32_0 = arith.constant 0 : i32
    %c0_i32_1 = arith.constant 0 : i32
    return %arg0, %arg1, %c0_i32, %c0_i32_0 : i32, i32, i32, i32
  }
}

module attributes {stable_mosaic.version = 11 : i64} {
  func.func @_conv_stats_kernel(%arg0: i32, %arg1: i32, %arg2: memref<1x16x16xbf16, #tpu.memory_space<vmem>>, %arg3: memref<1x16x16xbf16, #tpu.memory_space<vmem>>, %arg4: memref<4x16x128xbf16, #tpu.memory_space<vmem>>, %arg5: memref<1x16x128xbf16, #tpu.memory_space<vmem>>, %arg6: memref<1x1x1x128xf32, #tpu.memory_space<vmem>>, %arg7: memref<1x1x1x128xf32, #tpu.memory_space<vmem>>) attributes {dimension_semantics = [#tpu.dimension_semantics<parallel>, #tpu.dimension_semantics<parallel>], iteration_bounds = array<i64: 2, 1>, scalar_prefetch = 0 : i64, scratch_operands = 0 : i64, tpu.core_type = #tpu.core_type<tc>, window_params = [{transform_indices = @transform_0, window_bounds = array<i64: 1, 16, 16>}, {transform_indices = @transform_1, window_bounds = array<i64: 1, 16, 16>}, {pipeline_mode = #tpu.pipeline_mode<synchronous>, transform_indices = @transform_2, window_bounds = array<i64: 4, 16, 128>}, {transform_indices = @transform_3, window_bounds = array<i64: 1, 16, 128>}, {transform_indices = @transform_4, window_bounds = array<i64: 1, 1, 1, 128>}, {transform_indices = @transform_5, window_bounds = array<i64: 1, 1, 1, 128>}]} {
    %c0 = arith.constant 0 : index
    %c0_0 = arith.constant 0 : index
    %c0_1 = arith.constant 0 : index
    %0 = vector.load %arg2[%c0, %c0_0, %c0_1] : memref<1x16x16xbf16, #tpu.memory_space<vmem>>, vector<1x16x16xbf16>
    %1 = vector.shape_cast %0 : vector<1x16x16xbf16> to vector<16x16xbf16>
    %2 = arith.extf %1 : vector<16x16xbf16> to vector<16x16xf32>
    %c0_2 = arith.constant 0 : index
    %c0_3 = arith.constant 0 : index
    %c0_4 = arith.constant 0 : index
    %3 = vector.load %arg3[%c0_2, %c0_3, %c0_4] : memref<1x16x16xbf16, #tpu.memory_space<vmem>>, vector<1x16x16xbf16>
    %4 = vector.shape_cast %3 : vector<1x16x16xbf16> to vector<16x16xbf16>
    %5 = arith.extf %4 : vector<16x16xbf16> to vector<16x16xf32>
    %6 = tpu.concatenate %2, %5 in 0 : vector<16x16xf32>, vector<16x16xf32> -> vector<32x16xf32>
    %7 = vector.extract_strided_slice %6 {offsets = [0, 0], sizes = [16, 16], strides = [1, 1]} : vector<32x16xf32> to vector<16x16xf32>
    %8 = arith.truncf %7 : vector<16x16xf32> to vector<16x16xbf16>
    %c0_5 = arith.constant 0 : index
    %c0_6 = arith.constant 0 : index
    %c0_7 = arith.constant 0 : index
    %9 = vector.load %arg4[%c0_5, %c0_6, %c0_7] : memref<4x16x128xbf16, #tpu.memory_space<vmem>>, vector<1x16x128xbf16>
    %10 = vector.shape_cast %9 : vector<1x16x128xbf16> to vector<16x128xbf16>
    %cst = arith.constant dense<0.000000e+00> : vector<16x128xf32>
    %11 = tpu.matmul %8, %10, %cst {dimension_numbers = #tpu.dot_dimension_numbers<[1], [0], [0], [1], [0, 0, 1, 1], [], []>} : vector<16x16xbf16>, vector<16x128xbf16>, vector<16x128xf32> -> vector<16x128xf32>
    %c31_i32 = arith.constant 31 : i32
    %12 = tpu.dynamic_rotate %6 by %c31_i32 dim 0 : vector<32x16xf32>, i32 -> vector<32x16xf32>
    %13 = vector.extract_strided_slice %12 {offsets = [0, 0], sizes = [16, 16], strides = [1, 1]} : vector<32x16xf32> to vector<16x16xf32>
    %14 = arith.truncf %13 : vector<16x16xf32> to vector<16x16xbf16>
    %c1 = arith.constant 1 : index
    %c0_8 = arith.constant 0 : index
    %c0_9 = arith.constant 0 : index
    %15 = vector.load %arg4[%c1, %c0_8, %c0_9] : memref<4x16x128xbf16, #tpu.memory_space<vmem>>, vector<1x16x128xbf16>
    %16 = vector.shape_cast %15 : vector<1x16x128xbf16> to vector<16x128xbf16>
    %cst_10 = arith.constant dense<0.000000e+00> : vector<16x128xf32>
    %17 = tpu.matmul %14, %16, %cst_10 {dimension_numbers = #tpu.dot_dimension_numbers<[1], [0], [0], [1], [0, 0, 1, 1], [], []>} : vector<16x16xbf16>, vector<16x128xbf16>, vector<16x128xf32> -> vector<16x128xf32>
    %18 = arith.addf %11, %17 : vector<16x128xf32>
    %c30_i32 = arith.constant 30 : i32
    %19 = tpu.dynamic_rotate %6 by %c30_i32 dim 0 : vector<32x16xf32>, i32 -> vector<32x16xf32>
    %20 = vector.extract_strided_slice %19 {offsets = [0, 0], sizes = [16, 16], strides = [1, 1]} : vector<32x16xf32> to vector<16x16xf32>
    %21 = arith.truncf %20 : vector<16x16xf32> to vector<16x16xbf16>
    %c2 = arith.constant 2 : index
    %c0_11 = arith.constant 0 : index
    %c0_12 = arith.constant 0 : index
    %22 = vector.load %arg4[%c2, %c0_11, %c0_12] : memref<4x16x128xbf16, #tpu.memory_space<vmem>>, vector<1x16x128xbf16>
    %23 = vector.shape_cast %22 : vector<1x16x128xbf16> to vector<16x128xbf16>
    %cst_13 = arith.constant dense<0.000000e+00> : vector<16x128xf32>
    %24 = tpu.matmul %21, %23, %cst_13 {dimension_numbers = #tpu.dot_dimension_numbers<[1], [0], [0], [1], [0, 0, 1, 1], [], []>} : vector<16x16xbf16>, vector<16x128xbf16>, vector<16x128xf32> -> vector<16x128xf32>
    %25 = arith.addf %18, %24 : vector<16x128xf32>
    %c29_i32 = arith.constant 29 : i32
    %26 = tpu.dynamic_rotate %6 by %c29_i32 dim 0 : vector<32x16xf32>, i32 -> vector<32x16xf32>
    %27 = vector.extract_strided_slice %26 {offsets = [0, 0], sizes = [16, 16], strides = [1, 1]} : vector<32x16xf32> to vector<16x16xf32>
    %28 = arith.truncf %27 : vector<16x16xf32> to vector<16x16xbf16>
    %c3 = arith.constant 3 : index
    %c0_14 = arith.constant 0 : index
    %c0_15 = arith.constant 0 : index
    %29 = vector.load %arg4[%c3, %c0_14, %c0_15] : memref<4x16x128xbf16, #tpu.memory_space<vmem>>, vector<1x16x128xbf16>
    %30 = vector.shape_cast %29 : vector<1x16x128xbf16> to vector<16x128xbf16>
    %cst_16 = arith.constant dense<0.000000e+00> : vector<16x128xf32>
    %31 = tpu.matmul %28, %30, %cst_16 {dimension_numbers = #tpu.dot_dimension_numbers<[1], [0], [0], [1], [0, 0, 1, 1], [], []>} : vector<16x16xbf16>, vector<16x128xbf16>, vector<16x128xf32> -> vector<16x128xf32>
    %32 = arith.addf %25, %31 : vector<16x128xf32>
    %33 = arith.truncf %32 : vector<16x128xf32> to vector<16x128xbf16>
    %c0_17 = arith.constant 0 : index
    %c0_18 = arith.constant 0 : index
    %c0_19 = arith.constant 0 : index
    %34 = vector.load %arg5[%c0_17, %c0_18, %c0_19] : memref<1x16x128xbf16, #tpu.memory_space<vmem>>, vector<1x16x128xbf16>
    %35 = vector.shape_cast %34 : vector<1x16x128xbf16> to vector<16x128xbf16>
    %36 = vector.shape_cast %33 : vector<16x128xbf16> to vector<1x16x128xbf16>
    tpu.vector_store %arg5[%c0_17, %c0_18, %c0_19], %36 {strides = array<i32>} : memref<1x16x128xbf16, #tpu.memory_space<vmem>>, vector<1x16x128xbf16>,
    %c16_i32 = arith.constant 16 : i32
    %37 = arith.muli %arg1, %c16_i32 : i32
    %38 = tpu.iota {dimensions = array<i32: 0>} : vector<16x128xi32>
    %39 = vector.broadcast %37 : i32 to vector<16x128xi32>
    %40 = arith.addi %39, %38 : vector<16x128xi32>
    %c4_i32 = arith.constant 4 : i32
    %41 = vector.broadcast %c4_i32 : i32 to vector<16x128xi32>
    %42 = arith.cmpi slt, %40, %41 : vector<16x128xi32>
    %cst_20 = arith.constant 0.000000e+00 : f32
    %43 = vector.broadcast %cst_20 : f32 to vector<16x128xf32>
    %44 = arith.select %42, %32, %43 : vector<16x128xi1>, vector<16x128xf32>
    %cst_21 = arith.constant dense<0.000000e+00> : vector<128xf32>
    %45 = vector.multi_reduction <add>, %44, %cst_21 [0] : vector<16x128xf32> to vector<128xf32>
    %46 = vector.shape_cast %45 : vector<128xf32> to vector<1x128xf32>
    %c0_22 = arith.constant 0 : index
    %c0_23 = arith.constant 0 : index
    %c0_24 = arith.constant 0 : index
    %c0_25 = arith.constant 0 : index
    %47 = vector.load %arg6[%c0_22, %c0_23, %c0_24, %c0_25] : memref<1x1x1x128xf32, #tpu.memory_space<vmem>>, vector<1x1x1x128xf32>
    %48 = vector.shape_cast %47 : vector<1x1x1x128xf32> to vector<1x128xf32>
    %49 = vector.shape_cast %46 : vector<1x128xf32> to vector<1x1x1x128xf32>
    tpu.vector_store %arg6[%c0_22, %c0_23, %c0_24, %c0_25], %49 {strides = array<i32>} : memref<1x1x1x128xf32, #tpu.memory_space<vmem>>, vector<1x1x1x128xf32>,
    %50 = arith.mulf %44, %44 : vector<16x128xf32>
    %cst_26 = arith.constant dense<0.000000e+00> : vector<128xf32>
    %51 = vector.multi_reduction <add>, %50, %cst_26 [0] : vector<16x128xf32> to vector<128xf32>
    %52 = vector.shape_cast %51 : vector<128xf32> to vector<1x128xf32>
    %c0_27 = arith.constant 0 : index
    %c0_28 = arith.constant 0 : index
    %c0_29 = arith.constant 0 : index
    %c0_30 = arith.constant 0 : index
    %53 = vector.load %arg7[%c0_27, %c0_28, %c0_29, %c0_30] : memref<1x1x1x128xf32, #tpu.memory_space<vmem>>, vector<1x1x1x128xf32>
    %54 = vector.shape_cast %53 : vector<1x1x1x128xf32> to vector<1x128xf32>
    %55 = vector.shape_cast %52 : vector<1x128xf32> to vector<1x1x1x128xf32>
    tpu.vector_store %arg7[%c0_27, %c0_28, %c0_29, %c0_30], %55 {strides = array<i32>} : memref<1x1x1x128xf32, #tpu.memory_space<vmem>>, vector<1x1x1x128xf32>,
    return
  }
  func.func @transform_0(%arg0: i32, %arg1: i32) -> (i32, i32, i32) {
    %c0_i32 = arith.constant 0 : i32
    %c0_i32_0 = arith.constant 0 : i32
    return %arg0, %arg1, %c0_i32 : i32, i32, i32
  }
  func.func @transform_1(%arg0: i32, %arg1: i32) -> (i32, i32, i32) {
    %c1_i32 = arith.constant 1 : i32
    %0 = arith.addi %arg1, %c1_i32 : i32
    %c1_i32_0 = arith.constant 1 : i32
    %1 = arith.muli %0, %c1_i32_0 : i32
    %c0_i32 = arith.constant 0 : i32
    %c0_i32_1 = arith.constant 0 : i32
    return %arg0, %1, %c0_i32 : i32, i32, i32
  }
  func.func @transform_2(%arg0: i32, %arg1: i32) -> (i32, i32, i32) {
    %c0_i32 = arith.constant 0 : i32
    %c0_i32_0 = arith.constant 0 : i32
    %c0_i32_1 = arith.constant 0 : i32
    %c0_i32_2 = arith.constant 0 : i32
    return %c0_i32, %c0_i32_0, %c0_i32_1 : i32, i32, i32
  }
  func.func @transform_3(%arg0: i32, %arg1: i32) -> (i32, i32, i32) {
    %c0_i32 = arith.constant 0 : i32
    %c0_i32_0 = arith.constant 0 : i32
    return %arg0, %arg1, %c0_i32 : i32, i32, i32
  }
  func.func @transform_4(%arg0: i32, %arg1: i32) -> (i32, i32, i32, i32) {
    %c0_i32 = arith.constant 0 : i32
    %c0_i32_0 = arith.constant 0 : i32
    %c0_i32_1 = arith.constant 0 : i32
    return %arg0, %arg1, %c0_i32, %c0_i32_0 : i32, i32, i32, i32
  }
  func.func @transform_5(%arg0: i32, %arg1: i32) -> (i32, i32, i32, i32) {
    %c0_i32 = arith.constant 0 : i32
    %c0_i32_0 = arith.constant 0 : i32
    %c0_i32_1 = arith.constant 0 : i32
    return %arg0, %arg1, %c0_i32, %c0_i32_0 : i32, i32, i32, i32
  }
}

module attributes {stable_mosaic.version = 11 : i64} {
  func.func @_conv_stats_kernel(%arg0: i32, %arg1: i32, %arg2: memref<1x16x32xbf16, #tpu.memory_space<vmem>>, %arg3: memref<1x16x32xbf16, #tpu.memory_space<vmem>>, %arg4: memref<4x32x128xbf16, #tpu.memory_space<vmem>>, %arg5: memref<1x16x128xbf16, #tpu.memory_space<vmem>>, %arg6: memref<1x1x1x128xf32, #tpu.memory_space<vmem>>, %arg7: memref<1x1x1x128xf32, #tpu.memory_space<vmem>>) attributes {dimension_semantics = [#tpu.dimension_semantics<parallel>, #tpu.dimension_semantics<parallel>], iteration_bounds = array<i64: 2, 1>, scalar_prefetch = 0 : i64, scratch_operands = 0 : i64, tpu.core_type = #tpu.core_type<tc>, window_params = [{transform_indices = @transform_0, window_bounds = array<i64: 1, 16, 32>}, {transform_indices = @transform_1, window_bounds = array<i64: 1, 16, 32>}, {pipeline_mode = #tpu.pipeline_mode<synchronous>, transform_indices = @transform_2, window_bounds = array<i64: 4, 32, 128>}, {transform_indices = @transform_3, window_bounds = array<i64: 1, 16, 128>}, {transform_indices = @transform_4, window_bounds = array<i64: 1, 1, 1, 128>}, {transform_indices = @transform_5, window_bounds = array<i64: 1, 1, 1, 128>}]} {
    %c0 = arith.constant 0 : index
    %c0_0 = arith.constant 0 : index
    %c0_1 = arith.constant 0 : index
    %0 = vector.load %arg2[%c0, %c0_0, %c0_1] : memref<1x16x32xbf16, #tpu.memory_space<vmem>>, vector<1x16x32xbf16>
    %1 = vector.shape_cast %0 : vector<1x16x32xbf16> to vector<16x32xbf16>
    %2 = arith.extf %1 : vector<16x32xbf16> to vector<16x32xf32>
    %c0_2 = arith.constant 0 : index
    %c0_3 = arith.constant 0 : index
    %c0_4 = arith.constant 0 : index
    %3 = vector.load %arg3[%c0_2, %c0_3, %c0_4] : memref<1x16x32xbf16, #tpu.memory_space<vmem>>, vector<1x16x32xbf16>
    %4 = vector.shape_cast %3 : vector<1x16x32xbf16> to vector<16x32xbf16>
    %5 = arith.extf %4 : vector<16x32xbf16> to vector<16x32xf32>
    %6 = tpu.concatenate %2, %5 in 0 : vector<16x32xf32>, vector<16x32xf32> -> vector<32x32xf32>
    %7 = vector.extract_strided_slice %6 {offsets = [0, 0], sizes = [16, 32], strides = [1, 1]} : vector<32x32xf32> to vector<16x32xf32>
    %8 = arith.truncf %7 : vector<16x32xf32> to vector<16x32xbf16>
    %c0_5 = arith.constant 0 : index
    %c0_6 = arith.constant 0 : index
    %c0_7 = arith.constant 0 : index
    %9 = vector.load %arg4[%c0_5, %c0_6, %c0_7] : memref<4x32x128xbf16, #tpu.memory_space<vmem>>, vector<1x32x128xbf16>
    %10 = vector.shape_cast %9 : vector<1x32x128xbf16> to vector<32x128xbf16>
    %cst = arith.constant dense<0.000000e+00> : vector<16x128xf32>
    %11 = tpu.matmul %8, %10, %cst {dimension_numbers = #tpu.dot_dimension_numbers<[1], [0], [0], [1], [0, 0, 1, 1], [], []>} : vector<16x32xbf16>, vector<32x128xbf16>, vector<16x128xf32> -> vector<16x128xf32>
    %c31_i32 = arith.constant 31 : i32
    %12 = tpu.dynamic_rotate %6 by %c31_i32 dim 0 : vector<32x32xf32>, i32 -> vector<32x32xf32>
    %13 = vector.extract_strided_slice %12 {offsets = [0, 0], sizes = [16, 32], strides = [1, 1]} : vector<32x32xf32> to vector<16x32xf32>
    %14 = arith.truncf %13 : vector<16x32xf32> to vector<16x32xbf16>
    %c1 = arith.constant 1 : index
    %c0_8 = arith.constant 0 : index
    %c0_9 = arith.constant 0 : index
    %15 = vector.load %arg4[%c1, %c0_8, %c0_9] : memref<4x32x128xbf16, #tpu.memory_space<vmem>>, vector<1x32x128xbf16>
    %16 = vector.shape_cast %15 : vector<1x32x128xbf16> to vector<32x128xbf16>
    %cst_10 = arith.constant dense<0.000000e+00> : vector<16x128xf32>
    %17 = tpu.matmul %14, %16, %cst_10 {dimension_numbers = #tpu.dot_dimension_numbers<[1], [0], [0], [1], [0, 0, 1, 1], [], []>} : vector<16x32xbf16>, vector<32x128xbf16>, vector<16x128xf32> -> vector<16x128xf32>
    %18 = arith.addf %11, %17 : vector<16x128xf32>
    %c30_i32 = arith.constant 30 : i32
    %19 = tpu.dynamic_rotate %6 by %c30_i32 dim 0 : vector<32x32xf32>, i32 -> vector<32x32xf32>
    %20 = vector.extract_strided_slice %19 {offsets = [0, 0], sizes = [16, 32], strides = [1, 1]} : vector<32x32xf32> to vector<16x32xf32>
    %21 = arith.truncf %20 : vector<16x32xf32> to vector<16x32xbf16>
    %c2 = arith.constant 2 : index
    %c0_11 = arith.constant 0 : index
    %c0_12 = arith.constant 0 : index
    %22 = vector.load %arg4[%c2, %c0_11, %c0_12] : memref<4x32x128xbf16, #tpu.memory_space<vmem>>, vector<1x32x128xbf16>
    %23 = vector.shape_cast %22 : vector<1x32x128xbf16> to vector<32x128xbf16>
    %cst_13 = arith.constant dense<0.000000e+00> : vector<16x128xf32>
    %24 = tpu.matmul %21, %23, %cst_13 {dimension_numbers = #tpu.dot_dimension_numbers<[1], [0], [0], [1], [0, 0, 1, 1], [], []>} : vector<16x32xbf16>, vector<32x128xbf16>, vector<16x128xf32> -> vector<16x128xf32>
    %25 = arith.addf %18, %24 : vector<16x128xf32>
    %c29_i32 = arith.constant 29 : i32
    %26 = tpu.dynamic_rotate %6 by %c29_i32 dim 0 : vector<32x32xf32>, i32 -> vector<32x32xf32>
    %27 = vector.extract_strided_slice %26 {offsets = [0, 0], sizes = [16, 32], strides = [1, 1]} : vector<32x32xf32> to vector<16x32xf32>
    %28 = arith.truncf %27 : vector<16x32xf32> to vector<16x32xbf16>
    %c3 = arith.constant 3 : index
    %c0_14 = arith.constant 0 : index
    %c0_15 = arith.constant 0 : index
    %29 = vector.load %arg4[%c3, %c0_14, %c0_15] : memref<4x32x128xbf16, #tpu.memory_space<vmem>>, vector<1x32x128xbf16>
    %30 = vector.shape_cast %29 : vector<1x32x128xbf16> to vector<32x128xbf16>
    %cst_16 = arith.constant dense<0.000000e+00> : vector<16x128xf32>
    %31 = tpu.matmul %28, %30, %cst_16 {dimension_numbers = #tpu.dot_dimension_numbers<[1], [0], [0], [1], [0, 0, 1, 1], [], []>} : vector<16x32xbf16>, vector<32x128xbf16>, vector<16x128xf32> -> vector<16x128xf32>
    %32 = arith.addf %25, %31 : vector<16x128xf32>
    %33 = arith.truncf %32 : vector<16x128xf32> to vector<16x128xbf16>
    %c0_17 = arith.constant 0 : index
    %c0_18 = arith.constant 0 : index
    %c0_19 = arith.constant 0 : index
    %34 = vector.load %arg5[%c0_17, %c0_18, %c0_19] : memref<1x16x128xbf16, #tpu.memory_space<vmem>>, vector<1x16x128xbf16>
    %35 = vector.shape_cast %34 : vector<1x16x128xbf16> to vector<16x128xbf16>
    %36 = vector.shape_cast %33 : vector<16x128xbf16> to vector<1x16x128xbf16>
    tpu.vector_store %arg5[%c0_17, %c0_18, %c0_19], %36 {strides = array<i32>} : memref<1x16x128xbf16, #tpu.memory_space<vmem>>, vector<1x16x128xbf16>,
    %c16_i32 = arith.constant 16 : i32
    %37 = arith.muli %arg1, %c16_i32 : i32
    %38 = tpu.iota {dimensions = array<i32: 0>} : vector<16x128xi32>
    %39 = vector.broadcast %37 : i32 to vector<16x128xi32>
    %40 = arith.addi %39, %38 : vector<16x128xi32>
    %c2_i32 = arith.constant 2 : i32
    %41 = vector.broadcast %c2_i32 : i32 to vector<16x128xi32>
    %42 = arith.cmpi slt, %40, %41 : vector<16x128xi32>
    %cst_20 = arith.constant 0.000000e+00 : f32
    %43 = vector.broadcast %cst_20 : f32 to vector<16x128xf32>
    %44 = arith.select %42, %32, %43 : vector<16x128xi1>, vector<16x128xf32>
    %cst_21 = arith.constant dense<0.000000e+00> : vector<128xf32>
    %45 = vector.multi_reduction <add>, %44, %cst_21 [0] : vector<16x128xf32> to vector<128xf32>
    %46 = vector.shape_cast %45 : vector<128xf32> to vector<1x128xf32>
    %c0_22 = arith.constant 0 : index
    %c0_23 = arith.constant 0 : index
    %c0_24 = arith.constant 0 : index
    %c0_25 = arith.constant 0 : index
    %47 = vector.load %arg6[%c0_22, %c0_23, %c0_24, %c0_25] : memref<1x1x1x128xf32, #tpu.memory_space<vmem>>, vector<1x1x1x128xf32>
    %48 = vector.shape_cast %47 : vector<1x1x1x128xf32> to vector<1x128xf32>
    %49 = vector.shape_cast %46 : vector<1x128xf32> to vector<1x1x1x128xf32>
    tpu.vector_store %arg6[%c0_22, %c0_23, %c0_24, %c0_25], %49 {strides = array<i32>} : memref<1x1x1x128xf32, #tpu.memory_space<vmem>>, vector<1x1x1x128xf32>,
    %50 = arith.mulf %44, %44 : vector<16x128xf32>
    %cst_26 = arith.constant dense<0.000000e+00> : vector<128xf32>
    %51 = vector.multi_reduction <add>, %50, %cst_26 [0] : vector<16x128xf32> to vector<128xf32>
    %52 = vector.shape_cast %51 : vector<128xf32> to vector<1x128xf32>
    %c0_27 = arith.constant 0 : index
    %c0_28 = arith.constant 0 : index
    %c0_29 = arith.constant 0 : index
    %c0_30 = arith.constant 0 : index
    %53 = vector.load %arg7[%c0_27, %c0_28, %c0_29, %c0_30] : memref<1x1x1x128xf32, #tpu.memory_space<vmem>>, vector<1x1x1x128xf32>
    %54 = vector.shape_cast %53 : vector<1x1x1x128xf32> to vector<1x128xf32>
    %55 = vector.shape_cast %52 : vector<1x128xf32> to vector<1x1x1x128xf32>
    tpu.vector_store %arg7[%c0_27, %c0_28, %c0_29, %c0_30], %55 {strides = array<i32>} : memref<1x1x1x128xf32, #tpu.memory_space<vmem>>, vector<1x1x1x128xf32>,
    return
  }
  func.func @transform_0(%arg0: i32, %arg1: i32) -> (i32, i32, i32) {
    %c0_i32 = arith.constant 0 : i32
    %c0_i32_0 = arith.constant 0 : i32
    return %arg0, %arg1, %c0_i32 : i32, i32, i32
  }
  func.func @transform_1(%arg0: i32, %arg1: i32) -> (i32, i32, i32) {
    %c1_i32 = arith.constant 1 : i32
    %0 = arith.addi %arg1, %c1_i32 : i32
    %c1_i32_0 = arith.constant 1 : i32
    %1 = arith.muli %0, %c1_i32_0 : i32
    %c0_i32 = arith.constant 0 : i32
    %c0_i32_1 = arith.constant 0 : i32
    return %arg0, %1, %c0_i32 : i32, i32, i32
  }
  func.func @transform_2(%arg0: i32, %arg1: i32) -> (i32, i32, i32) {
    %c0_i32 = arith.constant 0 : i32
    %c0_i32_0 = arith.constant 0 : i32
    %c0_i32_1 = arith.constant 0 : i32
    %c0_i32_2 = arith.constant 0 : i32
    return %c0_i32, %c0_i32_0, %c0_i32_1 : i32, i32, i32
  }
  func.func @transform_3(%arg0: i32, %arg1: i32) -> (i32, i32, i32) {
    %c0_i32 = arith.constant 0 : i32
    %c0_i32_0 = arith.constant 0 : i32
    return %arg0, %arg1, %c0_i32 : i32, i32, i32
  }
  func.func @transform_4(%arg0: i32, %arg1: i32) -> (i32, i32, i32, i32) {
    %c0_i32 = arith.constant 0 : i32
    %c0_i32_0 = arith.constant 0 : i32
    %c0_i32_1 = arith.constant 0 : i32
    return %arg0, %arg1, %c0_i32, %c0_i32_0 : i32, i32, i32, i32
  }
  func.func @transform_5(%arg0: i32, %arg1: i32) -> (i32, i32, i32, i32) {
    %c0_i32 = arith.constant 0 : i32
    %c0_i32_0 = arith.constant 0 : i32
    %c0_i32_1 = arith.constant 0 : i32
    return %arg0, %arg1, %c0_i32, %c0_i32_0 : i32, i32, i32, i32
  }
}

module attributes {stable_mosaic.version = 11 : i64} {
  func.func @_conv_stats_kernel(%arg0: i32, %arg1: i32, %arg2: memref<1x16x32xbf16, #tpu.memory_space<vmem>>, %arg3: memref<1x16x32xbf16, #tpu.memory_space<vmem>>, %arg4: memref<7x32x128xbf16, #tpu.memory_space<vmem>>, %arg5: memref<1x16x128xbf16, #tpu.memory_space<vmem>>, %arg6: memref<1x1x1x128xf32, #tpu.memory_space<vmem>>, %arg7: memref<1x1x1x128xf32, #tpu.memory_space<vmem>>) attributes {dimension_semantics = [#tpu.dimension_semantics<parallel>, #tpu.dimension_semantics<parallel>], iteration_bounds = array<i64: 2, 1>, scalar_prefetch = 0 : i64, scratch_operands = 0 : i64, tpu.core_type = #tpu.core_type<tc>, window_params = [{transform_indices = @transform_0, window_bounds = array<i64: 1, 16, 32>}, {transform_indices = @transform_1, window_bounds = array<i64: 1, 16, 32>}, {pipeline_mode = #tpu.pipeline_mode<synchronous>, transform_indices = @transform_2, window_bounds = array<i64: 7, 32, 128>}, {transform_indices = @transform_3, window_bounds = array<i64: 1, 16, 128>}, {transform_indices = @transform_4, window_bounds = array<i64: 1, 1, 1, 128>}, {transform_indices = @transform_5, window_bounds = array<i64: 1, 1, 1, 128>}]} {
    %c0 = arith.constant 0 : index
    %c0_0 = arith.constant 0 : index
    %c0_1 = arith.constant 0 : index
    %0 = vector.load %arg2[%c0, %c0_0, %c0_1] : memref<1x16x32xbf16, #tpu.memory_space<vmem>>, vector<1x16x32xbf16>
    %1 = vector.shape_cast %0 : vector<1x16x32xbf16> to vector<16x32xbf16>
    %2 = arith.extf %1 : vector<16x32xbf16> to vector<16x32xf32>
    %c0_2 = arith.constant 0 : index
    %c0_3 = arith.constant 0 : index
    %c0_4 = arith.constant 0 : index
    %3 = vector.load %arg3[%c0_2, %c0_3, %c0_4] : memref<1x16x32xbf16, #tpu.memory_space<vmem>>, vector<1x16x32xbf16>
    %4 = vector.shape_cast %3 : vector<1x16x32xbf16> to vector<16x32xbf16>
    %5 = arith.extf %4 : vector<16x32xbf16> to vector<16x32xf32>
    %6 = tpu.concatenate %2, %5 in 0 : vector<16x32xf32>, vector<16x32xf32> -> vector<32x32xf32>
    %7 = vector.extract_strided_slice %6 {offsets = [0, 0], sizes = [16, 32], strides = [1, 1]} : vector<32x32xf32> to vector<16x32xf32>
    %8 = arith.truncf %7 : vector<16x32xf32> to vector<16x32xbf16>
    %c0_5 = arith.constant 0 : index
    %c0_6 = arith.constant 0 : index
    %c0_7 = arith.constant 0 : index
    %9 = vector.load %arg4[%c0_5, %c0_6, %c0_7] : memref<7x32x128xbf16, #tpu.memory_space<vmem>>, vector<1x32x128xbf16>
    %10 = vector.shape_cast %9 : vector<1x32x128xbf16> to vector<32x128xbf16>
    %cst = arith.constant dense<0.000000e+00> : vector<16x128xf32>
    %11 = tpu.matmul %8, %10, %cst {dimension_numbers = #tpu.dot_dimension_numbers<[1], [0], [0], [1], [0, 0, 1, 1], [], []>} : vector<16x32xbf16>, vector<32x128xbf16>, vector<16x128xf32> -> vector<16x128xf32>
    %c31_i32 = arith.constant 31 : i32
    %12 = tpu.dynamic_rotate %6 by %c31_i32 dim 0 : vector<32x32xf32>, i32 -> vector<32x32xf32>
    %13 = vector.extract_strided_slice %12 {offsets = [0, 0], sizes = [16, 32], strides = [1, 1]} : vector<32x32xf32> to vector<16x32xf32>
    %14 = arith.truncf %13 : vector<16x32xf32> to vector<16x32xbf16>
    %c1 = arith.constant 1 : index
    %c0_8 = arith.constant 0 : index
    %c0_9 = arith.constant 0 : index
    %15 = vector.load %arg4[%c1, %c0_8, %c0_9] : memref<7x32x128xbf16, #tpu.memory_space<vmem>>, vector<1x32x128xbf16>
    %16 = vector.shape_cast %15 : vector<1x32x128xbf16> to vector<32x128xbf16>
    %cst_10 = arith.constant dense<0.000000e+00> : vector<16x128xf32>
    %17 = tpu.matmul %14, %16, %cst_10 {dimension_numbers = #tpu.dot_dimension_numbers<[1], [0], [0], [1], [0, 0, 1, 1], [], []>} : vector<16x32xbf16>, vector<32x128xbf16>, vector<16x128xf32> -> vector<16x128xf32>
    %18 = arith.addf %11, %17 : vector<16x128xf32>
    %c30_i32 = arith.constant 30 : i32
    %19 = tpu.dynamic_rotate %6 by %c30_i32 dim 0 : vector<32x32xf32>, i32 -> vector<32x32xf32>
    %20 = vector.extract_strided_slice %19 {offsets = [0, 0], sizes = [16, 32], strides = [1, 1]} : vector<32x32xf32> to vector<16x32xf32>
    %21 = arith.truncf %20 : vector<16x32xf32> to vector<16x32xbf16>
    %c2 = arith.constant 2 : index
    %c0_11 = arith.constant 0 : index
    %c0_12 = arith.constant 0 : index
    %22 = vector.load %arg4[%c2, %c0_11, %c0_12] : memref<7x32x128xbf16, #tpu.memory_space<vmem>>, vector<1x32x128xbf16>
    %23 = vector.shape_cast %22 : vector<1x32x128xbf16> to vector<32x128xbf16>
    %cst_13 = arith.constant dense<0.000000e+00> : vector<16x128xf32>
    %24 = tpu.matmul %21, %23, %cst_13 {dimension_numbers = #tpu.dot_dimension_numbers<[1], [0], [0], [1], [0, 0, 1, 1], [], []>} : vector<16x32xbf16>, vector<32x128xbf16>, vector<16x128xf32> -> vector<16x128xf32>
    %25 = arith.addf %18, %24 : vector<16x128xf32>
    %c29_i32 = arith.constant 29 : i32
    %26 = tpu.dynamic_rotate %6 by %c29_i32 dim 0 : vector<32x32xf32>, i32 -> vector<32x32xf32>
    %27 = vector.extract_strided_slice %26 {offsets = [0, 0], sizes = [16, 32], strides = [1, 1]} : vector<32x32xf32> to vector<16x32xf32>
    %28 = arith.truncf %27 : vector<16x32xf32> to vector<16x32xbf16>
    %c3 = arith.constant 3 : index
    %c0_14 = arith.constant 0 : index
    %c0_15 = arith.constant 0 : index
    %29 = vector.load %arg4[%c3, %c0_14, %c0_15] : memref<7x32x128xbf16, #tpu.memory_space<vmem>>, vector<1x32x128xbf16>
    %30 = vector.shape_cast %29 : vector<1x32x128xbf16> to vector<32x128xbf16>
    %cst_16 = arith.constant dense<0.000000e+00> : vector<16x128xf32>
    %31 = tpu.matmul %28, %30, %cst_16 {dimension_numbers = #tpu.dot_dimension_numbers<[1], [0], [0], [1], [0, 0, 1, 1], [], []>} : vector<16x32xbf16>, vector<32x128xbf16>, vector<16x128xf32> -> vector<16x128xf32>
    %32 = arith.addf %25, %31 : vector<16x128xf32>
    %c28_i32 = arith.constant 28 : i32
    %33 = tpu.dynamic_rotate %6 by %c28_i32 dim 0 : vector<32x32xf32>, i32 -> vector<32x32xf32>
    %34 = vector.extract_strided_slice %33 {offsets = [0, 0], sizes = [16, 32], strides = [1, 1]} : vector<32x32xf32> to vector<16x32xf32>
    %35 = arith.truncf %34 : vector<16x32xf32> to vector<16x32xbf16>
    %c4 = arith.constant 4 : index
    %c0_17 = arith.constant 0 : index
    %c0_18 = arith.constant 0 : index
    %36 = vector.load %arg4[%c4, %c0_17, %c0_18] : memref<7x32x128xbf16, #tpu.memory_space<vmem>>, vector<1x32x128xbf16>
    %37 = vector.shape_cast %36 : vector<1x32x128xbf16> to vector<32x128xbf16>
    %cst_19 = arith.constant dense<0.000000e+00> : vector<16x128xf32>
    %38 = tpu.matmul %35, %37, %cst_19 {dimension_numbers = #tpu.dot_dimension_numbers<[1], [0], [0], [1], [0, 0, 1, 1], [], []>} : vector<16x32xbf16>, vector<32x128xbf16>, vector<16x128xf32> -> vector<16x128xf32>
    %39 = arith.addf %32, %38 : vector<16x128xf32>
    %c27_i32 = arith.constant 27 : i32
    %40 = tpu.dynamic_rotate %6 by %c27_i32 dim 0 : vector<32x32xf32>, i32 -> vector<32x32xf32>
    %41 = vector.extract_strided_slice %40 {offsets = [0, 0], sizes = [16, 32], strides = [1, 1]} : vector<32x32xf32> to vector<16x32xf32>
    %42 = arith.truncf %41 : vector<16x32xf32> to vector<16x32xbf16>
    %c5 = arith.constant 5 : index
    %c0_20 = arith.constant 0 : index
    %c0_21 = arith.constant 0 : index
    %43 = vector.load %arg4[%c5, %c0_20, %c0_21] : memref<7x32x128xbf16, #tpu.memory_space<vmem>>, vector<1x32x128xbf16>
    %44 = vector.shape_cast %43 : vector<1x32x128xbf16> to vector<32x128xbf16>
    %cst_22 = arith.constant dense<0.000000e+00> : vector<16x128xf32>
    %45 = tpu.matmul %42, %44, %cst_22 {dimension_numbers = #tpu.dot_dimension_numbers<[1], [0], [0], [1], [0, 0, 1, 1], [], []>} : vector<16x32xbf16>, vector<32x128xbf16>, vector<16x128xf32> -> vector<16x128xf32>
    %46 = arith.addf %39, %45 : vector<16x128xf32>
    %c26_i32 = arith.constant 26 : i32
    %47 = tpu.dynamic_rotate %6 by %c26_i32 dim 0 : vector<32x32xf32>, i32 -> vector<32x32xf32>
    %48 = vector.extract_strided_slice %47 {offsets = [0, 0], sizes = [16, 32], strides = [1, 1]} : vector<32x32xf32> to vector<16x32xf32>
    %49 = arith.truncf %48 : vector<16x32xf32> to vector<16x32xbf16>
    %c6 = arith.constant 6 : index
    %c0_23 = arith.constant 0 : index
    %c0_24 = arith.constant 0 : index
    %50 = vector.load %arg4[%c6, %c0_23, %c0_24] : memref<7x32x128xbf16, #tpu.memory_space<vmem>>, vector<1x32x128xbf16>
    %51 = vector.shape_cast %50 : vector<1x32x128xbf16> to vector<32x128xbf16>
    %cst_25 = arith.constant dense<0.000000e+00> : vector<16x128xf32>
    %52 = tpu.matmul %49, %51, %cst_25 {dimension_numbers = #tpu.dot_dimension_numbers<[1], [0], [0], [1], [0, 0, 1, 1], [], []>} : vector<16x32xbf16>, vector<32x128xbf16>, vector<16x128xf32> -> vector<16x128xf32>
    %53 = arith.addf %46, %52 : vector<16x128xf32>
    %54 = arith.truncf %53 : vector<16x128xf32> to vector<16x128xbf16>
    %c0_26 = arith.constant 0 : index
    %c0_27 = arith.constant 0 : index
    %c0_28 = arith.constant 0 : index
    %55 = vector.load %arg5[%c0_26, %c0_27, %c0_28] : memref<1x16x128xbf16, #tpu.memory_space<vmem>>, vector<1x16x128xbf16>
    %56 = vector.shape_cast %55 : vector<1x16x128xbf16> to vector<16x128xbf16>
    %57 = vector.shape_cast %54 : vector<16x128xbf16> to vector<1x16x128xbf16>
    tpu.vector_store %arg5[%c0_26, %c0_27, %c0_28], %57 {strides = array<i32>} : memref<1x16x128xbf16, #tpu.memory_space<vmem>>, vector<1x16x128xbf16>,
    %c16_i32 = arith.constant 16 : i32
    %58 = arith.muli %arg1, %c16_i32 : i32
    %59 = tpu.iota {dimensions = array<i32: 0>} : vector<16x128xi32>
    %60 = vector.broadcast %58 : i32 to vector<16x128xi32>
    %61 = arith.addi %60, %59 : vector<16x128xi32>
    %c4_i32 = arith.constant 4 : i32
    %62 = vector.broadcast %c4_i32 : i32 to vector<16x128xi32>
    %63 = arith.cmpi slt, %61, %62 : vector<16x128xi32>
    %cst_29 = arith.constant 0.000000e+00 : f32
    %64 = vector.broadcast %cst_29 : f32 to vector<16x128xf32>
    %65 = arith.select %63, %53, %64 : vector<16x128xi1>, vector<16x128xf32>
    %cst_30 = arith.constant dense<0.000000e+00> : vector<128xf32>
    %66 = vector.multi_reduction <add>, %65, %cst_30 [0] : vector<16x128xf32> to vector<128xf32>
    %67 = vector.shape_cast %66 : vector<128xf32> to vector<1x128xf32>
    %c0_31 = arith.constant 0 : index
    %c0_32 = arith.constant 0 : index
    %c0_33 = arith.constant 0 : index
    %c0_34 = arith.constant 0 : index
    %68 = vector.load %arg6[%c0_31, %c0_32, %c0_33, %c0_34] : memref<1x1x1x128xf32, #tpu.memory_space<vmem>>, vector<1x1x1x128xf32>
    %69 = vector.shape_cast %68 : vector<1x1x1x128xf32> to vector<1x128xf32>
    %70 = vector.shape_cast %67 : vector<1x128xf32> to vector<1x1x1x128xf32>
    tpu.vector_store %arg6[%c0_31, %c0_32, %c0_33, %c0_34], %70 {strides = array<i32>} : memref<1x1x1x128xf32, #tpu.memory_space<vmem>>, vector<1x1x1x128xf32>,
    %71 = arith.mulf %65, %65 : vector<16x128xf32>
    %cst_35 = arith.constant dense<0.000000e+00> : vector<128xf32>
    %72 = vector.multi_reduction <add>, %71, %cst_35 [0] : vector<16x128xf32> to vector<128xf32>
    %73 = vector.shape_cast %72 : vector<128xf32> to vector<1x128xf32>
    %c0_36 = arith.constant 0 : index
    %c0_37 = arith.constant 0 : index
    %c0_38 = arith.constant 0 : index
    %c0_39 = arith.constant 0 : index
    %74 = vector.load %arg7[%c0_36, %c0_37, %c0_38, %c0_39] : memref<1x1x1x128xf32, #tpu.memory_space<vmem>>, vector<1x1x1x128xf32>
    %75 = vector.shape_cast %74 : vector<1x1x1x128xf32> to vector<1x128xf32>
    %76 = vector.shape_cast %73 : vector<1x128xf32> to vector<1x1x1x128xf32>
    tpu.vector_store %arg7[%c0_36, %c0_37, %c0_38, %c0_39], %76 {strides = array<i32>} : memref<1x1x1x128xf32, #tpu.memory_space<vmem>>, vector<1x1x1x128xf32>,
    return
  }
  func.func @transform_0(%arg0: i32, %arg1: i32) -> (i32, i32, i32) {
    %c0_i32 = arith.constant 0 : i32
    %c0_i32_0 = arith.constant 0 : i32
    return %arg0, %arg1, %c0_i32 : i32, i32, i32
  }
  func.func @transform_1(%arg0: i32, %arg1: i32) -> (i32, i32, i32) {
    %c1_i32 = arith.constant 1 : i32
    %0 = arith.addi %arg1, %c1_i32 : i32
    %c1_i32_0 = arith.constant 1 : i32
    %1 = arith.muli %0, %c1_i32_0 : i32
    %c0_i32 = arith.constant 0 : i32
    %c0_i32_1 = arith.constant 0 : i32
    return %arg0, %1, %c0_i32 : i32, i32, i32
  }
  func.func @transform_2(%arg0: i32, %arg1: i32) -> (i32, i32, i32) {
    %c0_i32 = arith.constant 0 : i32
    %c0_i32_0 = arith.constant 0 : i32
    %c0_i32_1 = arith.constant 0 : i32
    %c0_i32_2 = arith.constant 0 : i32
    return %c0_i32, %c0_i32_0, %c0_i32_1 : i32, i32, i32
  }
  func.func @transform_3(%arg0: i32, %arg1: i32) -> (i32, i32, i32) {
    %c0_i32 = arith.constant 0 : i32
    %c0_i32_0 = arith.constant 0 : i32
    return %arg0, %arg1, %c0_i32 : i32, i32, i32
  }
  func.func @transform_4(%arg0: i32, %arg1: i32) -> (i32, i32, i32, i32) {
    %c0_i32 = arith.constant 0 : i32
    %c0_i32_0 = arith.constant 0 : i32
    %c0_i32_1 = arith.constant 0 : i32
    return %arg0, %arg1, %c0_i32, %c0_i32_0 : i32, i32, i32, i32
  }
  func.func @transform_5(%arg0: i32, %arg1: i32) -> (i32, i32, i32, i32) {
    %c0_i32 = arith.constant 0 : i32
    %c0_i32_0 = arith.constant 0 : i32
    %c0_i32_1 = arith.constant 0 : i32
    return %arg0, %arg1, %c0_i32, %c0_i32_0 : i32, i32, i32, i32
  }
}

module attributes {stable_mosaic.version = 11 : i64} {
  func.func @_conv_stats_kernel(%arg0: i32, %arg1: i32, %arg2: memref<1x16x32xbf16, #tpu.memory_space<vmem>>, %arg3: memref<1x16x32xbf16, #tpu.memory_space<vmem>>, %arg4: memref<7x32x128xbf16, #tpu.memory_space<vmem>>, %arg5: memref<1x16x128xbf16, #tpu.memory_space<vmem>>, %arg6: memref<1x1x1x128xf32, #tpu.memory_space<vmem>>, %arg7: memref<1x1x1x128xf32, #tpu.memory_space<vmem>>) attributes {dimension_semantics = [#tpu.dimension_semantics<parallel>, #tpu.dimension_semantics<parallel>], iteration_bounds = array<i64: 2, 1>, scalar_prefetch = 0 : i64, scratch_operands = 0 : i64, tpu.core_type = #tpu.core_type<tc>, window_params = [{transform_indices = @transform_0, window_bounds = array<i64: 1, 16, 32>}, {transform_indices = @transform_1, window_bounds = array<i64: 1, 16, 32>}, {pipeline_mode = #tpu.pipeline_mode<synchronous>, transform_indices = @transform_2, window_bounds = array<i64: 7, 32, 128>}, {transform_indices = @transform_3, window_bounds = array<i64: 1, 16, 128>}, {transform_indices = @transform_4, window_bounds = array<i64: 1, 1, 1, 128>}, {transform_indices = @transform_5, window_bounds = array<i64: 1, 1, 1, 128>}]} {
    %c0 = arith.constant 0 : index
    %c0_0 = arith.constant 0 : index
    %c0_1 = arith.constant 0 : index
    %0 = vector.load %arg2[%c0, %c0_0, %c0_1] : memref<1x16x32xbf16, #tpu.memory_space<vmem>>, vector<1x16x32xbf16>
    %1 = vector.shape_cast %0 : vector<1x16x32xbf16> to vector<16x32xbf16>
    %2 = arith.extf %1 : vector<16x32xbf16> to vector<16x32xf32>
    %c0_2 = arith.constant 0 : index
    %c0_3 = arith.constant 0 : index
    %c0_4 = arith.constant 0 : index
    %3 = vector.load %arg3[%c0_2, %c0_3, %c0_4] : memref<1x16x32xbf16, #tpu.memory_space<vmem>>, vector<1x16x32xbf16>
    %4 = vector.shape_cast %3 : vector<1x16x32xbf16> to vector<16x32xbf16>
    %5 = arith.extf %4 : vector<16x32xbf16> to vector<16x32xf32>
    %6 = tpu.concatenate %2, %5 in 0 : vector<16x32xf32>, vector<16x32xf32> -> vector<32x32xf32>
    %7 = vector.extract_strided_slice %6 {offsets = [0, 0], sizes = [16, 32], strides = [1, 1]} : vector<32x32xf32> to vector<16x32xf32>
    %8 = arith.truncf %7 : vector<16x32xf32> to vector<16x32xbf16>
    %c0_5 = arith.constant 0 : index
    %c0_6 = arith.constant 0 : index
    %c0_7 = arith.constant 0 : index
    %9 = vector.load %arg4[%c0_5, %c0_6, %c0_7] : memref<7x32x128xbf16, #tpu.memory_space<vmem>>, vector<1x32x128xbf16>
    %10 = vector.shape_cast %9 : vector<1x32x128xbf16> to vector<32x128xbf16>
    %cst = arith.constant dense<0.000000e+00> : vector<16x128xf32>
    %11 = tpu.matmul %8, %10, %cst {dimension_numbers = #tpu.dot_dimension_numbers<[1], [0], [0], [1], [0, 0, 1, 1], [], []>} : vector<16x32xbf16>, vector<32x128xbf16>, vector<16x128xf32> -> vector<16x128xf32>
    %c31_i32 = arith.constant 31 : i32
    %12 = tpu.dynamic_rotate %6 by %c31_i32 dim 0 : vector<32x32xf32>, i32 -> vector<32x32xf32>
    %13 = vector.extract_strided_slice %12 {offsets = [0, 0], sizes = [16, 32], strides = [1, 1]} : vector<32x32xf32> to vector<16x32xf32>
    %14 = arith.truncf %13 : vector<16x32xf32> to vector<16x32xbf16>
    %c1 = arith.constant 1 : index
    %c0_8 = arith.constant 0 : index
    %c0_9 = arith.constant 0 : index
    %15 = vector.load %arg4[%c1, %c0_8, %c0_9] : memref<7x32x128xbf16, #tpu.memory_space<vmem>>, vector<1x32x128xbf16>
    %16 = vector.shape_cast %15 : vector<1x32x128xbf16> to vector<32x128xbf16>
    %cst_10 = arith.constant dense<0.000000e+00> : vector<16x128xf32>
    %17 = tpu.matmul %14, %16, %cst_10 {dimension_numbers = #tpu.dot_dimension_numbers<[1], [0], [0], [1], [0, 0, 1, 1], [], []>} : vector<16x32xbf16>, vector<32x128xbf16>, vector<16x128xf32> -> vector<16x128xf32>
    %18 = arith.addf %11, %17 : vector<16x128xf32>
    %c30_i32 = arith.constant 30 : i32
    %19 = tpu.dynamic_rotate %6 by %c30_i32 dim 0 : vector<32x32xf32>, i32 -> vector<32x32xf32>
    %20 = vector.extract_strided_slice %19 {offsets = [0, 0], sizes = [16, 32], strides = [1, 1]} : vector<32x32xf32> to vector<16x32xf32>
    %21 = arith.truncf %20 : vector<16x32xf32> to vector<16x32xbf16>
    %c2 = arith.constant 2 : index
    %c0_11 = arith.constant 0 : index
    %c0_12 = arith.constant 0 : index
    %22 = vector.load %arg4[%c2, %c0_11, %c0_12] : memref<7x32x128xbf16, #tpu.memory_space<vmem>>, vector<1x32x128xbf16>
    %23 = vector.shape_cast %22 : vector<1x32x128xbf16> to vector<32x128xbf16>
    %cst_13 = arith.constant dense<0.000000e+00> : vector<16x128xf32>
    %24 = tpu.matmul %21, %23, %cst_13 {dimension_numbers = #tpu.dot_dimension_numbers<[1], [0], [0], [1], [0, 0, 1, 1], [], []>} : vector<16x32xbf16>, vector<32x128xbf16>, vector<16x128xf32> -> vector<16x128xf32>
    %25 = arith.addf %18, %24 : vector<16x128xf32>
    %c29_i32 = arith.constant 29 : i32
    %26 = tpu.dynamic_rotate %6 by %c29_i32 dim 0 : vector<32x32xf32>, i32 -> vector<32x32xf32>
    %27 = vector.extract_strided_slice %26 {offsets = [0, 0], sizes = [16, 32], strides = [1, 1]} : vector<32x32xf32> to vector<16x32xf32>
    %28 = arith.truncf %27 : vector<16x32xf32> to vector<16x32xbf16>
    %c3 = arith.constant 3 : index
    %c0_14 = arith.constant 0 : index
    %c0_15 = arith.constant 0 : index
    %29 = vector.load %arg4[%c3, %c0_14, %c0_15] : memref<7x32x128xbf16, #tpu.memory_space<vmem>>, vector<1x32x128xbf16>
    %30 = vector.shape_cast %29 : vector<1x32x128xbf16> to vector<32x128xbf16>
    %cst_16 = arith.constant dense<0.000000e+00> : vector<16x128xf32>
    %31 = tpu.matmul %28, %30, %cst_16 {dimension_numbers = #tpu.dot_dimension_numbers<[1], [0], [0], [1], [0, 0, 1, 1], [], []>} : vector<16x32xbf16>, vector<32x128xbf16>, vector<16x128xf32> -> vector<16x128xf32>
    %32 = arith.addf %25, %31 : vector<16x128xf32>
    %c28_i32 = arith.constant 28 : i32
    %33 = tpu.dynamic_rotate %6 by %c28_i32 dim 0 : vector<32x32xf32>, i32 -> vector<32x32xf32>
    %34 = vector.extract_strided_slice %33 {offsets = [0, 0], sizes = [16, 32], strides = [1, 1]} : vector<32x32xf32> to vector<16x32xf32>
    %35 = arith.truncf %34 : vector<16x32xf32> to vector<16x32xbf16>
    %c4 = arith.constant 4 : index
    %c0_17 = arith.constant 0 : index
    %c0_18 = arith.constant 0 : index
    %36 = vector.load %arg4[%c4, %c0_17, %c0_18] : memref<7x32x128xbf16, #tpu.memory_space<vmem>>, vector<1x32x128xbf16>
    %37 = vector.shape_cast %36 : vector<1x32x128xbf16> to vector<32x128xbf16>
    %cst_19 = arith.constant dense<0.000000e+00> : vector<16x128xf32>
    %38 = tpu.matmul %35, %37, %cst_19 {dimension_numbers = #tpu.dot_dimension_numbers<[1], [0], [0], [1], [0, 0, 1, 1], [], []>} : vector<16x32xbf16>, vector<32x128xbf16>, vector<16x128xf32> -> vector<16x128xf32>
    %39 = arith.addf %32, %38 : vector<16x128xf32>
    %c27_i32 = arith.constant 27 : i32
    %40 = tpu.dynamic_rotate %6 by %c27_i32 dim 0 : vector<32x32xf32>, i32 -> vector<32x32xf32>
    %41 = vector.extract_strided_slice %40 {offsets = [0, 0], sizes = [16, 32], strides = [1, 1]} : vector<32x32xf32> to vector<16x32xf32>
    %42 = arith.truncf %41 : vector<16x32xf32> to vector<16x32xbf16>
    %c5 = arith.constant 5 : index
    %c0_20 = arith.constant 0 : index
    %c0_21 = arith.constant 0 : index
    %43 = vector.load %arg4[%c5, %c0_20, %c0_21] : memref<7x32x128xbf16, #tpu.memory_space<vmem>>, vector<1x32x128xbf16>
    %44 = vector.shape_cast %43 : vector<1x32x128xbf16> to vector<32x128xbf16>
    %cst_22 = arith.constant dense<0.000000e+00> : vector<16x128xf32>
    %45 = tpu.matmul %42, %44, %cst_22 {dimension_numbers = #tpu.dot_dimension_numbers<[1], [0], [0], [1], [0, 0, 1, 1], [], []>} : vector<16x32xbf16>, vector<32x128xbf16>, vector<16x128xf32> -> vector<16x128xf32>
    %46 = arith.addf %39, %45 : vector<16x128xf32>
    %c26_i32 = arith.constant 26 : i32
    %47 = tpu.dynamic_rotate %6 by %c26_i32 dim 0 : vector<32x32xf32>, i32 -> vector<32x32xf32>
    %48 = vector.extract_strided_slice %47 {offsets = [0, 0], sizes = [16, 32], strides = [1, 1]} : vector<32x32xf32> to vector<16x32xf32>
    %49 = arith.truncf %48 : vector<16x32xf32> to vector<16x32xbf16>
    %c6 = arith.constant 6 : index
    %c0_23 = arith.constant 0 : index
    %c0_24 = arith.constant 0 : index
    %50 = vector.load %arg4[%c6, %c0_23, %c0_24] : memref<7x32x128xbf16, #tpu.memory_space<vmem>>, vector<1x32x128xbf16>
    %51 = vector.shape_cast %50 : vector<1x32x128xbf16> to vector<32x128xbf16>
    %cst_25 = arith.constant dense<0.000000e+00> : vector<16x128xf32>
    %52 = tpu.matmul %49, %51, %cst_25 {dimension_numbers = #tpu.dot_dimension_numbers<[1], [0], [0], [1], [0, 0, 1, 1], [], []>} : vector<16x32xbf16>, vector<32x128xbf16>, vector<16x128xf32> -> vector<16x128xf32>
    %53 = arith.addf %46, %52 : vector<16x128xf32>
    %54 = arith.truncf %53 : vector<16x128xf32> to vector<16x128xbf16>
    %c0_26 = arith.constant 0 : index
    %c0_27 = arith.constant 0 : index
    %c0_28 = arith.constant 0 : index
    %55 = vector.load %arg5[%c0_26, %c0_27, %c0_28] : memref<1x16x128xbf16, #tpu.memory_space<vmem>>, vector<1x16x128xbf16>
    %56 = vector.shape_cast %55 : vector<1x16x128xbf16> to vector<16x128xbf16>
    %57 = vector.shape_cast %54 : vector<16x128xbf16> to vector<1x16x128xbf16>
    tpu.vector_store %arg5[%c0_26, %c0_27, %c0_28], %57 {strides = array<i32>} : memref<1x16x128xbf16, #tpu.memory_space<vmem>>, vector<1x16x128xbf16>,
    %c16_i32 = arith.constant 16 : i32
    %58 = arith.muli %arg1, %c16_i32 : i32
    %59 = tpu.iota {dimensions = array<i32: 0>} : vector<16x128xi32>
    %60 = vector.broadcast %58 : i32 to vector<16x128xi32>
    %61 = arith.addi %60, %59 : vector<16x128xi32>
    %c8_i32 = arith.constant 8 : i32
    %62 = vector.broadcast %c8_i32 : i32 to vector<16x128xi32>
    %63 = arith.cmpi slt, %61, %62 : vector<16x128xi32>
    %cst_29 = arith.constant 0.000000e+00 : f32
    %64 = vector.broadcast %cst_29 : f32 to vector<16x128xf32>
    %65 = arith.select %63, %53, %64 : vector<16x128xi1>, vector<16x128xf32>
    %cst_30 = arith.constant dense<0.000000e+00> : vector<128xf32>
    %66 = vector.multi_reduction <add>, %65, %cst_30 [0] : vector<16x128xf32> to vector<128xf32>
    %67 = vector.shape_cast %66 : vector<128xf32> to vector<1x128xf32>
    %c0_31 = arith.constant 0 : index
    %c0_32 = arith.constant 0 : index
    %c0_33 = arith.constant 0 : index
    %c0_34 = arith.constant 0 : index
    %68 = vector.load %arg6[%c0_31, %c0_32, %c0_33, %c0_34] : memref<1x1x1x128xf32, #tpu.memory_space<vmem>>, vector<1x1x1x128xf32>
    %69 = vector.shape_cast %68 : vector<1x1x1x128xf32> to vector<1x128xf32>
    %70 = vector.shape_cast %67 : vector<1x128xf32> to vector<1x1x1x128xf32>
    tpu.vector_store %arg6[%c0_31, %c0_32, %c0_33, %c0_34], %70 {strides = array<i32>} : memref<1x1x1x128xf32, #tpu.memory_space<vmem>>, vector<1x1x1x128xf32>,
    %71 = arith.mulf %65, %65 : vector<16x128xf32>
    %cst_35 = arith.constant dense<0.000000e+00> : vector<128xf32>
    %72 = vector.multi_reduction <add>, %71, %cst_35 [0] : vector<16x128xf32> to vector<128xf32>
    %73 = vector.shape_cast %72 : vector<128xf32> to vector<1x128xf32>
    %c0_36 = arith.constant 0 : index
    %c0_37 = arith.constant 0 : index
    %c0_38 = arith.constant 0 : index
    %c0_39 = arith.constant 0 : index
    %74 = vector.load %arg7[%c0_36, %c0_37, %c0_38, %c0_39] : memref<1x1x1x128xf32, #tpu.memory_space<vmem>>, vector<1x1x1x128xf32>
    %75 = vector.shape_cast %74 : vector<1x1x1x128xf32> to vector<1x128xf32>
    %76 = vector.shape_cast %73 : vector<1x128xf32> to vector<1x1x1x128xf32>
    tpu.vector_store %arg7[%c0_36, %c0_37, %c0_38, %c0_39], %76 {strides = array<i32>} : memref<1x1x1x128xf32, #tpu.memory_space<vmem>>, vector<1x1x1x128xf32>,
    return
  }
  func.func @transform_0(%arg0: i32, %arg1: i32) -> (i32, i32, i32) {
    %c0_i32 = arith.constant 0 : i32
    %c0_i32_0 = arith.constant 0 : i32
    return %arg0, %arg1, %c0_i32 : i32, i32, i32
  }
  func.func @transform_1(%arg0: i32, %arg1: i32) -> (i32, i32, i32) {
    %c1_i32 = arith.constant 1 : i32
    %0 = arith.addi %arg1, %c1_i32 : i32
    %c1_i32_0 = arith.constant 1 : i32
    %1 = arith.muli %0, %c1_i32_0 : i32
    %c0_i32 = arith.constant 0 : i32
    %c0_i32_1 = arith.constant 0 : i32
    return %arg0, %1, %c0_i32 : i32, i32, i32
  }
  func.func @transform_2(%arg0: i32, %arg1: i32) -> (i32, i32, i32) {
    %c0_i32 = arith.constant 0 : i32
    %c0_i32_0 = arith.constant 0 : i32
    %c0_i32_1 = arith.constant 0 : i32
    %c0_i32_2 = arith.constant 0 : i32
    return %c0_i32, %c0_i32_0, %c0_i32_1 : i32, i32, i32
  }
  func.func @transform_3(%arg0: i32, %arg1: i32) -> (i32, i32, i32) {
    %c0_i32 = arith.constant 0 : i32
    %c0_i32_0 = arith.constant 0 : i32
    return %arg0, %arg1, %c0_i32 : i32, i32, i32
  }
  func.func @transform_4(%arg0: i32, %arg1: i32) -> (i32, i32, i32, i32) {
    %c0_i32 = arith.constant 0 : i32
    %c0_i32_0 = arith.constant 0 : i32
    %c0_i32_1 = arith.constant 0 : i32
    return %arg0, %arg1, %c0_i32, %c0_i32_0 : i32, i32, i32, i32
  }
  func.func @transform_5(%arg0: i32, %arg1: i32) -> (i32, i32, i32, i32) {
    %c0_i32 = arith.constant 0 : i32
    %c0_i32_0 = arith.constant 0 : i32
    %c0_i32_1 = arith.constant 0 : i32
    return %arg0, %arg1, %c0_i32, %c0_i32_0 : i32, i32, i32, i32
  }
}

module attributes {stable_mosaic.version = 11 : i64} {
  func.func @_conv_stats_kernel(%arg0: i32, %arg1: i32, %arg2: memref<1x16x16xbf16, #tpu.memory_space<vmem>>, %arg3: memref<1x16x16xbf16, #tpu.memory_space<vmem>>, %arg4: memref<7x16x128xbf16, #tpu.memory_space<vmem>>, %arg5: memref<1x16x128xbf16, #tpu.memory_space<vmem>>, %arg6: memref<1x1x1x128xf32, #tpu.memory_space<vmem>>, %arg7: memref<1x1x1x128xf32, #tpu.memory_space<vmem>>) attributes {dimension_semantics = [#tpu.dimension_semantics<parallel>, #tpu.dimension_semantics<parallel>], iteration_bounds = array<i64: 2, 1>, scalar_prefetch = 0 : i64, scratch_operands = 0 : i64, tpu.core_type = #tpu.core_type<tc>, window_params = [{transform_indices = @transform_0, window_bounds = array<i64: 1, 16, 16>}, {transform_indices = @transform_1, window_bounds = array<i64: 1, 16, 16>}, {pipeline_mode = #tpu.pipeline_mode<synchronous>, transform_indices = @transform_2, window_bounds = array<i64: 7, 16, 128>}, {transform_indices = @transform_3, window_bounds = array<i64: 1, 16, 128>}, {transform_indices = @transform_4, window_bounds = array<i64: 1, 1, 1, 128>}, {transform_indices = @transform_5, window_bounds = array<i64: 1, 1, 1, 128>}]} {
    %c0 = arith.constant 0 : index
    %c0_0 = arith.constant 0 : index
    %c0_1 = arith.constant 0 : index
    %0 = vector.load %arg2[%c0, %c0_0, %c0_1] : memref<1x16x16xbf16, #tpu.memory_space<vmem>>, vector<1x16x16xbf16>
    %1 = vector.shape_cast %0 : vector<1x16x16xbf16> to vector<16x16xbf16>
    %2 = arith.extf %1 : vector<16x16xbf16> to vector<16x16xf32>
    %c0_2 = arith.constant 0 : index
    %c0_3 = arith.constant 0 : index
    %c0_4 = arith.constant 0 : index
    %3 = vector.load %arg3[%c0_2, %c0_3, %c0_4] : memref<1x16x16xbf16, #tpu.memory_space<vmem>>, vector<1x16x16xbf16>
    %4 = vector.shape_cast %3 : vector<1x16x16xbf16> to vector<16x16xbf16>
    %5 = arith.extf %4 : vector<16x16xbf16> to vector<16x16xf32>
    %6 = tpu.concatenate %2, %5 in 0 : vector<16x16xf32>, vector<16x16xf32> -> vector<32x16xf32>
    %7 = vector.extract_strided_slice %6 {offsets = [0, 0], sizes = [16, 16], strides = [1, 1]} : vector<32x16xf32> to vector<16x16xf32>
    %8 = arith.truncf %7 : vector<16x16xf32> to vector<16x16xbf16>
    %c0_5 = arith.constant 0 : index
    %c0_6 = arith.constant 0 : index
    %c0_7 = arith.constant 0 : index
    %9 = vector.load %arg4[%c0_5, %c0_6, %c0_7] : memref<7x16x128xbf16, #tpu.memory_space<vmem>>, vector<1x16x128xbf16>
    %10 = vector.shape_cast %9 : vector<1x16x128xbf16> to vector<16x128xbf16>
    %cst = arith.constant dense<0.000000e+00> : vector<16x128xf32>
    %11 = tpu.matmul %8, %10, %cst {dimension_numbers = #tpu.dot_dimension_numbers<[1], [0], [0], [1], [0, 0, 1, 1], [], []>} : vector<16x16xbf16>, vector<16x128xbf16>, vector<16x128xf32> -> vector<16x128xf32>
    %c31_i32 = arith.constant 31 : i32
    %12 = tpu.dynamic_rotate %6 by %c31_i32 dim 0 : vector<32x16xf32>, i32 -> vector<32x16xf32>
    %13 = vector.extract_strided_slice %12 {offsets = [0, 0], sizes = [16, 16], strides = [1, 1]} : vector<32x16xf32> to vector<16x16xf32>
    %14 = arith.truncf %13 : vector<16x16xf32> to vector<16x16xbf16>
    %c1 = arith.constant 1 : index
    %c0_8 = arith.constant 0 : index
    %c0_9 = arith.constant 0 : index
    %15 = vector.load %arg4[%c1, %c0_8, %c0_9] : memref<7x16x128xbf16, #tpu.memory_space<vmem>>, vector<1x16x128xbf16>
    %16 = vector.shape_cast %15 : vector<1x16x128xbf16> to vector<16x128xbf16>
    %cst_10 = arith.constant dense<0.000000e+00> : vector<16x128xf32>
    %17 = tpu.matmul %14, %16, %cst_10 {dimension_numbers = #tpu.dot_dimension_numbers<[1], [0], [0], [1], [0, 0, 1, 1], [], []>} : vector<16x16xbf16>, vector<16x128xbf16>, vector<16x128xf32> -> vector<16x128xf32>
    %18 = arith.addf %11, %17 : vector<16x128xf32>
    %c30_i32 = arith.constant 30 : i32
    %19 = tpu.dynamic_rotate %6 by %c30_i32 dim 0 : vector<32x16xf32>, i32 -> vector<32x16xf32>
    %20 = vector.extract_strided_slice %19 {offsets = [0, 0], sizes = [16, 16], strides = [1, 1]} : vector<32x16xf32> to vector<16x16xf32>
    %21 = arith.truncf %20 : vector<16x16xf32> to vector<16x16xbf16>
    %c2 = arith.constant 2 : index
    %c0_11 = arith.constant 0 : index
    %c0_12 = arith.constant 0 : index
    %22 = vector.load %arg4[%c2, %c0_11, %c0_12] : memref<7x16x128xbf16, #tpu.memory_space<vmem>>, vector<1x16x128xbf16>
    %23 = vector.shape_cast %22 : vector<1x16x128xbf16> to vector<16x128xbf16>
    %cst_13 = arith.constant dense<0.000000e+00> : vector<16x128xf32>
    %24 = tpu.matmul %21, %23, %cst_13 {dimension_numbers = #tpu.dot_dimension_numbers<[1], [0], [0], [1], [0, 0, 1, 1], [], []>} : vector<16x16xbf16>, vector<16x128xbf16>, vector<16x128xf32> -> vector<16x128xf32>
    %25 = arith.addf %18, %24 : vector<16x128xf32>
    %c29_i32 = arith.constant 29 : i32
    %26 = tpu.dynamic_rotate %6 by %c29_i32 dim 0 : vector<32x16xf32>, i32 -> vector<32x16xf32>
    %27 = vector.extract_strided_slice %26 {offsets = [0, 0], sizes = [16, 16], strides = [1, 1]} : vector<32x16xf32> to vector<16x16xf32>
    %28 = arith.truncf %27 : vector<16x16xf32> to vector<16x16xbf16>
    %c3 = arith.constant 3 : index
    %c0_14 = arith.constant 0 : index
    %c0_15 = arith.constant 0 : index
    %29 = vector.load %arg4[%c3, %c0_14, %c0_15] : memref<7x16x128xbf16, #tpu.memory_space<vmem>>, vector<1x16x128xbf16>
    %30 = vector.shape_cast %29 : vector<1x16x128xbf16> to vector<16x128xbf16>
    %cst_16 = arith.constant dense<0.000000e+00> : vector<16x128xf32>
    %31 = tpu.matmul %28, %30, %cst_16 {dimension_numbers = #tpu.dot_dimension_numbers<[1], [0], [0], [1], [0, 0, 1, 1], [], []>} : vector<16x16xbf16>, vector<16x128xbf16>, vector<16x128xf32> -> vector<16x128xf32>
    %32 = arith.addf %25, %31 : vector<16x128xf32>
    %c28_i32 = arith.constant 28 : i32
    %33 = tpu.dynamic_rotate %6 by %c28_i32 dim 0 : vector<32x16xf32>, i32 -> vector<32x16xf32>
    %34 = vector.extract_strided_slice %33 {offsets = [0, 0], sizes = [16, 16], strides = [1, 1]} : vector<32x16xf32> to vector<16x16xf32>
    %35 = arith.truncf %34 : vector<16x16xf32> to vector<16x16xbf16>
    %c4 = arith.constant 4 : index
    %c0_17 = arith.constant 0 : index
    %c0_18 = arith.constant 0 : index
    %36 = vector.load %arg4[%c4, %c0_17, %c0_18] : memref<7x16x128xbf16, #tpu.memory_space<vmem>>, vector<1x16x128xbf16>
    %37 = vector.shape_cast %36 : vector<1x16x128xbf16> to vector<16x128xbf16>
    %cst_19 = arith.constant dense<0.000000e+00> : vector<16x128xf32>
    %38 = tpu.matmul %35, %37, %cst_19 {dimension_numbers = #tpu.dot_dimension_numbers<[1], [0], [0], [1], [0, 0, 1, 1], [], []>} : vector<16x16xbf16>, vector<16x128xbf16>, vector<16x128xf32> -> vector<16x128xf32>
    %39 = arith.addf %32, %38 : vector<16x128xf32>
    %c27_i32 = arith.constant 27 : i32
    %40 = tpu.dynamic_rotate %6 by %c27_i32 dim 0 : vector<32x16xf32>, i32 -> vector<32x16xf32>
    %41 = vector.extract_strided_slice %40 {offsets = [0, 0], sizes = [16, 16], strides = [1, 1]} : vector<32x16xf32> to vector<16x16xf32>
    %42 = arith.truncf %41 : vector<16x16xf32> to vector<16x16xbf16>
    %c5 = arith.constant 5 : index
    %c0_20 = arith.constant 0 : index
    %c0_21 = arith.constant 0 : index
    %43 = vector.load %arg4[%c5, %c0_20, %c0_21] : memref<7x16x128xbf16, #tpu.memory_space<vmem>>, vector<1x16x128xbf16>
    %44 = vector.shape_cast %43 : vector<1x16x128xbf16> to vector<16x128xbf16>
    %cst_22 = arith.constant dense<0.000000e+00> : vector<16x128xf32>
    %45 = tpu.matmul %42, %44, %cst_22 {dimension_numbers = #tpu.dot_dimension_numbers<[1], [0], [0], [1], [0, 0, 1, 1], [], []>} : vector<16x16xbf16>, vector<16x128xbf16>, vector<16x128xf32> -> vector<16x128xf32>
    %46 = arith.addf %39, %45 : vector<16x128xf32>
    %c26_i32 = arith.constant 26 : i32
    %47 = tpu.dynamic_rotate %6 by %c26_i32 dim 0 : vector<32x16xf32>, i32 -> vector<32x16xf32>
    %48 = vector.extract_strided_slice %47 {offsets = [0, 0], sizes = [16, 16], strides = [1, 1]} : vector<32x16xf32> to vector<16x16xf32>
    %49 = arith.truncf %48 : vector<16x16xf32> to vector<16x16xbf16>
    %c6 = arith.constant 6 : index
    %c0_23 = arith.constant 0 : index
    %c0_24 = arith.constant 0 : index
    %50 = vector.load %arg4[%c6, %c0_23, %c0_24] : memref<7x16x128xbf16, #tpu.memory_space<vmem>>, vector<1x16x128xbf16>
    %51 = vector.shape_cast %50 : vector<1x16x128xbf16> to vector<16x128xbf16>
    %cst_25 = arith.constant dense<0.000000e+00> : vector<16x128xf32>
    %52 = tpu.matmul %49, %51, %cst_25 {dimension_numbers = #tpu.dot_dimension_numbers<[1], [0], [0], [1], [0, 0, 1, 1], [], []>} : vector<16x16xbf16>, vector<16x128xbf16>, vector<16x128xf32> -> vector<16x128xf32>
    %53 = arith.addf %46, %52 : vector<16x128xf32>
    %54 = arith.truncf %53 : vector<16x128xf32> to vector<16x128xbf16>
    %c0_26 = arith.constant 0 : index
    %c0_27 = arith.constant 0 : index
    %c0_28 = arith.constant 0 : index
    %55 = vector.load %arg5[%c0_26, %c0_27, %c0_28] : memref<1x16x128xbf16, #tpu.memory_space<vmem>>, vector<1x16x128xbf16>
    %56 = vector.shape_cast %55 : vector<1x16x128xbf16> to vector<16x128xbf16>
    %57 = vector.shape_cast %54 : vector<16x128xbf16> to vector<1x16x128xbf16>
    tpu.vector_store %arg5[%c0_26, %c0_27, %c0_28], %57 {strides = array<i32>} : memref<1x16x128xbf16, #tpu.memory_space<vmem>>, vector<1x16x128xbf16>,
    %cst_29 = arith.constant dense<0.000000e+00> : vector<128xf32>
    %58 = vector.multi_reduction <add>, %53, %cst_29 [0] : vector<16x128xf32> to vector<128xf32>
    %59 = vector.shape_cast %58 : vector<128xf32> to vector<1x128xf32>
    %c0_30 = arith.constant 0 : index
    %c0_31 = arith.constant 0 : index
    %c0_32 = arith.constant 0 : index
    %c0_33 = arith.constant 0 : index
    %60 = vector.load %arg6[%c0_30, %c0_31, %c0_32, %c0_33] : memref<1x1x1x128xf32, #tpu.memory_space<vmem>>, vector<1x1x1x128xf32>
    %61 = vector.shape_cast %60 : vector<1x1x1x128xf32> to vector<1x128xf32>
    %62 = vector.shape_cast %59 : vector<1x128xf32> to vector<1x1x1x128xf32>
    tpu.vector_store %arg6[%c0_30, %c0_31, %c0_32, %c0_33], %62 {strides = array<i32>} : memref<1x1x1x128xf32, #tpu.memory_space<vmem>>, vector<1x1x1x128xf32>,
    %63 = arith.mulf %53, %53 : vector<16x128xf32>
    %cst_34 = arith.constant dense<0.000000e+00> : vector<128xf32>
    %64 = vector.multi_reduction <add>, %63, %cst_34 [0] : vector<16x128xf32> to vector<128xf32>
    %65 = vector.shape_cast %64 : vector<128xf32> to vector<1x128xf32>
    %c0_35 = arith.constant 0 : index
    %c0_36 = arith.constant 0 : index
    %c0_37 = arith.constant 0 : index
    %c0_38 = arith.constant 0 : index
    %66 = vector.load %arg7[%c0_35, %c0_36, %c0_37, %c0_38] : memref<1x1x1x128xf32, #tpu.memory_space<vmem>>, vector<1x1x1x128xf32>
    %67 = vector.shape_cast %66 : vector<1x1x1x128xf32> to vector<1x128xf32>
    %68 = vector.shape_cast %65 : vector<1x128xf32> to vector<1x1x1x128xf32>
    tpu.vector_store %arg7[%c0_35, %c0_36, %c0_37, %c0_38], %68 {strides = array<i32>} : memref<1x1x1x128xf32, #tpu.memory_space<vmem>>, vector<1x1x1x128xf32>,
    return
  }
  func.func @transform_0(%arg0: i32, %arg1: i32) -> (i32, i32, i32) {
    %c0_i32 = arith.constant 0 : i32
    %c0_i32_0 = arith.constant 0 : i32
    return %arg0, %arg1, %c0_i32 : i32, i32, i32
  }
  func.func @transform_1(%arg0: i32, %arg1: i32) -> (i32, i32, i32) {
    %c1_i32 = arith.constant 1 : i32
    %0 = arith.addi %arg1, %c1_i32 : i32
    %c1_i32_0 = arith.constant 1 : i32
    %1 = arith.muli %0, %c1_i32_0 : i32
    %c0_i32 = arith.constant 0 : i32
    %c0_i32_1 = arith.constant 0 : i32
    return %arg0, %1, %c0_i32 : i32, i32, i32
  }
  func.func @transform_2(%arg0: i32, %arg1: i32) -> (i32, i32, i32) {
    %c0_i32 = arith.constant 0 : i32
    %c0_i32_0 = arith.constant 0 : i32
    %c0_i32_1 = arith.constant 0 : i32
    %c0_i32_2 = arith.constant 0 : i32
    return %c0_i32, %c0_i32_0, %c0_i32_1 : i32, i32, i32
  }
  func.func @transform_3(%arg0: i32, %arg1: i32) -> (i32, i32, i32) {
    %c0_i32 = arith.constant 0 : i32
    %c0_i32_0 = arith.constant 0 : i32
    return %arg0, %arg1, %c0_i32 : i32, i32, i32
  }
  func.func @transform_4(%arg0: i32, %arg1: i32) -> (i32, i32, i32, i32) {
    %c0_i32 = arith.constant 0 : i32
    %c0_i32_0 = arith.constant 0 : i32
    %c0_i32_1 = arith.constant 0 : i32
    return %arg0, %arg1, %c0_i32, %c0_i32_0 : i32, i32, i32, i32
  }
  func.func @transform_5(%arg0: i32, %arg1: i32) -> (i32, i32, i32, i32) {
    %c0_i32 = arith.constant 0 : i32
    %c0_i32_0 = arith.constant 0 : i32
    %c0_i32_1 = arith.constant 0 : i32
    return %arg0, %arg1, %c0_i32, %c0_i32_0 : i32, i32, i32, i32
  }
}

module attributes {stable_mosaic.version = 11 : i64} {
  func.func @_bn_relu_conv1x1_kernel(%arg0: i32, %arg1: i32, %arg2: memref<1x16x128xbf16, #tpu.memory_space<vmem>>, %arg3: memref<1x128xf32, #tpu.memory_space<vmem>>, %arg4: memref<1x128xf32, #tpu.memory_space<vmem>>, %arg5: memref<128x128xbf16, #tpu.memory_space<vmem>>, %arg6: memref<1x128xf32, #tpu.memory_space<vmem>>, %arg7: memref<1x16x128xf32, #tpu.memory_space<vmem>>) attributes {dimension_semantics = [#tpu.dimension_semantics<parallel>, #tpu.dimension_semantics<parallel>], iteration_bounds = array<i64: 2, 1>, scalar_prefetch = 0 : i64, scratch_operands = 0 : i64, tpu.core_type = #tpu.core_type<tc>, window_params = [{transform_indices = @transform_0, window_bounds = array<i64: 1, 16, 128>}, {pipeline_mode = #tpu.pipeline_mode<synchronous>, transform_indices = @transform_1, window_bounds = array<i64: 1, 128>}, {pipeline_mode = #tpu.pipeline_mode<synchronous>, transform_indices = @transform_2, window_bounds = array<i64: 1, 128>}, {pipeline_mode = #tpu.pipeline_mode<synchronous>, transform_indices = @transform_3, window_bounds = array<i64: 128, 128>}, {pipeline_mode = #tpu.pipeline_mode<synchronous>, transform_indices = @transform_4, window_bounds = array<i64: 1, 128>}, {transform_indices = @transform_5, window_bounds = array<i64: 1, 16, 128>}]} {
    %c0 = arith.constant 0 : index
    %c0_0 = arith.constant 0 : index
    %c0_1 = arith.constant 0 : index
    %0 = vector.load %arg2[%c0, %c0_0, %c0_1] : memref<1x16x128xbf16, #tpu.memory_space<vmem>>, vector<1x16x128xbf16>
    %1 = vector.shape_cast %0 : vector<1x16x128xbf16> to vector<16x128xbf16>
    %2 = arith.extf %1 : vector<16x128xbf16> to vector<16x128xf32>
    %c0_2 = arith.constant 0 : index
    %c0_3 = arith.constant 0 : index
    %3 = vector.load %arg3[%c0_2, %c0_3] : memref<1x128xf32, #tpu.memory_space<vmem>>, vector<1x128xf32>
    %4 = vector.broadcast %3 : vector<1x128xf32> to vector<16x128xf32>
    %5 = arith.mulf %2, %4 : vector<16x128xf32>
    %c0_4 = arith.constant 0 : index
    %c0_5 = arith.constant 0 : index
    %6 = vector.load %arg4[%c0_4, %c0_5] : memref<1x128xf32, #tpu.memory_space<vmem>>, vector<1x128xf32>
    %7 = vector.broadcast %6 : vector<1x128xf32> to vector<16x128xf32>
    %8 = arith.addf %5, %7 : vector<16x128xf32>
    %cst = arith.constant 0.000000e+00 : f32
    %9 = vector.broadcast %cst : f32 to vector<16x128xf32>
    %10 = arith.maximumf %8, %9 : vector<16x128xf32>
    %11 = arith.truncf %10 : vector<16x128xf32> to vector<16x128xbf16>
    %c0_6 = arith.constant 0 : index
    %c0_7 = arith.constant 0 : index
    %12 = vector.load %arg5[%c0_6, %c0_7] : memref<128x128xbf16, #tpu.memory_space<vmem>>, vector<128x128xbf16>
    %cst_8 = arith.constant dense<0.000000e+00> : vector<16x128xf32>
    %13 = tpu.matmul %11, %12, %cst_8 {dimension_numbers = #tpu.dot_dimension_numbers<[1], [0], [0], [1], [0, 0, 1, 1], [], []>} : vector<16x128xbf16>, vector<128x128xbf16>, vector<16x128xf32> -> vector<16x128xf32>
    %c0_9 = arith.constant 0 : index
    %c0_10 = arith.constant 0 : index
    %14 = vector.load %arg6[%c0_9, %c0_10] : memref<1x128xf32, #tpu.memory_space<vmem>>, vector<1x128xf32>
    %15 = vector.broadcast %14 : vector<1x128xf32> to vector<16x128xf32>
    %16 = arith.addf %13, %15 : vector<16x128xf32>
    %c0_11 = arith.constant 0 : index
    %c0_12 = arith.constant 0 : index
    %c0_13 = arith.constant 0 : index
    %17 = vector.load %arg7[%c0_11, %c0_12, %c0_13] : memref<1x16x128xf32, #tpu.memory_space<vmem>>, vector<1x16x128xf32>
    %18 = vector.shape_cast %17 : vector<1x16x128xf32> to vector<16x128xf32>
    %19 = vector.shape_cast %16 : vector<16x128xf32> to vector<1x16x128xf32>
    tpu.vector_store %arg7[%c0_11, %c0_12, %c0_13], %19 {strides = array<i32>} : memref<1x16x128xf32, #tpu.memory_space<vmem>>, vector<1x16x128xf32>,
    return
  }
  func.func @transform_0(%arg0: i32, %arg1: i32) -> (i32, i32, i32) {
    %c0_i32 = arith.constant 0 : i32
    %c0_i32_0 = arith.constant 0 : i32
    return %arg0, %arg1, %c0_i32 : i32, i32, i32
  }
  func.func @transform_1(%arg0: i32, %arg1: i32) -> (i32, i32) {
    %c0_i32 = arith.constant 0 : i32
    %c0_i32_0 = arith.constant 0 : i32
    %c0_i32_1 = arith.constant 0 : i32
    return %c0_i32, %c0_i32_0 : i32, i32
  }
  func.func @transform_2(%arg0: i32, %arg1: i32) -> (i32, i32) {
    %c0_i32 = arith.constant 0 : i32
    %c0_i32_0 = arith.constant 0 : i32
    %c0_i32_1 = arith.constant 0 : i32
    return %c0_i32, %c0_i32_0 : i32, i32
  }
  func.func @transform_3(%arg0: i32, %arg1: i32) -> (i32, i32) {
    %c0_i32 = arith.constant 0 : i32
    %c0_i32_0 = arith.constant 0 : i32
    %c0_i32_1 = arith.constant 0 : i32
    return %c0_i32, %c0_i32_0 : i32, i32
  }
  func.func @transform_4(%arg0: i32, %arg1: i32) -> (i32, i32) {
    %c0_i32 = arith.constant 0 : i32
    %c0_i32_0 = arith.constant 0 : i32
    %c0_i32_1 = arith.constant 0 : i32
    return %c0_i32, %c0_i32_0 : i32, i32
  }
  func.func @transform_5(%arg0: i32, %arg1: i32) -> (i32, i32, i32) {
    %c0_i32 = arith.constant 0 : i32
    %c0_i32_0 = arith.constant 0 : i32
    return %arg0, %arg1, %c0_i32 : i32, i32, i32
  }
}

</mosaic_0001>

<bundles_post_ra>
// kernel: _lambda_.13
= control target key start
LH: loop header
LB: loop body
LE: loop exit
PB: predicated region body
PF: predicated region fallthrough
CT: control target
= control target key end

     0   :  { %s427_s12 = smov 0   ;;  %s429_s13 = smov 0   ;;  %s463_s0 = inlined_call_operand.vmem [shape: bf16[2,16,128], index: 0, kind: input, shape index: {}]   ;;  %s464_s1 = inlined_call_operand.vmem [shape: f32[1,128], index: 1, kind: input, shape index: {}]   ;;  %s465_s2 = inlined_call_operand.vmem [shape: f32[1,128], index: 2, kind: input, shape index: {}]   ;;  %s466_s3 = inlined_call_operand.vmem [shape: bf16[2,16,128], index: 3, kind: output, shape index: {}]  }
   0x1   :  { %s431_s14 = smov 0  }
   0x2 LB: > { %s25_s15 = sadd.s32 1, %s401_s13  ;;  %p335_p0 = scmp.ge.s32.totalorder %s405_s14, 1  ;;  %s405_s14 = sphi %s431_s14, %s13_s14   ;;  %s401_s13 = sphi %s429_s13, %s468_s13   ;;  %s397_s12 = sphi %s427_s12, %s467_s12  }
   0x3   : > { %p27_p1 = scmp.ge.s32.totalorder %s25_s15, 2  ;;  %p158_p2 = scmp.lt.s32.totalorder %s405_s14, 3 }
   0x5   : > { %s470_s15 = smov (%p27_p1, %s25_s15), 0  ;;  %p159_p3 = pnand %p335_p0, %p158_p2 }
   0x6   : > { %p191_p4 = scmp.lt.s32.totalorder (!%p159_p3), %s397_s12, 1  ;;  %v340_v1 = vld [vmem:[%s464_s1] ss:$0 sm:$0xff] (!%p159_p3) }
   0x7   : > { %162 = sbr.rel (%p159_p3) target bundleno = 29 (0x1d), region = 32  ;;  %v341_v4 = vld [vmem:[%s465_s2] ss:$0 sm:$0xff] (!%p159_p3) }
   0xe   : > { %s472_s12 = smov (!%p191_p4, %s397_s12), 1 }
   0xf   : > { %s346_s16 = sshll.u32 %s472_s12, 3 }
  0x10   : > { %s198_s19 = scalar_lea.vmem %s463_s0, %s346_s16  ;;  %s208_s26 = scalar_lea.vmem %s466_s3, %s346_s16 }
  0x11   : > { %v351_v0 = vld [vmem:[%s198_s19] sm:$0xff]  }
  0x12   : > { %v352_v2 = vunpack.c.l.bf16 %v351_v0  ;;  %v353_v3 = vunpack.c.h.bf16 %v351_v0 }
  0x14   : > { %v221_v5 = vmul.f32 %v352_v2, %v340_v1  ;;  %v222_v6 = vmul.f32 %v353_v3, %v340_v1 }
  0x16   : > { %v230_v7 = vadd.f32 %v341_v4, %v221_v5  ;;  %v231_v8 = vadd.f32 %v341_v4, %v222_v6 }
  0x18   : > { %v232_v9 = vmax.f32 %v230_v7, 0.0  ;;  %v233_v10 = vmax.f32 %v231_v8, 0.0 }
  0x1a   : > { %v357_v11 = vpack.c.bf16 %v233_v10, %v232_v9 }
  0x1c   : > { %358 = vst [vmem:[%s208_s26] sm:$0xff] %v357_v11  }
  0x1d PF: > { %s13_s14 = sadd.s32 1, %s405_s14   ;;  %s467_s12 = smov %s401_s13 }
  0x1e   : > { %p10_p5 = scmp.ge.s32.totalorder %s13_s14, 4   ;;  %s468_s13 = smov %s470_s15 }
  0x20   :  { %12 = sbr.rel (!%p10_p5) target bundleno = 2 (0x2), region = 62 }

// kernel: _lambda_.12
= control target key start
LH: loop header
LB: loop body
LE: loop exit
PB: predicated region body
PF: predicated region fallthrough
CT: control target
= control target key end

     0   :  { %s945_s18 = smov 0   ;;  %s947_s19 = smov 0   ;;  %s1017_s0 = inlined_call_operand.vmem [shape: bf16[2,32,8], index: 0, kind: input, shape index: {}, may-alias: {0,1}]   ;;  %s1018_s1 = inlined_call_operand.vmem [shape: bf16[2,32,8], index: 1, kind: input, shape index: {}, may-alias: {0,1}]   ;;  %s1019_s2 = inlined_call_operand.vmem [shape: bf16[4,8,128], index: 2, kind: input, shape index: {}]   ;;  %s1020_s3 = inlined_call_operand.vmem [shape: bf16[2,16,128], index: 3, kind: output, shape index: {0}]   ;;  %s1021_s4 = inlined_call_operand.vmem [shape: f32[2,1,1,128], index: 4, kind: output, shape index: {1}]   ;;  %s1022_s5 = inlined_call_operand.vmem [shape: f32[2,1,1,128], index: 5, kind: output, shape index: {2}]  }
   0x1   :  { %s949_s20 = smov 0  }
   0x2 LB: > { %s28_s21 = sadd.s32 1, %s907_s19  ;;  %p788_p0 = scmp.ge.s32.totalorder %s911_s20, 1  ;;  %s911_s20 = sphi %s949_s20, %s16_s20   ;;  %s907_s19 = sphi %s947_s19, %s1024_s19   ;;  %s903_s18 = sphi %s945_s18, %s1023_s18  }
   0x3   : > { %p30_p1 = scmp.ge.s32.totalorder %s28_s21, 2  ;;  %p238_p2 = scmp.lt.s32.totalorder %s911_s20, 3 }
   0x5   : > { %s1026_s21 = smov (%p30_p1, %s28_s21), 0  ;;  %p239_p3 = pnand %p788_p0, %p238_p2 }
   0x6   : > { %v796_v0 = vld [vmem:[%s1019_s2 + $0x4] sm:$0xf] (!%p239_p3)  ;;  %vm364_vm0 = vcmask (!%p239_p3), 1043456   ;;  %v799_v1 = vld [vmem:[%s1019_s2 + $0x8] sm:$0xf] (!%p239_p3)  ;;  %v913_v2 = vmov (!%p239_p3), 0.0   ;;  %v352_v5 = vlaneseq (!%p239_p3) }
   0x7   : > { %242 = sbr.rel (%p239_p3) target bundleno = 267 (0x10b), region = 32  ;;  %827 = vmatprep.subr.bf16.mxu1 (!%p239_p3), %v913_v2  ;;  %839 = vmatprep.subr.bf16.mxu0 (!%p239_p3), %v913_v2  ;;  %v366_v3 = vsel (!%p239_p3), %vm364_vm0, %v796_v0, 0  ;;  %v469_v4 = vsel (!%p239_p3), %vm364_vm0, %v799_v1, 0  ;;  %p297_p4 = scmp.lt.s32.totalorder (!%p239_p3), %s903_s18, 1  ;;  %vm914_vm1 = vmmov (!%p239_p3), 0   ;;  %vm360_vm4 = vcmask (!%p239_p3), 64512  }
   0x8   : > { %828 = vmatpush3.bf16.msra.mxu1 (!%p239_p3), %v366_v3  ;;  %840 = vmatpush3.bf16.msra.mxu0 (!%p239_p3), %v469_v4  ;;  %v353_v6 = vshrl.u32 (!%p239_p3), %v352_v5, 7  ;;  %v348_v17 = vld [vmem:[%s1019_s2] sm:$0xf] (!%p239_p3)  ;;  %v801_v19 = vld [vmem:[%s1019_s2 + $0xc] sm:$0xf] (!%p239_p3) }
   0x9   : > { %829 = vmatprep.mubr.msk.bf16.mxu1 (!%p239_p3), %vm914_vm1, %v913_v2  ;;  %833 = vmatprep.subr.bf16.mxu1 (!%p239_p3), %v913_v2  ;;  %v413_v25 = vsel (!%p239_p3), %vm364_vm0, %v348_v17, 0  ;;  %v527_v27 = vsel (!%p239_p3), %vm364_vm0, %v801_v19, 0 }
   0xa   : > { %841 = vmatprep.mubr.msk.bf16.mxu0 (!%p239_p3), %vm914_vm1, %v913_v2  ;;  %845 = vmatprep.subr.bf16.mxu0 (!%p239_p3), %v913_v2  ;;  %vm354_vm2 = vcmp.lt.s32.totalorder (!%p239_p3), %v353_v6, 7  ;;  %vm459_vm3 = vcmp.lt.s32.totalorder (!%p239_p3), %v353_v6, 6  ;;  %vm517_vm5 = vcmp.lt.s32.totalorder (!%p239_p3), %v353_v6, 5 }
   0xe   : > { %s1028_s18 = smov (!%p297_p4, %s903_s18), 1 }
   0xf   : > { %s807_s26 = sshll.u32 %s1028_s18, 4  ;;  %s810_s13 = sshll.u32 %s1028_s18, 3 }
  0x10   : > { %s304_s29 = scalar_lea.vmem %s1017_s0, %s807_s26  ;;  %s809_s30 = sadd.s32 8, %s807_s26 }
  0x11   : > { %s315_s8 = scalar_lea.vmem %s1018_s1, %s809_s30  ;;  %v341_v7 = vld [vmem:[%s304_s29] sm:$0xff]   ;;  %s326_s16 = scalar_lea.vmem %s1020_s3, %s810_s13 }
  0x12   : > { %v343_v8 = vunpack.c.l.bf16 %v341_v7  ;;  %v344_v9 = vunpack.c.h.bf16 %v341_v7  ;;  %v345_v10 = vld [vmem:[%s315_s8] sm:$0xf]  ;;  %s333_s23 = scalar_lea.vmem %s1021_s4, %s1028_s18  ;;  %s339_s26 = scalar_lea.vmem %s1022_s5, %s1028_s18 }
  0x13   : > { %v346_v11 = vunpack.c.l.bf16 %v345_v10 }
  0x14   : > { %v349_v12 = vrot.slane %v343_v8, 1  ;;  %v350_v13 = vrot.slane %v344_v9, 1  ;;  %v456_v14 = vrot.slane %v343_v8, 2  ;;  %v457_v15 = vrot.slane %v344_v9, 2 }
  0x15   : > { %v351_v16 = vrot.slane %v346_v11, 1  ;;  %v458_v18 = vrot.slane %v346_v11, 2  ;;  %v514_v28 = vrot.slane %v343_v8, 3  ;;  %v515_v29 = vrot.slane %v344_v9, 3 }
  0x16   : > { %v356_v20 = vsel %vm354_vm2, %v349_v12, %v350_v13  ;;  %v461_v21 = vsel %vm459_vm3, %v456_v14, %v457_v15  ;;  %v516_v30 = vrot.slane %v346_v11, 3 }
  0x17   : > { %v355_v22 = vsel %vm354_vm2, %v350_v13, %v351_v16  ;;  %v460_v23 = vsel %vm459_vm3, %v457_v15, %v458_v18  ;;  %v519_v32 = vsel %vm517_vm5, %v514_v28, %v515_v29 }
  0x18   : > { %v357_v24 = vpack.c.bf16 %v355_v22, %v356_v20  ;;  %v462_v26 = vpack.c.bf16 %v460_v23, %v461_v21  ;;  %v518_v31 = vsel %vm517_vm5, %v515_v29, %v516_v30 }
  0x19   : > { %v520_v33 = vpack.c.bf16 %v518_v31, %v519_v32 }
  0x1a   : > { %830 = vmatmul.mubr.msk.bf16.vlgmr.msra.gmra.mrb[0].mxu1 %vm360_vm4, %v357_v24  ;;  %842 = vmatmul.mubr.msk.bf16.vlgmr.msra.gmra.mrb[0].mxu0 %vm360_vm4, %v462_v26 }
  0x1b   : > { %834 = vmatpush3.bf16.msra.mxu1 %v413_v25  ;;  %846 = vmatpush3.bf16.msra.mxu0 %v527_v27 }
  0x1c   : > { %835 = vmatprep.mubr.msk.bf16.mxu1 %vm914_vm1, %v913_v2  ;;  %847 = vmatprep.mubr.msk.bf16.mxu0 %vm914_vm1, %v913_v2 }
  0x26   : > { %836 = vmatmul.mubr.msk.bf16.vlgmr.msra.gmra.mrb[0].mxu1 %vm360_vm4, %v341_v7  ;;  %848 = vmatmul.mubr.msk.bf16.vlgmr.msra.gmra.mrb[0].mxu0 %vm360_vm4, %v520_v33 }
  0xf9   : > { %v449_v34 = vpop.f32.mrb[0].mxu1  ;;  %v563_v35 = vpop.f32.mrb[0].mxu0 }
  0xfa   : > { %v851_v36 = vadd.f32 %v563_v35, %v449_v34  ;;  %v837_v37 = vpop.f32.mrb[1].mxu1  ;;  %v849_v38 = vpop.f32.mrb[1].mxu0 }
  0xfb   : > { %v452_v39 = vpop.f32.mrb[2].mxu1  ;;  %v566_v40 = vpop.f32.mrb[2].mxu0 }
  0xfc   : > { %v592_v41 = vrot.slane %v851_v36, 4  ;;  %v599_v42 = vmul.f32 %v851_v36, %v851_v36  ;;  %v852_v43 = vadd.f32 %v566_v40, %v452_v39  ;;  %v838_v44 = vpop.f32.mrb[3].mxu1  ;;  %v850_v45 = vpop.f32.mrb[3].mxu0 }
  0xfe   : > { %v593_v46 = vadd.f32 %v851_v36, %v592_v41  ;;  %v602_v47 = vrot.slane %v599_v42, 4  ;;  %v816_v48 = vpack.c.bf16 %v852_v43, %v851_v36 }
 0x100   : > { %v594_v49 = vrot.slane %v593_v46, 2  ;;  %v603_v50 = vadd.f32 %v602_v47, %v599_v42  ;;  %817 = vst [vmem:[%s326_s16] sm:$0xff] %v816_v48  }
 0x102   : > { %v595_v51 = vadd.f32 %v594_v49, %v593_v46  ;;  %v604_v52 = vrot.slane %v603_v50, 2 }
 0x104   : > { %v596_v53 = vrot.slane %v595_v51, 1  ;;  %v605_v54 = vadd.f32 %v604_v52, %v603_v50 }
 0x106   : > { %v597_v55 = vadd.f32 %v596_v53, %v595_v51  ;;  %v606_v56 = vrot.slane %v605_v54, 1 }
 0x108   : > { %598 = vst [vmem:[%s333_s23] sm:$0x1] %v597_v55  ;;  %v607_v57 = vadd.f32 %v606_v56, %v605_v54 }
 0x10a   : > { %608 = vst [vmem:[%s339_s26] sm:$0x1] %v607_v57 }
 0x10b PF: > { %s16_s20 = sadd.s32 1, %s911_s20   ;;  %s1023_s18 = smov %s907_s19 }
 0x10c   : > { %p13_p5 = scmp.ge.s32.totalorder %s16_s20, 4   ;;  %s1024_s19 = smov %s1026_s21 }
 0x10e   :  { %15 = sbr.rel (!%p13_p5) target bundleno = 2 (0x2), region = 92 }

// kernel: _lambda_.14
= control target key start
LH: loop header
LB: loop body
LE: loop exit
PB: predicated region body
PF: predicated region fallthrough
CT: control target
= control target key end

     0   :  { %s971_s18 = smov 0   ;;  %s973_s19 = smov 0   ;;  %s1039_s0 = inlined_call_operand.vmem [shape: bf16[2,32,16], index: 0, kind: input, shape index: {}, may-alias: {0,1}]   ;;  %s1040_s1 = inlined_call_operand.vmem [shape: bf16[2,32,16], index: 1, kind: input, shape index: {}, may-alias: {0,1}]   ;;  %s1041_s2 = inlined_call_operand.vmem [shape: bf16[4,16,128], index: 2, kind: input, shape index: {}]   ;;  %s1042_s3 = inlined_call_operand.vmem [shape: bf16[2,16,128], index: 3, kind: output, shape index: {0}]   ;;  %s1043_s4 = inlined_call_operand.vmem [shape: f32[2,1,1,128], index: 4, kind: output, shape index: {1}]   ;;  %s1044_s5 = inlined_call_operand.vmem [shape: f32[2,1,1,128], index: 5, kind: output, shape index: {2}]  }
   0x1   :  { %s975_s20 = smov 0  }
   0x2 LB: > { %s28_s21 = sadd.s32 1, %s933_s19  ;;  %p803_p0 = scmp.ge.s32.totalorder %s937_s20, 1  ;;  %s937_s20 = sphi %s975_s20, %s16_s20   ;;  %s933_s19 = sphi %s973_s19, %s1046_s19   ;;  %s929_s18 = sphi %s971_s18, %s1045_s18  }
   0x3   : > { %p30_p1 = scmp.ge.s32.totalorder %s28_s21, 2  ;;  %p238_p2 = scmp.lt.s32.totalorder %s937_s20, 3 }
   0x5   : > { %s1048_s21 = smov (%p30_p1, %s28_s21), 0  ;;  %p239_p3 = pnand %p803_p0, %p238_p2 }
   0x6   : > { %v909_v0 = vld [vmem:[%s1041_s2 + $0x8] sm:$0xff] (!%p239_p3)   ;;  %v939_v1 = vmov (!%p239_p3), 0.0   ;;  %v910_v2 = vld [vmem:[%s1041_s2 + $0x10] sm:$0xff] (!%p239_p3)   ;;  %vm940_vm0 = vmmov (!%p239_p3), 0   ;;  %p297_p4 = scmp.lt.s32.totalorder (!%p239_p3), %s929_s18, 1  ;;  %v353_v3 = vlaneseq (!%p239_p3)  ;;  %vm368_vm3 = vcmask (!%p239_p3), 130048  }
   0x7   : > { %242 = sbr.rel (%p239_p3) target bundleno = 268 (0x10c), region = 32  ;;  %849 = vmatprep.subr.bf16.mxu1 (!%p239_p3), %v939_v1  ;;  %861 = vmatprep.subr.bf16.mxu0 (!%p239_p3), %v939_v1  ;;  %v911_v19 = vld [vmem:[%s1041_s2] sm:$0xff] (!%p239_p3)   ;;  %v912_v21 = vld [vmem:[%s1041_s2 + $0x18] sm:$0xff] (!%p239_p3)  }
   0x8   : > { %850 = vmatpush3.bf16.msra.mxu1 (!%p239_p3), %v909_v0  ;;  %851 = vmatprep.mubr.msk.bf16.mxu1 (!%p239_p3), %vm940_vm0, %v939_v1  ;;  %v354_v4 = vshrl.u32 (!%p239_p3), %v353_v3, 7 }
   0x9   : > { %862 = vmatpush3.bf16.msra.mxu0 (!%p239_p3), %v910_v2  ;;  %855 = vmatprep.subr.bf16.mxu1 (!%p239_p3), %v939_v1 }
   0xa   : > { %863 = vmatprep.mubr.msk.bf16.mxu0 (!%p239_p3), %vm940_vm0, %v939_v1  ;;  %867 = vmatprep.subr.bf16.mxu0 (!%p239_p3), %v939_v1  ;;  %vm355_vm1 = vcmp.lt.s32.totalorder (!%p239_p3), %v354_v4, 7  ;;  %vm466_vm2 = vcmp.lt.s32.totalorder (!%p239_p3), %v354_v4, 6  ;;  %vm528_vm4 = vcmp.lt.s32.totalorder (!%p239_p3), %v354_v4, 5  ;;  %vm602_vm5 = vcmp.lt.s32.totalorder (!%p239_p3), %v354_v4, 4 }
   0xe   : > { %s1050_s18 = smov (!%p297_p4, %s929_s18), 1 }
   0xf   : > { %s829_s26 = sshll.u32 %s1050_s18, 4  ;;  %s832_s13 = sshll.u32 %s1050_s18, 3 }
  0x10   : > { %s304_s29 = scalar_lea.vmem %s1039_s0, %s829_s26  ;;  %s831_s30 = sadd.s32 8, %s829_s26 }
  0x11   : > { %s315_s8 = scalar_lea.vmem %s1040_s1, %s831_s30  ;;  %v341_v5 = vld [vmem:[%s304_s29] sm:$0xff]   ;;  %s326_s16 = scalar_lea.vmem %s1042_s3, %s832_s13 }
  0x12   : > { %v343_v6 = vunpack.c.l.bf16 %v341_v5  ;;  %v344_v7 = vunpack.c.h.bf16 %v341_v5  ;;  %v345_v8 = vld [vmem:[%s315_s8] sm:$0xf]  ;;  %s333_s23 = scalar_lea.vmem %s1043_s4, %s1050_s18  ;;  %s339_s26 = scalar_lea.vmem %s1044_s5, %s1050_s18 }
  0x13   : > { %v346_v9 = vunpack.c.l.bf16 %v345_v8 }
  0x14   : > { %v350_v10 = vrot.slane %v343_v6, 1  ;;  %v351_v11 = vrot.slane %v344_v7, 1  ;;  %v463_v12 = vrot.slane %v343_v6, 2  ;;  %v464_v13 = vrot.slane %v344_v7, 2 }
  0x15   : > { %v352_v14 = vrot.slane %v346_v9, 1  ;;  %v465_v15 = vrot.slane %v346_v9, 2  ;;  %v525_v24 = vrot.slane %v343_v6, 3  ;;  %v526_v25 = vrot.slane %v344_v7, 3 }
  0x16   : > { %v357_v16 = vsel %vm355_vm1, %v350_v10, %v351_v11  ;;  %v468_v17 = vsel %vm466_vm2, %v463_v12, %v464_v13  ;;  %v527_v26 = vrot.slane %v346_v9, 3 }
  0x17   : > { %v356_v18 = vsel %vm355_vm1, %v351_v11, %v352_v14  ;;  %v467_v20 = vsel %vm466_vm2, %v464_v13, %v465_v15  ;;  %v530_v28 = vsel %vm528_vm4, %v525_v24, %v526_v25 }
  0x18   : > { %v358_v22 = vpack.c.bf16 %v356_v18, %v357_v16  ;;  %v469_v23 = vpack.c.bf16 %v467_v20, %v468_v17  ;;  %v529_v27 = vsel %vm528_vm4, %v526_v25, %v527_v26 }
  0x19   : > { %v531_v29 = vpack.c.bf16 %v529_v27, %v530_v28 }
  0x1a   : > { %852 = vmatmul.mubr.msk.bf16.vlgmr.msra.gmra.mrb[0].mxu1 %vm368_vm3, %v358_v22  ;;  %864 = vmatmul.mubr.msk.bf16.vlgmr.msra.gmra.mrb[0].mxu0 %vm368_vm3, %v469_v23 }
  0x1b   : > { %856 = vmatpush3.bf16.msra.mxu1 %v911_v19  ;;  %868 = vmatpush3.bf16.msra.mxu0 %v912_v21 }
  0x1c   : > { %857 = vmatprep.mubr.msk.bf16.mxu1 %vm940_vm0, %v939_v1  ;;  %869 = vmatprep.mubr.msk.bf16.mxu0 %vm940_vm0, %v939_v1 }
  0x26   : > { %858 = vmatmul.mubr.msk.bf16.vlgmr.msra.gmra.mrb[0].mxu1 %vm368_vm3, %v341_v5  ;;  %870 = vmatmul.mubr.msk.bf16.vlgmr.msra.gmra.mrb[0].mxu0 %vm368_vm3, %v531_v29 }
  0xf9   : > { %v456_v30 = vpop.f32.mrb[0].mxu1  ;;  %v578_v31 = vpop.f32.mrb[0].mxu0 }
  0xfa   : > { %v873_v32 = vadd.f32 %v578_v31, %v456_v30  ;;  %v859_v33 = vpop.f32.mrb[1].mxu1  ;;  %v871_v34 = vpop.f32.mrb[1].mxu0 }
  0xfb   : > { %v459_v35 = vpop.f32.mrb[2].mxu1  ;;  %v581_v36 = vpop.f32.mrb[2].mxu0 }
  0xfc   : > { %v604_v37 = vsel %vm602_vm5, %v873_v32, 0.0  ;;  %v874_v38 = vadd.f32 %v581_v36, %v459_v35  ;;  %v860_v39 = vpop.f32.mrb[3].mxu1  ;;  %v872_v40 = vpop.f32.mrb[3].mxu0 }
  0xfd   : > { %v607_v41 = vrot.slane %v604_v37, 4  ;;  %v614_v42 = vmul.f32 %v604_v37, %v604_v37 }
  0xfe   : > { %v838_v43 = vpack.c.bf16 %v874_v38, %v873_v32 }
  0xff   : > { %v608_v44 = vadd.f32 %v607_v41, %v604_v37  ;;  %v617_v45 = vrot.slane %v614_v42, 4 }
 0x100   : > { %839 = vst [vmem:[%s326_s16] sm:$0xff] %v838_v43  }
 0x101   : > { %v609_v46 = vrot.slane %v608_v44, 2  ;;  %v618_v47 = vadd.f32 %v617_v45, %v614_v42 }
 0x103   : > { %v610_v48 = vadd.f32 %v609_v46, %v608_v44  ;;  %v619_v49 = vrot.slane %v618_v47, 2 }
 0x105   : > { %v611_v50 = vrot.slane %v610_v48, 1  ;;  %v620_v51 = vadd.f32 %v619_v49, %v618_v47 }
 0x107   : > { %v612_v52 = vadd.f32 %v611_v50, %v610_v48  ;;  %v621_v53 = vrot.slane %v620_v51, 1 }
 0x109   : > { %613 = vst [vmem:[%s333_s23] sm:$0x1] %v612_v52  ;;  %v622_v54 = vadd.f32 %v621_v53, %v620_v51 }
 0x10b   : > { %623 = vst [vmem:[%s339_s26] sm:$0x1] %v622_v54 }
 0x10c PF: > { %s16_s20 = sadd.s32 1, %s937_s20   ;;  %s1045_s18 = smov %s933_s19 }
 0x10d   : > { %p13_p5 = scmp.ge.s32.totalorder %s16_s20, 4   ;;  %s1046_s19 = smov %s1048_s21 }
 0x10f   :  { %15 = sbr.rel (!%p13_p5) target bundleno = 2 (0x2), region = 92 }

// kernel: _lambda_.16
= control target key start
LH: loop header
LB: loop body
LE: loop exit
PB: predicated region body
PF: predicated region fallthrough
CT: control target
= control target key end

     0   :  { %s1029_s18 = smov 0   ;;  %s1031_s19 = smov 0   ;;  %s1109_s0 = inlined_call_operand.vmem [shape: bf16[2,32,32], index: 0, kind: input, shape index: {}, may-alias: {0,1}]   ;;  %s1110_s1 = inlined_call_operand.vmem [shape: bf16[2,32,32], index: 1, kind: input, shape index: {}, may-alias: {0,1}]   ;;  %s1111_s2 = inlined_call_operand.vmem [shape: bf16[4,32,128], index: 2, kind: input, shape index: {}]   ;;  %s1112_s3 = inlined_call_operand.vmem [shape: bf16[2,16,128], index: 3, kind: output, shape index: {0}]   ;;  %s1113_s4 = inlined_call_operand.vmem [shape: f32[2,1,1,128], index: 4, kind: output, shape index: {1}]   ;;  %s1114_s5 = inlined_call_operand.vmem [shape: f32[2,1,1,128], index: 5, kind: output, shape index: {2}]  }
   0x1   :  { %s1033_s20 = smov 0  }
   0x2 LB: > { %s28_s21 = sadd.s32 1, %s991_s19  ;;  %p835_p0 = scmp.ge.s32.totalorder %s995_s20, 1  ;;  %s995_s20 = sphi %s1033_s20, %s16_s20   ;;  %s991_s19 = sphi %s1031_s19, %s1116_s19   ;;  %s987_s18 = sphi %s1029_s18, %s1115_s18  }
   0x3   : > { %p30_p1 = scmp.ge.s32.totalorder %s28_s21, 2  ;;  %p238_p2 = scmp.lt.s32.totalorder %s995_s20, 3 }
   0x5   : > { %s1118_s21 = smov (%p30_p1, %s28_s21), 0  ;;  %p239_p3 = pnand %p835_p0, %p238_p2 }
   0x6   : > { %v963_v0 = vld [vmem:[%s1111_s2 + $0x10] sm:$0xff] (!%p239_p3)   ;;  %v997_v1 = vmov (!%p239_p3), 0.0   ;;  %v964_v2 = vld [vmem:[%s1111_s2 + $0x20] sm:$0xff] (!%p239_p3)   ;;  %v965_v3 = vld [vmem:[%s1111_s2 + $0x18] sm:$0xff] (!%p239_p3)   ;;  %vm998_vm0 = vmmov (!%p239_p3), 0   ;;  %p297_p4 = scmp.lt.s32.totalorder (!%p239_p3), %s987_s18, 1  ;;  %v355_v4 = vlaneseq (!%p239_p3) }
   0x7   : > { %242 = sbr.rel (%p239_p3) target bundleno = 268 (0x10c), region = 32  ;;  %895 = vmatprep.subr.bf16.mxu1 (!%p239_p3), %v997_v1  ;;  %911 = vmatprep.subr.bf16.mxu0 (!%p239_p3), %v997_v1  ;;  %v966_v5 = vld [vmem:[%s1111_s2 + $0x28] sm:$0xff] (!%p239_p3)   ;;  %vm378_vm3 = vcmask (!%p239_p3), 261120   ;;  %v967_v21 = vld [vmem:[%s1111_s2] sm:$0xff] (!%p239_p3)   ;;  %v968_v23 = vld [vmem:[%s1111_s2 + $0x30] sm:$0xff] (!%p239_p3)  }
   0x8   : > { %896 = vmatpush3.bf16.msra.mxu1 (!%p239_p3), %v963_v0  ;;  %899 = vmatprep.mubr.msk.bf16.mxu1 (!%p239_p3), %vm998_vm0, %v997_v1  ;;  %v356_v6 = vshrl.u32 (!%p239_p3), %v355_v4, 7  ;;  %v969_v26 = vld [vmem:[%s1111_s2 + $0x8] sm:$0xff] (!%p239_p3)   ;;  %v970_v27 = vld [vmem:[%s1111_s2 + $0x38] sm:$0xff] (!%p239_p3)  }
   0x9   : > { %912 = vmatpush3.bf16.msra.mxu0 (!%p239_p3), %v964_v2  ;;  %897 = vmatprep.subr.bf16.mxu1 (!%p239_p3), %v997_v1 }
   0xa   : > { %913 = vmatprep.subr.bf16.mxu0 (!%p239_p3), %v997_v1  ;;  %915 = vmatprep.mubr.msk.bf16.mxu0 (!%p239_p3), %vm998_vm0, %v997_v1  ;;  %vm357_vm1 = vcmp.lt.s32.totalorder (!%p239_p3), %v356_v6, 7  ;;  %vm482_vm2 = vcmp.lt.s32.totalorder (!%p239_p3), %v356_v6, 6  ;;  %vm552_vm4 = vcmp.lt.s32.totalorder (!%p239_p3), %v356_v6, 5  ;;  %vm634_vm5 = vcmp.lt.s32.totalorder (!%p239_p3), %v356_v6, 2 }
   0xc   : > { %898 = vmatpush3.bf16.msra.mxu1 (!%p239_p3), %v965_v3 }
   0xd   : > { %914 = vmatpush3.bf16.msra.mxu0 (!%p239_p3), %v966_v5  ;;  %903 = vmatprep.subr.bf16.mxu1 (!%p239_p3), %v997_v1 }
   0xe   : > { %s1120_s18 = smov (!%p297_p4, %s987_s18), 1  ;;  %919 = vmatprep.subr.bf16.mxu0 %v997_v1 }
   0xf   : > { %s871_s30 = sshll.u32 %s1120_s18, 4  ;;  %s874_s25 = sshll.u32 %s1120_s18, 3 }
  0x10   : > { %s304_s8 = scalar_lea.vmem %s1109_s0, %s871_s30  ;;  %s873_s9 = sadd.s32 8, %s871_s30 }
  0x11   : > { %s315_s12 = scalar_lea.vmem %s1110_s1, %s873_s9  ;;  %v341_v7 = vld [vmem:[%s304_s8] sm:$0xff]   ;;  %s326_s28 = scalar_lea.vmem %s1112_s3, %s874_s25 }
  0x12   : > { %v343_v8 = vunpack.c.l.bf16 %v341_v7  ;;  %v344_v9 = vunpack.c.h.bf16 %v341_v7  ;;  %v345_v10 = vld [vmem:[%s315_s12] sm:$0xf]  ;;  %s333_s6 = scalar_lea.vmem %s1113_s4, %s1120_s18  ;;  %s339_s9 = scalar_lea.vmem %s1114_s5, %s1120_s18 }
  0x13   : > { %v346_v11 = vunpack.c.l.bf16 %v345_v10 }
  0x14   : > { %v352_v12 = vrot.slane %v343_v8, 1  ;;  %v353_v13 = vrot.slane %v344_v9, 1  ;;  %v479_v14 = vrot.slane %v343_v8, 2  ;;  %v480_v15 = vrot.slane %v344_v9, 2 }
  0x15   : > { %v354_v16 = vrot.slane %v346_v11, 1  ;;  %v481_v17 = vrot.slane %v346_v11, 2  ;;  %v549_v28 = vrot.slane %v343_v8, 3  ;;  %v550_v29 = vrot.slane %v344_v9, 3 }
  0x16   : > { %v359_v18 = vsel %vm357_vm1, %v352_v12, %v353_v13  ;;  %v484_v19 = vsel %vm482_vm2, %v479_v14, %v480_v15  ;;  %v551_v30 = vrot.slane %v346_v11, 3 }
  0x17   : > { %v358_v20 = vsel %vm357_vm1, %v353_v13, %v354_v16  ;;  %v483_v22 = vsel %vm482_vm2, %v480_v15, %v481_v17  ;;  %v554_v32 = vsel %vm552_vm4, %v549_v28, %v550_v29 }
  0x18   : > { %v360_v24 = vpack.c.bf16 %v358_v20, %v359_v18  ;;  %v485_v25 = vpack.c.bf16 %v483_v22, %v484_v19  ;;  %v553_v31 = vsel %vm552_vm4, %v550_v29, %v551_v30 }
  0x19   : > { %v555_v33 = vpack.c.bf16 %v553_v31, %v554_v32 }
  0x1a   : > { %900 = vmatmul.mubr.msk.bf16.vlgmr.msra.gmra.mrb[0].mxu1 %vm378_vm3, %v360_v24  ;;  %916 = vmatmul.mubr.msk.bf16.vlgmr.msra.gmra.mrb[0].mxu0 %vm378_vm3, %v485_v25 }
  0x1b   : > { %904 = vmatpush3.bf16.msra.mxu1 %v967_v21  ;;  %920 = vmatpush3.bf16.msra.mxu0 %v968_v23 }
  0x1c   : > { %905 = vmatprep.subr.bf16.mxu1 %v997_v1  ;;  %921 = vmatprep.subr.bf16.mxu0 %v997_v1 }
  0x1d   : > { %907 = vmatprep.mubr.msk.bf16.mxu1 %vm998_vm0, %v997_v1  ;;  %923 = vmatprep.mubr.msk.bf16.mxu0 %vm998_vm0, %v997_v1 }
  0x1f   : > { %906 = vmatpush3.bf16.msra.mxu1 %v969_v26  ;;  %922 = vmatpush3.bf16.msra.mxu0 %v970_v27 }
  0x26   : > { %908 = vmatmul.mubr.msk.bf16.vlgmr.msra.gmra.mrb[0].mxu1 %vm378_vm3, %v341_v7  ;;  %924 = vmatmul.mubr.msk.bf16.vlgmr.msra.gmra.mrb[0].mxu0 %vm378_vm3, %v555_v33 }
  0xf9   : > { %v472_v34 = vpop.f32.mrb[0].mxu1  ;;  %v610_v35 = vpop.f32.mrb[0].mxu0 }
  0xfa   : > { %v927_v36 = vadd.f32 %v610_v35, %v472_v34  ;;  %v909_v37 = vpop.f32.mrb[1].mxu1  ;;  %v925_v38 = vpop.f32.mrb[1].mxu0 }
  0xfb   : > { %v475_v39 = vpop.f32.mrb[2].mxu1  ;;  %v613_v40 = vpop.f32.mrb[2].mxu0 }
  0xfc   : > { %v636_v41 = vsel %vm634_vm5, %v927_v36, 0.0  ;;  %v928_v42 = vadd.f32 %v613_v40, %v475_v39  ;;  %v910_v43 = vpop.f32.mrb[3].mxu1  ;;  %v926_v44 = vpop.f32.mrb[3].mxu0 }
  0xfd   : > { %v639_v45 = vrot.slane %v636_v41, 4  ;;  %v646_v46 = vmul.f32 %v636_v41, %v636_v41 }
  0xfe   : > { %v880_v47 = vpack.c.bf16 %v928_v42, %v927_v36 }
  0xff   : > { %v640_v48 = vadd.f32 %v639_v45, %v636_v41  ;;  %v649_v49 = vrot.slane %v646_v46, 4 }
 0x100   : > { %881 = vst [vmem:[%s326_s28] sm:$0xff] %v880_v47  }
 0x101   : > { %v641_v50 = vrot.slane %v640_v48, 2  ;;  %v650_v51 = vadd.f32 %v649_v49, %v646_v46 }
 0x103   : > { %v642_v52 = vadd.f32 %v641_v50, %v640_v48  ;;  %v651_v53 = vrot.slane %v650_v51, 2 }
 0x105   : > { %v643_v54 = vrot.slane %v642_v52, 1  ;;  %v652_v55 = vadd.f32 %v651_v53, %v650_v51 }
 0x107   : > { %v644_v56 = vadd.f32 %v643_v54, %v642_v52  ;;  %v653_v57 = vrot.slane %v652_v55, 1 }
 0x109   : > { %645 = vst [vmem:[%s333_s6] sm:$0x1] %v644_v56  ;;  %v654_v58 = vadd.f32 %v653_v57, %v652_v55 }
 0x10b   : > { %655 = vst [vmem:[%s339_s9] sm:$0x1] %v654_v58 }
 0x10c PF: > { %s16_s20 = sadd.s32 1, %s995_s20   ;;  %s1115_s18 = smov %s991_s19 }
 0x10d   : > { %p13_p5 = scmp.ge.s32.totalorder %s16_s20, 4   ;;  %s1116_s19 = smov %s1118_s21 }
 0x10f   :  { %15 = sbr.rel (!%p13_p5) target bundleno = 2 (0x2), region = 92 }

// kernel: _lambda_.18
= control target key start
LH: loop header
LB: loop body
LE: loop exit
PB: predicated region body
PF: predicated region fallthrough
CT: control target
= control target key end

     0   :  { %s1311_s18 = smov 0   ;;  %s1313_s19 = smov 0   ;;  %s1478_s0 = inlined_call_operand.vmem [shape: bf16[2,32,32], index: 0, kind: input, shape index: {}, may-alias: {0,1}]   ;;  %s1479_s1 = inlined_call_operand.vmem [shape: bf16[2,32,32], index: 1, kind: input, shape index: {}, may-alias: {0,1}]   ;;  %s1480_s2 = inlined_call_operand.vmem [shape: bf16[7,32,128], index: 2, kind: input, shape index: {}]   ;;  %s1481_s3 = inlined_call_operand.vmem [shape: bf16[2,16,128], index: 3, kind: output, shape index: {0}]   ;;  %s1482_s4 = inlined_call_operand.vmem [shape: f32[2,1,1,128], index: 4, kind: output, shape index: {1}]   ;;  %s1483_s5 = inlined_call_operand.vmem [shape: f32[2,1,1,128], index: 5, kind: output, shape index: {2}]  }
   0x1   :  { %s1315_s20 = smov 0  }
   0x2 LB: > { %s28_s21 = sadd.s32 1, %s1273_s19  ;;  %p1045_p0 = scmp.ge.s32.totalorder %s1277_s20, 1  ;;  %s1277_s20 = sphi %s1315_s20, %s16_s20   ;;  %s1273_s19 = sphi %s1313_s19, %s1485_s19   ;;  %s1269_s18 = sphi %s1311_s18, %s1484_s18  }
   0x3   : > { %p30_p1 = scmp.ge.s32.totalorder %s28_s21, 2  ;;  %p238_p2 = scmp.lt.s32.totalorder %s1277_s20, 3 }
   0x5   : > { %s1487_s21 = smov (%p30_p1, %s28_s21), 0  ;;  %p239_p3 = pnand %p1045_p0, %p238_p2 }
   0x6   : > { %v1239_v0 = vld [vmem:[%s1480_s2 + $0x30] sm:$0xff] (!%p239_p3)   ;;  %v1279_v1 = vmov (!%p239_p3), 0.0   ;;  %v1241_v3 = vld [vmem:[%s1480_s2 + $0x38] sm:$0xff] (!%p239_p3)   ;;  %vm1280_vm0 = vmmov (!%p239_p3), 0   ;;  %p297_p4 = scmp.lt.s32.totalorder (!%p239_p3), %s1269_s18, 1  ;;  %v355_v4 = vlaneseq (!%p239_p3)  ;;  %v1243_v20 = vld [vmem:[%s1480_s2 + $0x40] sm:$0xff] (!%p239_p3)  }
   0x7   : > { %242 = sbr.rel (%p239_p3) target bundleno = 292 (0x124), region = 32  ;;  %1159 = vmatprep.subr.bf16.mxu0 (!%p239_p3), %v1279_v1  ;;  %1135 = vmatprep.subr.bf16.mxu1 (!%p239_p3), %v1279_v1  ;;  %v1240_v2 = vld [vmem:[%s1480_s2 + $0x10] sm:$0xff] (!%p239_p3)   ;;  %v1242_v5 = vld [vmem:[%s1480_s2 + $0x18] sm:$0xff] (!%p239_p3)   ;;  %vm378_vm3 = vcmask (!%p239_p3), 261120   ;;  %v1244_v23 = vld [vmem:[%s1480_s2] sm:$0xff] (!%p239_p3)  }
   0x8   : > { %1160 = vmatpush3.bf16.msra.mxu0 (!%p239_p3), %v1239_v0  ;;  %1139 = vmatprep.mubr.msk.bf16.mxu1 (!%p239_p3), %vm1280_vm0, %v1279_v1  ;;  %v1352_v6 = vshrl.u32 (!%p239_p3), %v355_v4, 7  ;;  %v1245_v26 = vld [vmem:[%s1480_s2 + $0x48] sm:$0xff] (!%p239_p3)   ;;  %v1248_v34 = vld [vmem:[%s1480_s2 + $0x50] sm:$0xff] (!%p239_p3)   ;;  %v1249_v35 = vld [vmem:[%s1480_s2 + $0x20] sm:$0xff] (!%p239_p3)  }
   0x9   : > { %1136 = vmatpush3.bf16.msra.mxu1 (!%p239_p3), %v1240_v2  ;;  %1161 = vmatprep.subr.bf16.mxu0 (!%p239_p3), %v1279_v1  ;;  %v1246_v27 = vld [vmem:[%s1480_s2 + $0x8] sm:$0xff] (!%p239_p3)   ;;  %v1250_v38 = vld [vmem:[%s1480_s2 + $0x58] sm:$0xff] (!%p239_p3)   ;;  %v1252_v50 = vld [vmem:[%s1480_s2 + $0x60] sm:$0xff] (!%p239_p3)  }
   0xa   : > { %1137 = vmatprep.subr.bf16.mxu1 (!%p239_p3), %v1279_v1  ;;  %1163 = vmatprep.mubr.msk.bf16.mxu0 (!%p239_p3), %vm1280_vm0, %v1279_v1  ;;  %vm357_vm1 = vcmp.lt.s32.totalorder (!%p239_p3), %v1352_v6, 7  ;;  %vm552_vm2 = vcmp.lt.s32.totalorder (!%p239_p3), %v1352_v6, 5  ;;  %vm622_vm4 = vcmp.lt.s32.totalorder (!%p239_p3), %v1352_v6, 4  ;;  %vm482_vm5 = vcmp.lt.s32.totalorder (!%p239_p3), %v1352_v6, 6  ;;  %v1251_v39 = vld [vmem:[%s1480_s2 + $0x28] sm:$0xff] (!%p239_p3)  }
   0xb   : > { %vm692_vm6 = vcmp.lt.s32.totalorder (!%p239_p3), %v1352_v6, 3  ;;  %v1253_v51 = vld [vmem:[%s1480_s2 + $0x68] sm:$0xff] (!%p239_p3)   ;;  %vm762_vm7 = vcmp.lt.s32.totalorder (!%p239_p3), %v1352_v6, 2 }
   0xc   : > { %1162 = vmatpush3.bf16.msra.mxu0 (!%p239_p3), %v1241_v3 }
   0xd   : > { %1138 = vmatpush3.bf16.msra.mxu1 (!%p239_p3), %v1242_v5  ;;  %1167 = vmatprep.subr.bf16.mxu0 (!%p239_p3), %v1279_v1 }
   0xe   : > { %s1489_s18 = smov (!%p297_p4, %s1269_s18), 1  ;;  %1143 = vmatprep.subr.bf16.mxu1 %v1279_v1 }
   0xf   : > { %s1102_s30 = sshll.u32 %s1489_s18, 4  ;;  %s333_s22 = scalar_lea.vmem %s1482_s4, %s1489_s18 }
  0x10   : > { %s304_s8 = scalar_lea.vmem %s1478_s0, %s1102_s30  ;;  %s1104_s9 = sadd.s32 8, %s1102_s30 }
  0x11   : > { %s315_s12 = scalar_lea.vmem %s1479_s1, %s1104_s9  ;;  %v341_v7 = vld [vmem:[%s304_s8] sm:$0xff]   ;;  %s339_s25 = scalar_lea.vmem %s1483_s5, %s1489_s18 }
  0x12   : > { %v1362_v8 = vunpack.c.l.bf16 %v341_v7  ;;  %v1364_v9 = vunpack.c.h.bf16 %v341_v7  ;;  %v345_v10 = vld [vmem:[%s315_s12] sm:$0xf]  ;;  %s1105_s12 = sshll.u32 %s1489_s18, 3 }
  0x13   : > { %v1366_v11 = vunpack.c.l.bf16 %v345_v10  ;;  %s326_s15 = scalar_lea.vmem %s1481_s3, %s1105_s12 }
  0x14   : > { %v352_v12 = vrot.slane %v1362_v8, 1  ;;  %v353_v13 = vrot.slane %v1364_v9, 1  ;;  %v549_v14 = vrot.slane %v1362_v8, 3  ;;  %v550_v15 = vrot.slane %v1364_v9, 3 }
  0x15   : > { %v354_v16 = vrot.slane %v1366_v11, 1  ;;  %v551_v17 = vrot.slane %v1366_v11, 3  ;;  %v619_v28 = vrot.slane %v1362_v8, 4  ;;  %v620_v29 = vrot.slane %v1364_v9, 4 }
  0x16   : > { %v359_v18 = vsel %vm357_vm1, %v352_v12, %v353_v13  ;;  %v554_v19 = vsel %vm552_vm2, %v549_v14, %v550_v15  ;;  %v621_v30 = vrot.slane %v1366_v11, 4  ;;  %v479_v36 = vrot.slane %v1362_v8, 2 }
  0x17   : > { %v358_v21 = vsel %vm357_vm1, %v353_v13, %v354_v16  ;;  %v553_v22 = vsel %vm552_vm2, %v550_v15, %v551_v17  ;;  %v624_v32 = vsel %vm622_vm4, %v619_v28, %v620_v29  ;;  %v480_v37 = vrot.slane %v1364_v9, 2 }
  0x18   : > { %v360_v24 = vpack.c.bf16 %v358_v21, %v359_v18  ;;  %v555_v25 = vpack.c.bf16 %v553_v22, %v554_v19  ;;  %v623_v31 = vsel %vm622_vm4, %v620_v29, %v621_v30  ;;  %v481_v40 = vrot.slane %v1366_v11, 2 }
  0x19   : > { %v625_v33 = vpack.c.bf16 %v623_v31, %v624_v32  ;;  %v689_v41 = vrot.slane %v1362_v8, 5  ;;  %v690_v42 = vrot.slane %v1364_v9, 5  ;;  %v691_v43 = vrot.slane %v1366_v11, 5 }
  0x1a   : > { %1140 = vmatmul.mubr.msk.bf16.vlgmr.msra.gmra.mrb[0].mxu1 %vm378_vm3, %v360_v24  ;;  %1164 = vmatmul.mubr.msk.bf16.vlgmr.msra.gmra.mrb[0].mxu0 %vm378_vm3, %v555_v25  ;;  %v484_v44 = vsel %vm482_vm5, %v479_v36, %v480_v37  ;;  %v483_v45 = vsel %vm482_vm5, %v480_v37, %v481_v40  ;;  %v759_v52 = vrot.slane %v1362_v8, 6  ;;  %v760_v53 = vrot.slane %v1364_v9, 6 }
  0x1b   : > { %1168 = vmatpush3.bf16.msra.mxu0 %v1243_v20  ;;  %1144 = vmatpush3.bf16.msra.mxu1 %v1244_v23  ;;  %v693_v46 = vsel %vm692_vm6, %v690_v42, %v691_v43  ;;  %v694_v47 = vsel %vm692_vm6, %v689_v41, %v690_v42  ;;  %v485_v48 = vpack.c.bf16 %v483_v45, %v484_v44  ;;  %v761_v54 = vrot.slane %v1366_v11, 6 }
  0x1c   : > { %1169 = vmatprep.subr.bf16.mxu0 %v1279_v1  ;;  %1145 = vmatprep.subr.bf16.mxu1 %v1279_v1  ;;  %v695_v49 = vpack.c.bf16 %v693_v46, %v694_v47  ;;  %v764_v56 = vsel %vm762_vm7, %v759_v52, %v760_v53 }
  0x1d   : > { %1147 = vmatprep.mubr.msk.bf16.mxu1 %vm1280_vm0, %v1279_v1  ;;  %1171 = vmatprep.mubr.msk.bf16.mxu0 %vm1280_vm0, %v1279_v1  ;;  %v763_v55 = vsel %vm762_vm7, %v760_v53, %v761_v54 }
  0x1e   : > { %v765_v57 = vpack.c.bf16 %v763_v55, %v764_v56 }
  0x1f   : > { %1170 = vmatpush3.bf16.msra.mxu0 %v1245_v26  ;;  %1146 = vmatpush3.bf16.msra.mxu1 %v1246_v27 }
  0x20   : > { %1175 = vmatprep.subr.bf16.mxu0 %v1279_v1  ;;  %1151 = vmatprep.subr.bf16.mxu1 %v1279_v1 }
  0x26   : > { %1148 = vmatmul.mubr.msk.bf16.vlgmr.msra.gmra.mrb[0].mxu1 %vm378_vm3, %v341_v7  ;;  %1172 = vmatmul.mubr.msk.bf16.vlgmr.msra.gmra.mrb[0].mxu0 %vm378_vm3, %v625_v33 }
  0x27   : > { %1176 = vmatpush3.bf16.msra.mxu0 %v1248_v34  ;;  %1152 = vmatpush3.bf16.msra.mxu1 %v1249_v35 }
  0x28   : > { %1177 = vmatprep.subr.bf16.mxu0 %v1279_v1  ;;  %1153 = vmatprep.subr.bf16.mxu1 %v1279_v1 }
  0x29   : > { %1155 = vmatprep.mubr.msk.bf16.mxu1 %vm1280_vm0, %v1279_v1  ;;  %1179 = vmatprep.mubr.msk.bf16.mxu0 %vm1280_vm0, %v1279_v1 }
  0x2b   : > { %1178 = vmatpush3.bf16.msra.mxu0 %v1250_v38  ;;  %1154 = vmatpush3.bf16.msra.mxu1 %v1251_v39 }
  0x2c   : > { %1183 = vmatprep.subr.bf16.mxu0 %v1279_v1 }
  0x32   : > { %1156 = vmatmul.mubr.msk.bf16.vlgmr.msra.gmra.mrb[0].mxu1 %vm378_vm3, %v485_v48  ;;  %1180 = vmatmul.mubr.msk.bf16.vlgmr.msra.gmra.mrb[0].mxu0 %vm378_vm3, %v695_v49 }
  0x33   : > { %1184 = vmatpush3.bf16.msra.mxu0 %v1252_v50  ;;  %1187 = vmatprep.mubr.msk.bf16.mxu0 %vm1280_vm0, %v1279_v1 }
  0x34   : > { %1185 = vmatprep.subr.bf16.mxu0 %v1279_v1 }
  0x37   : > { %1186 = vmatpush3.bf16.msra.mxu0 %v1253_v51 }
  0x3e   : > { %1188 = vmatmul.mubr.msk.bf16.vlgmr.msra.gmra.mrb[0].mxu0 %vm378_vm3, %v765_v57 }
 0x105   : > { %v540_v58 = vpop.f32.mrb[0].mxu1 }
 0x106   : > { %v1157_v59 = vpop.f32.mrb[1].mxu1 }
 0x107   : > { %v543_v60 = vpop.f32.mrb[2].mxu1 }
 0x108   : > { %v1158_v61 = vpop.f32.mrb[3].mxu1 }
 0x111   : > { %v820_v62 = vpop.f32.mrb[0].mxu0 }
 0x112   : > { %v1191_v63 = vadd.f32 %v820_v62, %v540_v58  ;;  %v1189_v0 = vpop.f32.mrb[1].mxu0 }
 0x113   : > { %v823_v2 = vpop.f32.mrb[2].mxu0 }
 0x114   : > { %v846_v1 = vsel %vm622_vm4, %v1191_v63, 0.0  ;;  %v1192_v3 = vadd.f32 %v823_v2, %v543_v60  ;;  %v1190_v4 = vpop.f32.mrb[3].mxu0 }
 0x115   : > { %v849_v5 = vrot.slane %v846_v1, 4  ;;  %v856_v7 = vmul.f32 %v846_v1, %v846_v1 }
 0x116   : > { %v1111_v8 = vpack.c.bf16 %v1192_v3, %v1191_v63 }
 0x117   : > { %v850_v9 = vadd.f32 %v849_v5, %v846_v1  ;;  %v859_v10 = vrot.slane %v856_v7, 4 }
 0x118   : > { %1112 = vst [vmem:[%s326_s15] sm:$0xff] %v1111_v8  }
 0x119   : > { %v851_v11 = vrot.slane %v850_v9, 2  ;;  %v860_v12 = vadd.f32 %v859_v10, %v856_v7 }
 0x11b   : > { %v852_v13 = vadd.f32 %v851_v11, %v850_v9  ;;  %v861_v14 = vrot.slane %v860_v12, 2 }
 0x11d   : > { %v853_v6 = vrot.slane %v852_v13, 1  ;;  %v862_v15 = vadd.f32 %v861_v14, %v860_v12 }
 0x11f   : > { %v854_v16 = vadd.f32 %v853_v6, %v852_v13  ;;  %v863_v17 = vrot.slane %v862_v15, 1 }
 0x121   : > { %855 = vst [vmem:[%s333_s22] sm:$0x1] %v854_v16  ;;  %v864_v18 = vadd.f32 %v863_v17, %v862_v15 }
 0x123   : > { %865 = vst [vmem:[%s339_s25] sm:$0x1] %v864_v18 }
 0x124 PF: > { %s16_s20 = sadd.s32 1, %s1277_s20   ;;  %s1484_s18 = smov %s1273_s19 }
 0x125   : > { %p13_p5 = scmp.ge.s32.totalorder %s16_s20, 4   ;;  %s1485_s19 = smov %s1487_s21 }
 0x127   :  { %15 = sbr.rel (!%p13_p5) target bundleno = 2 (0x2), region = 95 }

// kernel: _lambda_.20
= control target key start
LH: loop header
LB: loop body
LE: loop exit
PB: predicated region body
PF: predicated region fallthrough
CT: control target
= control target key end

     0   :  { %s1311_s18 = smov 0   ;;  %s1313_s19 = smov 0   ;;  %s1472_s0 = inlined_call_operand.vmem [shape: bf16[2,32,32], index: 0, kind: input, shape index: {}, may-alias: {0,1}]   ;;  %s1473_s1 = inlined_call_operand.vmem [shape: bf16[2,32,32], index: 1, kind: input, shape index: {}, may-alias: {0,1}]   ;;  %s1474_s2 = inlined_call_operand.vmem [shape: bf16[7,32,128], index: 2, kind: input, shape index: {}]   ;;  %s1475_s3 = inlined_call_operand.vmem [shape: bf16[2,16,128], index: 3, kind: output, shape index: {0}]   ;;  %s1476_s4 = inlined_call_operand.vmem [shape: f32[2,1,1,128], index: 4, kind: output, shape index: {1}]   ;;  %s1477_s5 = inlined_call_operand.vmem [shape: f32[2,1,1,128], index: 5, kind: output, shape index: {2}]  }
   0x1   :  { %s1315_s20 = smov 0  }
   0x2 LB: > { %s28_s21 = sadd.s32 1, %s1273_s19  ;;  %p1045_p0 = scmp.ge.s32.totalorder %s1277_s20, 1  ;;  %s1277_s20 = sphi %s1315_s20, %s16_s20   ;;  %s1273_s19 = sphi %s1313_s19, %s1479_s19   ;;  %s1269_s18 = sphi %s1311_s18, %s1478_s18  }
   0x3   : > { %p30_p1 = scmp.ge.s32.totalorder %s28_s21, 2  ;;  %p238_p2 = scmp.lt.s32.totalorder %s1277_s20, 3 }
   0x5   : > { %s1481_s21 = smov (%p30_p1, %s28_s21), 0  ;;  %p239_p3 = pnand %p1045_p0, %p238_p2 }
   0x6   : > { %v1239_v0 = vld [vmem:[%s1474_s2 + $0x30] sm:$0xff] (!%p239_p3)   ;;  %v1279_v1 = vmov (!%p239_p3), 0.0   ;;  %v1241_v3 = vld [vmem:[%s1474_s2 + $0x38] sm:$0xff] (!%p239_p3)   ;;  %vm1280_vm0 = vmmov (!%p239_p3), 0   ;;  %p297_p4 = scmp.lt.s32.totalorder (!%p239_p3), %s1269_s18, 1  ;;  %v355_v4 = vlaneseq (!%p239_p3)  ;;  %v1243_v20 = vld [vmem:[%s1474_s2 + $0x40] sm:$0xff] (!%p239_p3)  }
   0x7   : > { %242 = sbr.rel (%p239_p3) target bundleno = 291 (0x123), region = 32  ;;  %1159 = vmatprep.subr.bf16.mxu0 (!%p239_p3), %v1279_v1  ;;  %1135 = vmatprep.subr.bf16.mxu1 (!%p239_p3), %v1279_v1  ;;  %v1240_v2 = vld [vmem:[%s1474_s2 + $0x10] sm:$0xff] (!%p239_p3)   ;;  %v1242_v5 = vld [vmem:[%s1474_s2 + $0x18] sm:$0xff] (!%p239_p3)   ;;  %vm378_vm3 = vcmask (!%p239_p3), 261120   ;;  %v1244_v23 = vld [vmem:[%s1474_s2] sm:$0xff] (!%p239_p3)  }
   0x8   : > { %1160 = vmatpush3.bf16.msra.mxu0 (!%p239_p3), %v1239_v0  ;;  %1139 = vmatprep.mubr.msk.bf16.mxu1 (!%p239_p3), %vm1280_vm0, %v1279_v1  ;;  %v1352_v6 = vshrl.u32 (!%p239_p3), %v355_v4, 7  ;;  %v1245_v26 = vld [vmem:[%s1474_s2 + $0x48] sm:$0xff] (!%p239_p3)   ;;  %v1248_v34 = vld [vmem:[%s1474_s2 + $0x50] sm:$0xff] (!%p239_p3)   ;;  %v1249_v35 = vld [vmem:[%s1474_s2 + $0x20] sm:$0xff] (!%p239_p3)  }
   0x9   : > { %1136 = vmatpush3.bf16.msra.mxu1 (!%p239_p3), %v1240_v2  ;;  %1161 = vmatprep.subr.bf16.mxu0 (!%p239_p3), %v1279_v1  ;;  %v1246_v27 = vld [vmem:[%s1474_s2 + $0x8] sm:$0xff] (!%p239_p3)   ;;  %v1250_v38 = vld [vmem:[%s1474_s2 + $0x58] sm:$0xff] (!%p239_p3)   ;;  %v1252_v50 = vld [vmem:[%s1474_s2 + $0x60] sm:$0xff] (!%p239_p3)  }
   0xa   : > { %1137 = vmatprep.subr.bf16.mxu1 (!%p239_p3), %v1279_v1  ;;  %1163 = vmatprep.mubr.msk.bf16.mxu0 (!%p239_p3), %vm1280_vm0, %v1279_v1  ;;  %vm357_vm1 = vcmp.lt.s32.totalorder (!%p239_p3), %v1352_v6, 7  ;;  %vm552_vm2 = vcmp.lt.s32.totalorder (!%p239_p3), %v1352_v6, 5  ;;  %vm622_vm4 = vcmp.lt.s32.totalorder (!%p239_p3), %v1352_v6, 4  ;;  %vm482_vm5 = vcmp.lt.s32.totalorder (!%p239_p3), %v1352_v6, 6  ;;  %v1251_v39 = vld [vmem:[%s1474_s2 + $0x28] sm:$0xff] (!%p239_p3)  }
   0xb   : > { %vm692_vm6 = vcmp.lt.s32.totalorder (!%p239_p3), %v1352_v6, 3  ;;  %v1253_v51 = vld [vmem:[%s1474_s2 + $0x68] sm:$0xff] (!%p239_p3)   ;;  %vm762_vm7 = vcmp.lt.s32.totalorder (!%p239_p3), %v1352_v6, 2 }
   0xc   : > { %1162 = vmatpush3.bf16.msra.mxu0 (!%p239_p3), %v1241_v3 }
   0xd   : > { %1138 = vmatpush3.bf16.msra.mxu1 (!%p239_p3), %v1242_v5  ;;  %1167 = vmatprep.subr.bf16.mxu0 (!%p239_p3), %v1279_v1 }
   0xe   : > { %s1483_s18 = smov (!%p297_p4, %s1269_s18), 1  ;;  %1143 = vmatprep.subr.bf16.mxu1 %v1279_v1 }
   0xf   : > { %s1102_s30 = sshll.u32 %s1483_s18, 4  ;;  %s333_s22 = scalar_lea.vmem %s1476_s4, %s1483_s18 }
  0x10   : > { %s304_s8 = scalar_lea.vmem %s1472_s0, %s1102_s30  ;;  %s1104_s9 = sadd.s32 8, %s1102_s30 }
  0x11   : > { %s315_s12 = scalar_lea.vmem %s1473_s1, %s1104_s9  ;;  %v341_v7 = vld [vmem:[%s304_s8] sm:$0xff]   ;;  %s339_s25 = scalar_lea.vmem %s1477_s5, %s1483_s18 }
  0x12   : > { %v1362_v8 = vunpack.c.l.bf16 %v341_v7  ;;  %v1364_v9 = vunpack.c.h.bf16 %v341_v7  ;;  %v345_v10 = vld [vmem:[%s315_s12] sm:$0xf]  ;;  %s1105_s12 = sshll.u32 %s1483_s18, 3 }
  0x13   : > { %v1366_v11 = vunpack.c.l.bf16 %v345_v10  ;;  %s326_s15 = scalar_lea.vmem %s1475_s3, %s1105_s12 }
  0x14   : > { %v352_v12 = vrot.slane %v1362_v8, 1  ;;  %v353_v13 = vrot.slane %v1364_v9, 1  ;;  %v549_v14 = vrot.slane %v1362_v8, 3  ;;  %v550_v15 = vrot.slane %v1364_v9, 3 }
  0x15   : > { %v354_v16 = vrot.slane %v1366_v11, 1  ;;  %v551_v17 = vrot.slane %v1366_v11, 3  ;;  %v619_v28 = vrot.slane %v1362_v8, 4  ;;  %v620_v29 = vrot.slane %v1364_v9, 4 }
  0x16   : > { %v359_v18 = vsel %vm357_vm1, %v352_v12, %v353_v13  ;;  %v554_v19 = vsel %vm552_vm2, %v549_v14, %v550_v15  ;;  %v621_v30 = vrot.slane %v1366_v11, 4  ;;  %v479_v36 = vrot.slane %v1362_v8, 2 }
  0x17   : > { %v358_v21 = vsel %vm357_vm1, %v353_v13, %v354_v16  ;;  %v553_v22 = vsel %vm552_vm2, %v550_v15, %v551_v17  ;;  %v624_v32 = vsel %vm622_vm4, %v619_v28, %v620_v29  ;;  %v480_v37 = vrot.slane %v1364_v9, 2 }
  0x18   : > { %v360_v24 = vpack.c.bf16 %v358_v21, %v359_v18  ;;  %v555_v25 = vpack.c.bf16 %v553_v22, %v554_v19  ;;  %v623_v31 = vsel %vm622_vm4, %v620_v29, %v621_v30  ;;  %v481_v40 = vrot.slane %v1366_v11, 2 }
  0x19   : > { %v625_v33 = vpack.c.bf16 %v623_v31, %v624_v32  ;;  %v689_v41 = vrot.slane %v1362_v8, 5  ;;  %v690_v42 = vrot.slane %v1364_v9, 5  ;;  %v691_v43 = vrot.slane %v1366_v11, 5 }
  0x1a   : > { %1140 = vmatmul.mubr.msk.bf16.vlgmr.msra.gmra.mrb[0].mxu1 %vm378_vm3, %v360_v24  ;;  %1164 = vmatmul.mubr.msk.bf16.vlgmr.msra.gmra.mrb[0].mxu0 %vm378_vm3, %v555_v25  ;;  %v484_v44 = vsel %vm482_vm5, %v479_v36, %v480_v37  ;;  %v483_v45 = vsel %vm482_vm5, %v480_v37, %v481_v40  ;;  %v759_v52 = vrot.slane %v1362_v8, 6  ;;  %v760_v53 = vrot.slane %v1364_v9, 6 }
  0x1b   : > { %1168 = vmatpush3.bf16.msra.mxu0 %v1243_v20  ;;  %1144 = vmatpush3.bf16.msra.mxu1 %v1244_v23  ;;  %v693_v46 = vsel %vm692_vm6, %v690_v42, %v691_v43  ;;  %v694_v47 = vsel %vm692_vm6, %v689_v41, %v690_v42  ;;  %v485_v48 = vpack.c.bf16 %v483_v45, %v484_v44  ;;  %v761_v54 = vrot.slane %v1366_v11, 6 }
  0x1c   : > { %1169 = vmatprep.subr.bf16.mxu0 %v1279_v1  ;;  %1145 = vmatprep.subr.bf16.mxu1 %v1279_v1  ;;  %v695_v49 = vpack.c.bf16 %v693_v46, %v694_v47  ;;  %v764_v56 = vsel %vm762_vm7, %v759_v52, %v760_v53 }
  0x1d   : > { %1147 = vmatprep.mubr.msk.bf16.mxu1 %vm1280_vm0, %v1279_v1  ;;  %1171 = vmatprep.mubr.msk.bf16.mxu0 %vm1280_vm0, %v1279_v1  ;;  %v763_v55 = vsel %vm762_vm7, %v760_v53, %v761_v54 }
  0x1e   : > { %v765_v57 = vpack.c.bf16 %v763_v55, %v764_v56 }
  0x1f   : > { %1170 = vmatpush3.bf16.msra.mxu0 %v1245_v26  ;;  %1146 = vmatpush3.bf16.msra.mxu1 %v1246_v27 }
  0x20   : > { %1175 = vmatprep.subr.bf16.mxu0 %v1279_v1  ;;  %1151 = vmatprep.subr.bf16.mxu1 %v1279_v1 }
  0x26   : > { %1148 = vmatmul.mubr.msk.bf16.vlgmr.msra.gmra.mrb[0].mxu1 %vm378_vm3, %v341_v7  ;;  %1172 = vmatmul.mubr.msk.bf16.vlgmr.msra.gmra.mrb[0].mxu0 %vm378_vm3, %v625_v33 }
  0x27   : > { %1176 = vmatpush3.bf16.msra.mxu0 %v1248_v34  ;;  %1152 = vmatpush3.bf16.msra.mxu1 %v1249_v35 }
  0x28   : > { %1177 = vmatprep.subr.bf16.mxu0 %v1279_v1  ;;  %1153 = vmatprep.subr.bf16.mxu1 %v1279_v1 }
  0x29   : > { %1155 = vmatprep.mubr.msk.bf16.mxu1 %vm1280_vm0, %v1279_v1  ;;  %1179 = vmatprep.mubr.msk.bf16.mxu0 %vm1280_vm0, %v1279_v1 }
  0x2b   : > { %1178 = vmatpush3.bf16.msra.mxu0 %v1250_v38  ;;  %1154 = vmatpush3.bf16.msra.mxu1 %v1251_v39 }
  0x2c   : > { %1183 = vmatprep.subr.bf16.mxu0 %v1279_v1 }
  0x32   : > { %1156 = vmatmul.mubr.msk.bf16.vlgmr.msra.gmra.mrb[0].mxu1 %vm378_vm3, %v485_v48  ;;  %1180 = vmatmul.mubr.msk.bf16.vlgmr.msra.gmra.mrb[0].mxu0 %vm378_vm3, %v695_v49 }
  0x33   : > { %1184 = vmatpush3.bf16.msra.mxu0 %v1252_v50  ;;  %1187 = vmatprep.mubr.msk.bf16.mxu0 %vm1280_vm0, %v1279_v1 }
  0x34   : > { %1185 = vmatprep.subr.bf16.mxu0 %v1279_v1 }
  0x37   : > { %1186 = vmatpush3.bf16.msra.mxu0 %v1253_v51 }
  0x3e   : > { %1188 = vmatmul.mubr.msk.bf16.vlgmr.msra.gmra.mrb[0].mxu0 %vm378_vm3, %v765_v57 }
 0x105   : > { %v540_v58 = vpop.f32.mrb[0].mxu1 }
 0x106   : > { %v1157_v59 = vpop.f32.mrb[1].mxu1 }
 0x107   : > { %v543_v60 = vpop.f32.mrb[2].mxu1 }
 0x108   : > { %v1158_v61 = vpop.f32.mrb[3].mxu1 }
 0x111   : > { %v820_v62 = vpop.f32.mrb[0].mxu0 }
 0x112   : > { %v1191_v63 = vadd.f32 %v820_v62, %v540_v58  ;;  %v1189_v0 = vpop.f32.mrb[1].mxu0 }
 0x113   : > { %v823_v2 = vpop.f32.mrb[2].mxu0 }
 0x114   : > { %v849_v3 = vrot.slane %v1191_v63, 4  ;;  %v856_v1 = vmul.f32 %v1191_v63, %v1191_v63  ;;  %v1192_v4 = vadd.f32 %v823_v2, %v543_v60  ;;  %v1190_v5 = vpop.f32.mrb[3].mxu0 }
 0x116   : > { %v850_v6 = vadd.f32 %v1191_v63, %v849_v3  ;;  %v859_v7 = vrot.slane %v856_v1, 4  ;;  %v1111_v8 = vpack.c.bf16 %v1192_v4, %v1191_v63 }
 0x118   : > { %v851_v9 = vrot.slane %v850_v6, 2  ;;  %v860_v10 = vadd.f32 %v859_v7, %v856_v1  ;;  %1112 = vst [vmem:[%s326_s15] sm:$0xff] %v1111_v8  }
 0x11a   : > { %v852_v11 = vadd.f32 %v851_v9, %v850_v6  ;;  %v861_v12 = vrot.slane %v860_v10, 2 }
 0x11c   : > { %v853_v13 = vrot.slane %v852_v11, 1  ;;  %v862_v14 = vadd.f32 %v861_v12, %v860_v10 }
 0x11e   : > { %v854_v15 = vadd.f32 %v853_v13, %v852_v11  ;;  %v863_v16 = vrot.slane %v862_v14, 1 }
 0x120   : > { %855 = vst [vmem:[%s333_s22] sm:$0x1] %v854_v15  ;;  %v864_v17 = vadd.f32 %v863_v16, %v862_v14 }
 0x122   : > { %865 = vst [vmem:[%s339_s25] sm:$0x1] %v864_v17 }
 0x123 PF: > { %s16_s20 = sadd.s32 1, %s1277_s20   ;;  %s1478_s18 = smov %s1273_s19 }
 0x124   : > { %p13_p5 = scmp.ge.s32.totalorder %s16_s20, 4   ;;  %s1479_s19 = smov %s1481_s21 }
 0x126   :  { %15 = sbr.rel (!%p13_p5) target bundleno = 2 (0x2), region = 95 }

// kernel: _lambda_.23
= control target key start
LH: loop header
LB: loop body
LE: loop exit
PB: predicated region body
PF: predicated region fallthrough
CT: control target
= control target key end

     0   :  { %s638_s18 = smov 0   ;;  %s640_s19 = smov 0   ;;  %s708_s0 = inlined_call_operand.vmem [shape: bf16[2,16,128], index: 0, kind: input, shape index: {}]   ;;  %s709_s1 = inlined_call_operand.vmem [shape: f32[1,128], index: 1, kind: input, shape index: {}]   ;;  %s710_s2 = inlined_call_operand.vmem [shape: f32[1,128], index: 2, kind: input, shape index: {}]   ;;  %s711_s3 = inlined_call_operand.vmem [shape: bf16[128,128], index: 3, kind: input, shape index: {}]   ;;  %s712_s4 = inlined_call_operand.vmem [shape: f32[1,128], index: 4, kind: input, shape index: {}]   ;;  %s713_s5 = inlined_call_operand.vmem [shape: f32[2,16,128], index: 5, kind: output, shape index: {}]  }
   0x1   :  { %s642_s20 = smov 0  }
   0x2 LB: > { %s27_s21 = sadd.s32 1, %s600_s19  ;;  %p495_p0 = scmp.ge.s32.totalorder %s604_s20, 1  ;;  %s604_s20 = sphi %s642_s20, %s15_s20   ;;  %s600_s19 = sphi %s640_s19, %s715_s19   ;;  %s596_s18 = sphi %s638_s18, %s714_s18  }
   0x3   : > { %p29_p1 = scmp.ge.s32.totalorder %s27_s21, 2  ;;  %p208_p2 = scmp.lt.s32.totalorder %s604_s20, 3 }
   0x5   : > { %s717_s21 = smov (%p29_p1, %s27_s21), 0  ;;  %p209_p3 = pnand %p495_p0, %p208_p2 }
   0x6   : > { %v574_v0 = vld [vmem:[%s711_s3] sm:$0xff] (!%p209_p3)   ;;  %v606_v1 = vmov (!%p209_p3), 0.0   ;;  %v575_v2 = vld [vmem:[%s711_s3 + $0x8] sm:$0xff] (!%p209_p3)   ;;  %vm607_vm0 = vmmov (!%p209_p3), 0   ;;  %p245_p4 = scmp.lt.s32.totalorder (!%p209_p3), %s596_s18, 1  ;;  %v576_v3 = vld [vmem:[%s711_s3 + $0x10] sm:$0xff] (!%p209_p3)  }
   0x7   : > { %212 = sbr.rel (%p209_p3) target bundleno = 256 (0x100), region = 40  ;;  %528 = vmatprep.subr.bf16.mxu0 (!%p209_p3), %v606_v1  ;;  %544 = vmatprep.mubr.msk.bf16.mxu0 (!%p209_p3), %vm607_vm0, %v606_v1  ;;  %v577_v4 = vld [vmem:[%s711_s3 + $0x18] sm:$0xff] (!%p209_p3)   ;;  %v578_v8 = vld [vmem:[%s711_s3 + $0x20] sm:$0xff] (!%p209_p3)   ;;  %v579_v12 = vld [vmem:[%s711_s3 + $0x28] sm:$0xff] (!%p209_p3)  }
   0x8   : > { %529 = vmatpush3.bf16.msra.mxu0 (!%p209_p3), %v574_v0  ;;  %v500_v9 = vld [vmem:[%s709_s1] ss:$0 sm:$0xff] (!%p209_p3)  ;;  %v580_v16 = vld [vmem:[%s711_s3 + $0x30] sm:$0xff] (!%p209_p3)   ;;  %v581_v19 = vld [vmem:[%s711_s3 + $0x38] sm:$0xff] (!%p209_p3)  }
   0x9   : > { %530 = vmatprep.subr.bf16.mxu0 (!%p209_p3), %v606_v1  ;;  %v501_v13 = vld [vmem:[%s710_s2] ss:$0 sm:$0xff] (!%p209_p3) }
   0xa   : > { %v502_v21 = vld [vmem:[%s712_s4] ss:$0 sm:$0xff] (!%p209_p3) }
   0xc   : > { %531 = vmatpush3.bf16.msra.mxu0 (!%p209_p3), %v575_v2 }
   0xd   : > { %532 = vmatprep.subr.bf16.mxu0 (!%p209_p3), %v606_v1 }
   0xe   : > { %s719_s18 = smov (!%p245_p4, %s596_s18), 1 }
   0xf   : > { %s513_s28 = sshll.u32 %s719_s18, 3  ;;  %s514_s25 = sshll.u32 %s719_s18, 4 }
  0x10   : > { %s252_s6 = scalar_lea.vmem %s708_s0, %s513_s28  ;;  %533 = vmatpush3.bf16.msra.mxu0 %v576_v3  ;;  %s262_s30 = scalar_lea.vmem %s713_s5, %s514_s25 }
  0x11   : > { %v516_v5 = vld [vmem:[%s252_s6] sm:$0xff]   ;;  %534 = vmatprep.subr.bf16.mxu0 %v606_v1 }
  0x12   : > { %v517_v6 = vunpack.c.l.bf16 %v516_v5  ;;  %v518_v7 = vunpack.c.h.bf16 %v516_v5 }
  0x14   : > { %535 = vmatpush3.bf16.msra.mxu0 %v577_v4  ;;  %v276_v10 = vmul.f32 %v517_v6, %v500_v9  ;;  %v277_v11 = vmul.f32 %v518_v7, %v500_v9 }
  0x15   : > { %536 = vmatprep.subr.bf16.mxu0 %v606_v1 }
  0x16   : > { %v285_v14 = vadd.f32 %v501_v13, %v276_v10  ;;  %v286_v15 = vadd.f32 %v501_v13, %v277_v11 }
  0x18   : > { %537 = vmatpush3.bf16.msra.mxu0 %v578_v8  ;;  %v287_v17 = vmax.f32 %v285_v14, 0.0  ;;  %v288_v18 = vmax.f32 %v286_v15, 0.0 }
  0x19   : > { %538 = vmatprep.subr.bf16.mxu0 %v606_v1 }
  0x1a   : > { %v289_v20 = vpack.c.bf16 %v288_v18, %v287_v17 }
  0x1c   : > { %539 = vmatpush3.bf16.msra.mxu0 %v579_v12 }
  0x1d   : > { %540 = vmatprep.subr.bf16.mxu0 %v606_v1 }
  0x20   : > { %541 = vmatpush3.bf16.msra.mxu0 %v580_v16 }
  0x21   : > { %542 = vmatprep.subr.bf16.mxu0 %v606_v1 }
  0x24   : > { %543 = vmatpush3.bf16.msra.mxu0 %v581_v19 }
  0x27   : > { %545 = vmatmul.mubr.bf16.vlgmr.msra.gmra.mrb[0].mxu0 %v289_v20 }
  0xfa   : > { %v395_v22 = vpop.f32.mrb[0].mxu0 }
  0xfb   : > { %v396_v23 = vadd.f32 %v502_v21, %v395_v22  ;;  %v546_v24 = vpop.f32.mrb[1].mxu0 }
  0xfc   : > { %v398_v25 = vpop.f32.mrb[2].mxu0 }
  0xfd   : > { %402 = vst [vmem:[%s262_s30] sm:$0xff] %v396_v23  ;;  %v399_v26 = vadd.f32 %v502_v21, %v398_v25  ;;  %v547_v27 = vpop.f32.mrb[3].mxu0 }
  0xff   : > { %403 = vst [vmem:[%s262_s30 + $0x8] sm:$0xff] %v399_v26 }
 0x100 PF: > { %s15_s20 = sadd.s32 1, %s604_s20   ;;  %s714_s18 = smov %s600_s19 }
 0x101   : > { %p12_p5 = scmp.ge.s32.totalorder %s15_s20, 4   ;;  %s715_s19 = smov %s717_s21 }
 0x103   :  { %14 = sbr.rel (!%p12_p5) target bundleno = 2 (0x2), region = 70 }

// kernel: _lambda_.22
= control target key start
LH: loop header
LB: loop body
LE: loop exit
PB: predicated region body
PF: predicated region fallthrough
CT: control target
= control target key end

     0   :  { %s1199_s18 = smov 0   ;;  %s1201_s19 = smov 0   ;;  %s1328_s0 = inlined_call_operand.vmem [shape: bf16[2,32,16], index: 0, kind: input, shape index: {}, may-alias: {0,1}]   ;;  %s1329_s1 = inlined_call_operand.vmem [shape: bf16[2,32,16], index: 1, kind: input, shape index: {}, may-alias: {0,1}]   ;;  %s1330_s2 = inlined_call_operand.vmem [shape: bf16[7,16,128], index: 2, kind: input, shape index: {}]   ;;  %s1331_s3 = inlined_call_operand.vmem [shape: bf16[2,16,128], index: 3, kind: output, shape index: {0}]   ;;  %s1332_s4 = inlined_call_operand.vmem [shape: f32[2,1,1,128], index: 4, kind: output, shape index: {1}]   ;;  %s1333_s5 = inlined_call_operand.vmem [shape: f32[2,1,1,128], index: 5, kind: output, shape index: {2}]  }
   0x1   :  { %s1203_s20 = smov 0  }
   0x2 LB: > { %s28_s21 = sadd.s32 1, %s1161_s19  ;;  %p980_p0 = scmp.ge.s32.totalorder %s1165_s20, 1  ;;  %s1165_s20 = sphi %s1203_s20, %s16_s20   ;;  %s1161_s19 = sphi %s1201_s19, %s1335_s19   ;;  %s1157_s18 = sphi %s1199_s18, %s1334_s18  }
   0x3   : > { %p30_p1 = scmp.ge.s32.totalorder %s28_s21, 2  ;;  %p238_p2 = scmp.lt.s32.totalorder %s1165_s20, 3 }
   0x5   : > { %s1337_s21 = smov (%p30_p1, %s28_s21), 0  ;;  %p239_p3 = pnand %p980_p0, %p238_p2 }
   0x6   : > { %v1134_v0 = vld [vmem:[%s1330_s2 + $0x18] sm:$0xff] (!%p239_p3)   ;;  %v1167_v1 = vmov (!%p239_p3), 0.0   ;;  %v1135_v2 = vld [vmem:[%s1330_s2 + $0x8] sm:$0xff] (!%p239_p3)   ;;  %vm1168_vm0 = vmmov (!%p239_p3), 0   ;;  %p297_p4 = scmp.lt.s32.totalorder (!%p239_p3), %s1157_s18, 1  ;;  %v353_v3 = vlaneseq (!%p239_p3)  ;;  %vm368_vm3 = vcmask (!%p239_p3), 130048  }
   0x7   : > { %242 = sbr.rel (%p239_p3) target bundleno = 295 (0x127), region = 32  ;;  %1062 = vmatprep.subr.bf16.mxu0 (!%p239_p3), %v1167_v1  ;;  %1044 = vmatprep.subr.bf16.mxu1 (!%p239_p3), %v1167_v1  ;;  %v1136_v20 = vld [vmem:[%s1330_s2 + $0x20] sm:$0xff] (!%p239_p3)   ;;  %v1139_v30 = vld [vmem:[%s1330_s2 + $0x28] sm:$0xff] (!%p239_p3)   ;;  %v1140_v31 = vld [vmem:[%s1330_s2 + $0x10] sm:$0xff] (!%p239_p3)  }
   0x8   : > { %1063 = vmatpush3.bf16.msra.mxu0 (!%p239_p3), %v1134_v0  ;;  %1046 = vmatprep.mubr.msk.bf16.mxu1 (!%p239_p3), %vm1168_vm0, %v1167_v1  ;;  %v1234_v4 = vshrl.u32 (!%p239_p3), %v353_v3, 7  ;;  %v1137_v21 = vld [vmem:[%s1330_s2] sm:$0xff] (!%p239_p3)   ;;  %v1141_v44 = vld [vmem:[%s1330_s2 + $0x30] sm:$0xff] (!%p239_p3)  }
   0x9   : > { %1045 = vmatpush3.bf16.msra.mxu1 (!%p239_p3), %v1135_v2  ;;  %1064 = vmatprep.mubr.msk.bf16.mxu0 (!%p239_p3), %vm1168_vm0, %v1167_v1 }
   0xa   : > { %1068 = vmatprep.subr.bf16.mxu0 (!%p239_p3), %v1167_v1  ;;  %1050 = vmatprep.subr.bf16.mxu1 (!%p239_p3), %v1167_v1  ;;  %vm355_vm1 = vcmp.lt.s32.totalorder (!%p239_p3), %v1234_v4, 7  ;;  %vm528_vm2 = vcmp.lt.s32.totalorder (!%p239_p3), %v1234_v4, 5  ;;  %vm590_vm4 = vcmp.lt.s32.totalorder (!%p239_p3), %v1234_v4, 4  ;;  %vm466_vm5 = vcmp.lt.s32.totalorder (!%p239_p3), %v1234_v4, 6 }
   0xb   : > { %vm652_vm6 = vcmp.lt.s32.totalorder (!%p239_p3), %v1234_v4, 3  ;;  %vm714_vm7 = vcmp.lt.s32.totalorder (!%p239_p3), %v1234_v4, 2 }
   0xe   : > { %s1339_s18 = smov (!%p297_p4, %s1157_s18), 1 }
   0xf   : > { %s1018_s26 = sshll.u32 %s1339_s18, 4  ;;  %s1021_s23 = sshll.u32 %s1339_s18, 3 }
  0x10   : > { %s304_s29 = scalar_lea.vmem %s1328_s0, %s1018_s26  ;;  %s1020_s30 = sadd.s32 8, %s1018_s26 }
  0x11   : > { %s315_s8 = scalar_lea.vmem %s1329_s1, %s1020_s30  ;;  %v341_v5 = vld [vmem:[%s304_s29] sm:$0xff]   ;;  %s326_s26 = scalar_lea.vmem %s1331_s3, %s1021_s23 }
  0x12   : > { %v1242_v6 = vunpack.c.l.bf16 %v341_v5  ;;  %v1244_v7 = vunpack.c.h.bf16 %v341_v5  ;;  %v345_v8 = vld [vmem:[%s315_s8] sm:$0xf]  ;;  %s333_s29 = scalar_lea.vmem %s1332_s4, %s1339_s18  ;;  %s339_s7 = scalar_lea.vmem %s1333_s5, %s1339_s18 }
  0x13   : > { %v1246_v9 = vunpack.c.l.bf16 %v345_v8 }
  0x14   : > { %v350_v10 = vrot.slane %v1242_v6, 1  ;;  %v351_v11 = vrot.slane %v1244_v7, 1  ;;  %v525_v12 = vrot.slane %v1242_v6, 3  ;;  %v526_v13 = vrot.slane %v1244_v7, 3 }
  0x15   : > { %v352_v14 = vrot.slane %v1246_v9, 1  ;;  %v527_v15 = vrot.slane %v1246_v9, 3  ;;  %v587_v24 = vrot.slane %v1242_v6, 4  ;;  %v588_v25 = vrot.slane %v1244_v7, 4 }
  0x16   : > { %v357_v16 = vsel %vm355_vm1, %v350_v10, %v351_v11  ;;  %v530_v17 = vsel %vm528_vm2, %v525_v12, %v526_v13  ;;  %v589_v26 = vrot.slane %v1246_v9, 4  ;;  %v463_v32 = vrot.slane %v1242_v6, 2 }
  0x17   : > { %v356_v18 = vsel %vm355_vm1, %v351_v11, %v352_v14  ;;  %v529_v19 = vsel %vm528_vm2, %v526_v13, %v527_v15  ;;  %v592_v28 = vsel %vm590_vm4, %v587_v24, %v588_v25  ;;  %v464_v33 = vrot.slane %v1244_v7, 2 }
  0x18   : > { %v358_v22 = vpack.c.bf16 %v356_v18, %v357_v16  ;;  %v531_v23 = vpack.c.bf16 %v529_v19, %v530_v17  ;;  %v591_v27 = vsel %vm590_vm4, %v588_v25, %v589_v26  ;;  %v465_v34 = vrot.slane %v1246_v9, 2 }
  0x19   : > { %v593_v29 = vpack.c.bf16 %v591_v27, %v592_v28  ;;  %v649_v35 = vrot.slane %v1242_v6, 5  ;;  %v650_v36 = vrot.slane %v1244_v7, 5  ;;  %v651_v37 = vrot.slane %v1246_v9, 5 }
  0x1a   : > { %1047 = vmatmul.mubr.msk.bf16.vlgmr.msra.gmra.mrb[0].mxu1 %vm368_vm3, %v358_v22  ;;  %1065 = vmatmul.mubr.msk.bf16.vlgmr.msra.gmra.mrb[0].mxu0 %vm368_vm3, %v531_v23  ;;  %v467_v38 = vsel %vm466_vm5, %v464_v33, %v465_v34  ;;  %v468_v39 = vsel %vm466_vm5, %v463_v32, %v464_v33  ;;  %v711_v45 = vrot.slane %v1242_v6, 6  ;;  %v712_v46 = vrot.slane %v1244_v7, 6 }
  0x1b   : > { %1069 = vmatpush3.bf16.msra.mxu0 %v1136_v20  ;;  %1051 = vmatpush3.bf16.msra.mxu1 %v1137_v21  ;;  %v653_v40 = vsel %vm652_vm6, %v650_v36, %v651_v37  ;;  %v654_v41 = vsel %vm652_vm6, %v649_v35, %v650_v36  ;;  %v469_v42 = vpack.c.bf16 %v467_v38, %v468_v39  ;;  %v713_v47 = vrot.slane %v1246_v9, 6 }
  0x1c   : > { %1052 = vmatprep.mubr.msk.bf16.mxu1 %vm1168_vm0, %v1167_v1  ;;  %1070 = vmatprep.mubr.msk.bf16.mxu0 %vm1168_vm0, %v1167_v1  ;;  %v655_v43 = vpack.c.bf16 %v653_v40, %v654_v41  ;;  %v716_v49 = vsel %vm714_vm7, %v711_v45, %v712_v46 }
  0x1d   : > { %1074 = vmatprep.subr.bf16.mxu0 %v1167_v1  ;;  %1056 = vmatprep.subr.bf16.mxu1 %v1167_v1  ;;  %v715_v48 = vsel %vm714_vm7, %v712_v46, %v713_v47 }
  0x1e   : > { %v717_v50 = vpack.c.bf16 %v715_v48, %v716_v49 }
  0x26   : > { %1053 = vmatmul.mubr.msk.bf16.vlgmr.msra.gmra.mrb[0].mxu1 %vm368_vm3, %v341_v5  ;;  %1071 = vmatmul.mubr.msk.bf16.vlgmr.msra.gmra.mrb[0].mxu0 %vm368_vm3, %v593_v29 }
  0x27   : > { %1075 = vmatpush3.bf16.msra.mxu0 %v1139_v30  ;;  %1057 = vmatpush3.bf16.msra.mxu1 %v1140_v31 }
  0x28   : > { %1058 = vmatprep.mubr.msk.bf16.mxu1 %vm1168_vm0, %v1167_v1  ;;  %1076 = vmatprep.mubr.msk.bf16.mxu0 %vm1168_vm0, %v1167_v1 }
  0x29   : > { %1080 = vmatprep.subr.bf16.mxu0 %v1167_v1 }
  0x32   : > { %1059 = vmatmul.mubr.msk.bf16.vlgmr.msra.gmra.mrb[0].mxu1 %vm368_vm3, %v469_v42  ;;  %1077 = vmatmul.mubr.msk.bf16.vlgmr.msra.gmra.mrb[0].mxu0 %vm368_vm3, %v655_v43 }
  0x33   : > { %1081 = vmatpush3.bf16.msra.mxu0 %v1141_v44  ;;  %1082 = vmatprep.mubr.msk.bf16.mxu0 %vm1168_vm0, %v1167_v1 }
  0x3e   : > { %1083 = vmatmul.mubr.msk.bf16.vlgmr.msra.gmra.mrb[0].mxu0 %vm368_vm3, %v717_v50 }
 0x105   : > { %v516_v51 = vpop.f32.mrb[0].mxu1 }
 0x106   : > { %v1060_v52 = vpop.f32.mrb[1].mxu1 }
 0x107   : > { %v519_v53 = vpop.f32.mrb[2].mxu1 }
 0x108   : > { %v1061_v54 = vpop.f32.mrb[3].mxu1 }
 0x111   : > { %v764_v55 = vpop.f32.mrb[0].mxu0 }
 0x112   : > { %v1086_v56 = vadd.f32 %v764_v55, %v516_v51  ;;  %v1084_v57 = vpop.f32.mrb[1].mxu0 }
 0x113   : > { %v767_v58 = vpop.f32.mrb[2].mxu0 }
 0x114   : > { %v1087_v59 = vadd.f32 %v767_v58, %v519_v53  ;;  %v1085_v60 = vpop.f32.mrb[3].mxu0  ;;  %v791_v61 = vmul.f32 %v1086_v56, %v1086_v56 }
 0x116   : > { %v1027_v62 = vpack.c.bf16 %v1087_v59, %v1086_v56  ;;  %v783_v63 = vadd.f32 %v1087_v59, %v1086_v56  ;;  %v792_v0 = vmul.f32 %v1087_v59, %v1087_v59 }
 0x118   : > { %1028 = vst [vmem:[%s326_s26] sm:$0xff] %v1027_v62   ;;  %v784_v1 = vrot.slane %v783_v63, 4  ;;  %v793_v2 = vadd.f32 %v792_v0, %v791_v61 }
 0x11a   : > { %v785_v3 = vadd.f32 %v784_v1, %v783_v63  ;;  %v794_v4 = vrot.slane %v793_v2, 4 }
 0x11c   : > { %v786_v5 = vrot.slane %v785_v3, 2  ;;  %v795_v6 = vadd.f32 %v794_v4, %v793_v2 }
 0x11e   : > { %v787_v7 = vadd.f32 %v786_v5, %v785_v3  ;;  %v796_v8 = vrot.slane %v795_v6, 2 }
 0x120   : > { %v788_v9 = vrot.slane %v787_v7, 1  ;;  %v797_v10 = vadd.f32 %v796_v8, %v795_v6 }
 0x122   : > { %v789_v11 = vadd.f32 %v788_v9, %v787_v7  ;;  %v798_v12 = vrot.slane %v797_v10, 1 }
 0x124   : > { %790 = vst [vmem:[%s333_s29] sm:$0x1] %v789_v11  ;;  %v799_v13 = vadd.f32 %v798_v12, %v797_v10 }
 0x126   : > { %800 = vst [vmem:[%s339_s7] sm:$0x1] %v799_v13 }
 0x127 PF: > { %s16_s20 = sadd.s32 1, %s1165_s20   ;;  %s1334_s18 = smov %s1161_s19 }
 0x128   : > { %p13_p5 = scmp.ge.s32.totalorder %s16_s20, 4   ;;  %s1335_s19 = smov %s1337_s21 }
 0x12a   :  { %15 = sbr.rel (!%p13_p5) target bundleno = 2 (0x2), region = 95 }

</bundles_post_ra>
